<compile_context>
chip_gen: v6e
topology: v6e:2x2x1
jax: 0.10.0
libtpu: 0.0.40
codegen_flags: <defaults>
</compile_context>

<pallas_src>
import numpy as np
import jax
import jax.numpy as jnp
from jax import lax
from jax.experimental import pallas as pl
from jax.experimental.pallas import tpu as pltpu

F32 = jnp.float32
LANES = 128
MAX_LANE_GROUPS = 4        # <= 512 images per grid step (keeps vreg pressure low)
_WIN = 12                  # input rows covered by one conv(11) + pool row pair


# ---------------------------------------------------------------------------
# Static (shape-only) index lists for the Toeplitz LHS matrices, built once.
# ---------------------------------------------------------------------------
def _pool_conv_indices(hw, wal, k, br):
    """Indices for the fused conv(k,'same') + 2x2 max-pool Toeplitz LHS.

    LHS[j] has shape (4*br, _WIN*wal); row blk*br + t holds the coefficients
    producing conv(y=2j+dy, x=2t+px) from the 12-row input slab starting at
    plane row starts[j] (plane rows are wal-strided, batch on lanes).
    """
    p = k // 2
    starts, rows, cols, widx = [], [], [], []
    for j in range(hw // 2):
        s = min(max(2 * j - p, 0), hw - _WIN)
        starts.append(s)
        for blk, (dy, px) in enumerate(((0, 0), (0, 1), (1, 0), (1, 1))):
            y = 2 * j + dy
            for t in range(hw // 2):
                xx = 2 * t + px
                for ky in range(k):
                    iy = y + ky - p
                    if iy < 0 or iy >= hw:
                        continue
                    for kx in range(k):
                        ix = xx + kx - p
                        if ix < 0 or ix >= hw:
                            continue
                        rows.append(j * 4 * br + blk * br + t)
                        cols.append((iy - s) * wal + ix)
                        widx.append(ky * k + kx)
    return tuple(starts), np.asarray(rows), np.asarray(cols), np.asarray(widx)


def _conv3_head_indices():
    """Indices for the (490, 64) conv3 Toeplitz with flatten-ordered rows."""
    rows, cols, widx = [], [], []
    for c in range(10):
        for oy in range(7):
            for ox in range(7):
                r = c * 49 + oy * 7 + ox
                for ky in range(5):
                    iy = oy + ky - 2
                    if iy < 0 or iy >= 7:
                        continue
                    for kx in range(5):
                        ix = ox + kx - 2
                        if ix < 0 or ix >= 7:
                            continue
                        rows.append(r)
                        cols.append(iy * 8 + ix)
                        widx.append((c * 5 + ky) * 5 + kx)
    return np.asarray(rows), np.asarray(cols), np.asarray(widx)


_C1_STARTS, _C1_ROWS, _C1_COLS, _C1_WIDX = _pool_conv_indices(28, 32, 11, 16)
_C2_STARTS, _C2_ROWS, _C2_COLS, _C2_WIDX = _pool_conv_indices(14, 16, 11, 8)
_C3_ROWS, _C3_COLS, _C3_WIDX = _conv3_head_indices()


# ---------------------------------------------------------------------------
# Wrapper-side (tiny, XLA) weight -> Toeplitz-LHS construction.
# ---------------------------------------------------------------------------
def _build_pool_lhs(w, rows, cols, widx, hw, wal, br):
    flat = jnp.zeros((hw // 2 * 4 * br, _WIN * wal), F32)
    flat = flat.at[rows, cols].set(w.reshape(-1).astype(F32)[widx])
    return flat.reshape(hw // 2, 4 * br, _WIN * wal)


def _build_head_lhs(w3, b3, lw1, lb1):
    # conv3 (10ch, 5x5 'same') as a (490, 64) matmul over the 7x8 pool2 plane,
    # with the conv bias in column 56 (fed by a constant-one plane row), then
    # algebraically folded with Flatten + Linear(490, 50).
    t3 = jnp.zeros((490, 64), F32)
    t3 = t3.at[_C3_ROWS, _C3_COLS].set(w3.reshape(-1).astype(F32)[_C3_WIDX])
    t3 = t3.at[:, 56].set(jnp.repeat(b3.astype(F32), 49))
    m1 = lw1.astype(F32) @ t3                       # (50, 64)
    return m1.at[:, 56].add(lb1.astype(F32))        # fold Linear1 bias too


# ---------------------------------------------------------------------------
# The kernel: whole network for one batch tile (TB images on the lanes).
# ---------------------------------------------------------------------------
def _mnist_kernel(x_ref, t1_ref, t2_ref, m1_ref, lw2_ref, lb2_ref, b12_ref,
                  o_ref, p2_ref, p3_ref):
    # x_ref : (896, TB)  = 28 input rows x 32-aligned cols (cols 28..31 zero)
    # t1_ref: (14, 64, 384), t2_ref: (7, 32, 192)  Toeplitz conv+pool LHS
    # m1_ref: (50, 64)   folded conv3+Flatten+Linear1 LHS
    # lw2_ref: (10, 50), lb2_ref: (10, 1), b12_ref: SMEM (2,) = (b1, b2)
    # o_ref : (10, TB) logits (lane dense)
    # p2_ref: (224, TB) pool1 plane (14 rows x 16-wide), p3_ref: (64, TB) pool2
    tb = x_ref.shape[1]
    b1 = b12_ref[0]
    b2 = b12_ref[1]

    # --- conv1 (11x11 'same') + ReLU + 2x2 max-pool: 28x28 -> 14x14 (MXU) ----
    for j in range(14):                                          # fully unrolled
        slab = x_ref[pl.ds(_C1_STARTS[j] * 32, _WIN * 32), :]            # (384, TB)
        out = jnp.dot(t1_ref[j], slab, preferred_element_type=F32)       # (64, TB)
        m = jnp.maximum(jnp.maximum(out[0:16], out[16:32]),
                        jnp.maximum(out[32:48], out[48:64]))             # (16, TB)
        # relu(maxpool(conv) + b) == maxpool(relu(conv + b))  (monotone)
        p2_ref[pl.ds(j * 16, 16), :] = jnp.maximum(m + b1, 0.0)

    # --- conv2 (11x11 'same') + ReLU + 2x2 max-pool: 14x14 -> 7x7 (MXU) ------
    for j in range(7):
        slab = p2_ref[pl.ds(_C2_STARTS[j] * 16, _WIN * 16), :]           # (192, TB)
        out = jnp.dot(t2_ref[j], slab, preferred_element_type=F32)       # (32, TB)
        m = jnp.maximum(jnp.maximum(out[0:8], out[8:16]),
                        jnp.maximum(out[16:24], out[24:32]))             # (8, TB)
        p3_ref[pl.ds(j * 8, 8), :] = jnp.maximum(m + b2, 0.0)

    # constant-one rows feeding the folded conv3 / Linear1 bias column (col 56)
    p3_ref[pl.ds(56, 8), :] = jnp.ones((8, tb), F32)

    # --- conv3 + Flatten + Linear(490,50) (folded) + ReLU + Linear(50,10) ----
    h = jnp.maximum(jnp.dot(m1_ref[...], p3_ref[...],
                            preferred_element_type=F32), 0.0)            # (50, TB)
    logits = jnp.dot(lw2_ref[...], h, preferred_element_type=F32)        # (10, TB)
    o_ref[...] = logits + lb2_ref[...]


# ---------------------------------------------------------------------------
# Host wrapper.
# ---------------------------------------------------------------------------
def _choose_tiles(n):
    """Batch tile size: >= 2 grid steps whenever N > 128 (v7x megacore)."""
    n128 = max(1, (n + LANES - 1) // LANES)
    if n128 == 1:
        return 1, LANES
    gb = max(2, (n128 + MAX_LANE_GROUPS - 1) // MAX_LANE_GROUPS)
    tbg = (n128 + gb - 1) // gb
    return gb, tbg * LANES


def mnist_conv5_forward(x, params):
    """x: (N, 1, 28, 28) float32 (NCHW, like PyTorch).  Returns (N, 10)."""
    (w1, b1, w2, b2, w3, b3, lw1, lb1, lw2, lb2) = params
    n = x.shape[0]
    gb, tb = _choose_tiles(n)
    npad = gb * tb

    # (N,1,28,28) -> (896, npad): batch on the lanes, W zero-padded 28 -> 32.
    x2 = x[:, 0].astype(F32)
    x2 = jnp.pad(x2, ((0, npad - n), (0, 0), (0, 4)))
    x4 = jnp.transpose(x2, (1, 2, 0)).reshape(28 * 32, npad)

    t1 = _build_pool_lhs(w1, _C1_ROWS, _C1_COLS, _C1_WIDX, 28, 32, 16)
    t2 = _build_pool_lhs(w2, _C2_ROWS, _C2_COLS, _C2_WIDX, 14, 16, 8)
    m1 = _build_head_lhs(w3, b3, lw1, lb1)
    b12 = jnp.concatenate([b1.reshape(1), b2.reshape(1)]).astype(F32)

    out = pl.pallas_call(
        _mnist_kernel,
        out_shape=jax.ShapeDtypeStruct((10, npad), F32),
        grid=(gb,),
        in_specs=[
            pl.BlockSpec((28 * 32, tb), lambda i: (0, i)),         # x tile
            pl.BlockSpec((14, 64, _WIN * 32), lambda i: (0, 0, 0)),  # t1
            pl.BlockSpec((7, 32, _WIN * 16), lambda i: (0, 0, 0)),   # t2
            pl.BlockSpec((50, 64), lambda i: (0, 0)),              # folded conv3+fc1
            pl.BlockSpec((10, 50), lambda i: (0, 0)),              # lw2
            pl.BlockSpec((10, 1), lambda i: (0, 0)),               # lb2 column
            pl.BlockSpec(memory_space=pltpu.MemorySpace.SMEM),     # (b1, b2)
        ],
        out_specs=pl.BlockSpec((10, tb), lambda i: (0, i)),
        scratch_shapes=[
            pltpu.VMEM((14 * 16, tb), F32),   # pool1 plane: 14 rows x 16 cols
            pltpu.VMEM((64, tb), F32),        # pool2 plane (7x8) + ones rows
        ],
        compiler_params=pltpu.CompilerParams(
            dimension_semantics=("parallel",),
            vmem_limit_bytes=32 * 1024 * 1024),
    )(x4, t1, t2, m1, lw2.astype(F32), lb2.reshape(10, 1).astype(F32), b12)

    return jnp.transpose(out)[:n]


# ---------------------------------------------------------------------------
# Pure-JAX reference matching the PyTorch module semantics.
# ---------------------------------------------------------------------------
def reference_forward(x, params):
    (w1, b1, w2, b2, w3, b3, lw1, lb1, lw2, lb2) = params
    dn = ('NCHW', 'OIHW', 'NCHW')
    out = lax.conv_general_dilated(x, w1, (1, 1), 'SAME',
                                   dimension_numbers=dn) + b1.reshape(1, 1, 1, 1)
    out = jnp.maximum(out, 0.0)
    out = lax.reduce_window(out, -jnp.inf, lax.max, (1, 1, 2, 2), (1, 1, 2, 2), 'VALID')
    out = lax.conv_general_dilated(out, w2, (1, 1), 'SAME',
                                   dimension_numbers=dn) + b2.reshape(1, 1, 1, 1)
    out = jnp.maximum(out, 0.0)
    out = lax.reduce_window(out, -jnp.inf, lax.max, (1, 1, 2, 2), (1, 1, 2, 2), 'VALID')
    out = lax.conv_general_dilated(out, w3, (1, 1), 'SAME',
                                   dimension_numbers=dn) + b3.reshape(1, 10, 1, 1)
    flat = out.reshape(x.shape[0], 490)
    h = jnp.maximum(flat @ lw1.T + lb1, 0.0)
    return h @ lw2.T + lb2


def init_params(key):
    ks = jax.random.split(key, 10)
    w1 = jax.random.normal(ks[0], (1, 1, 11, 11), F32) * 0.08    # Conv2d(1,1,11)
    b1 = jax.random.normal(ks[1], (1,), F32) * 0.1
    w2 = jax.random.normal(ks[2], (1, 1, 11, 11), F32) * 0.08    # Conv2d(1,1,11)
    b2 = jax.random.normal(ks[3], (1,), F32) * 0.1
    w3 = jax.random.normal(ks[4], (10, 1, 5, 5), F32) * 0.15     # Conv2d(1,10,5)
    b3 = jax.random.normal(ks[5], (10,), F32) * 0.1
    lw1 = jax.random.normal(ks[6], (50, 490), F32) * 0.05        # Linear(490,50)
    lb1 = jax.random.normal(ks[7], (50,), F32) * 0.1
    lw2 = jax.random.normal(ks[8], (10, 50), F32) * 0.1          # Linear(50,10)
    lb2 = jax.random.normal(ks[9], (10,), F32) * 0.1
    return (w1, b1, w2, b2, w3, b3, lw1, lb1, lw2, lb2)


if __name__ == "__main__":
    key = jax.random.PRNGKey(0)
    pkey, xkey = jax.random.split(key)
    params = init_params(pkey)
    # MNIST-shaped input implied by Linear(in_features=490): (N, 1, 28, 28).
    x = jax.random.normal(xkey, (2, 1, 28, 28), F32)

    out = jax.block_until_ready(mnist_conv5_forward(x, params))
    ref = jax.block_until_ready(reference_forward(x, params))
    # Tolerance covers MXU vs. XLA-conv f32 rounding-mode differences.
    np.testing.assert_allclose(np.asarray(out), np.asarray(ref),
                               rtol=5e-3, atol=5e-3)
    print("KERNEL_OK")
</pallas_src>

<mosaic_0001>
module attributes {stable_mosaic.version = 11 : i64} {
  func.func @_mnist_kernel(%arg0: i32, %arg1: memref<896x128xf32, #tpu.memory_space<vmem>>, %arg2: memref<14x64x384xf32, #tpu.memory_space<vmem>>, %arg3: memref<7x32x192xf32, #tpu.memory_space<vmem>>, %arg4: memref<50x64xf32, #tpu.memory_space<vmem>>, %arg5: memref<10x50xf32, #tpu.memory_space<vmem>>, %arg6: memref<10x1xf32, #tpu.memory_space<vmem>>, %arg7: memref<2xf32, #tpu.memory_space<smem>>, %arg8: memref<10x128xf32, #tpu.memory_space<vmem>>, %arg9: memref<224x128xf32, #tpu.memory_space<vmem>>, %arg10: memref<64x128xf32, #tpu.memory_space<vmem>>) attributes {dimension_semantics = [#tpu.dimension_semantics<parallel>], iteration_bounds = array<i64: 1>, scalar_prefetch = 0 : i64, scratch_operands = 2 : i64, tpu.core_type = #tpu.core_type<tc>, window_params = [{transform_indices = @transform_0, window_bounds = array<i64: 896, 128>}, {pipeline_mode = #tpu.pipeline_mode<synchronous>, transform_indices = @transform_1, window_bounds = array<i64: 14, 64, 384>}, {pipeline_mode = #tpu.pipeline_mode<synchronous>, transform_indices = @transform_2, window_bounds = array<i64: 7, 32, 192>}, {pipeline_mode = #tpu.pipeline_mode<synchronous>, transform_indices = @transform_3, window_bounds = array<i64: 50, 64>}, {pipeline_mode = #tpu.pipeline_mode<synchronous>, transform_indices = @transform_4, window_bounds = array<i64: 10, 50>}, {pipeline_mode = #tpu.pipeline_mode<synchronous>, transform_indices = @transform_5, window_bounds = array<i64: 10, 1>}, {transform_indices = @transform_6, window_bounds = array<i64: 2>}, {transform_indices = @transform_7, window_bounds = array<i64: 10, 128>}]} {
    %c0 = arith.constant 0 : index
    %0 = memref.load %arg7[%c0] : memref<2xf32, #tpu.memory_space<smem>>
    %c1 = arith.constant 1 : index
    %1 = memref.load %arg7[%c1] : memref<2xf32, #tpu.memory_space<smem>>
    %c0_0 = arith.constant 0 : index
    %c0_1 = arith.constant 0 : index
    %2 = vector.load %arg1[%c0_0, %c0_1] : memref<896x128xf32, #tpu.memory_space<vmem>>, vector<384x128xf32>
    %c0_2 = arith.constant 0 : index
    %c0_3 = arith.constant 0 : index
    %c0_4 = arith.constant 0 : index
    %3 = vector.load %arg2[%c0_2, %c0_3, %c0_4] : memref<14x64x384xf32, #tpu.memory_space<vmem>>, vector<1x64x384xf32>
    %4 = vector.shape_cast %3 : vector<1x64x384xf32> to vector<64x384xf32>
    %cst = arith.constant dense<0.000000e+00> : vector<64x128xf32>
    %5 = tpu.matmul %4, %2, %cst {dimension_numbers = #tpu.dot_dimension_numbers<[1], [0], [0], [1], [0, 0, 1, 1], [], []>} : vector<64x384xf32>, vector<384x128xf32>, vector<64x128xf32> -> vector<64x128xf32>
    %6 = vector.extract_strided_slice %5 {offsets = [0, 0], sizes = [16, 128], strides = [1, 1]} : vector<64x128xf32> to vector<16x128xf32>
    %7 = vector.extract_strided_slice %5 {offsets = [16, 0], sizes = [16, 128], strides = [1, 1]} : vector<64x128xf32> to vector<16x128xf32>
    %8 = arith.maximumf %6, %7 : vector<16x128xf32>
    %9 = vector.extract_strided_slice %5 {offsets = [32, 0], sizes = [16, 128], strides = [1, 1]} : vector<64x128xf32> to vector<16x128xf32>
    %10 = vector.extract_strided_slice %5 {offsets = [48, 0], sizes = [16, 128], strides = [1, 1]} : vector<64x128xf32> to vector<16x128xf32>
    %11 = arith.maximumf %9, %10 : vector<16x128xf32>
    %12 = arith.maximumf %8, %11 : vector<16x128xf32>
    %13 = vector.broadcast %0 : f32 to vector<16x128xf32>
    %14 = arith.addf %12, %13 : vector<16x128xf32>
    %cst_5 = arith.constant 0.000000e+00 : f32
    %15 = vector.broadcast %cst_5 : f32 to vector<16x128xf32>
    %16 = arith.maximumf %14, %15 : vector<16x128xf32>
    %c0_6 = arith.constant 0 : index
    %c0_7 = arith.constant 0 : index
    %17 = vector.load %arg9[%c0_6, %c0_7] : memref<224x128xf32, #tpu.memory_space<vmem>>, vector<16x128xf32>
    tpu.vector_store %arg9[%c0_6, %c0_7], %16 {strides = array<i32>} : memref<224x128xf32, #tpu.memory_space<vmem>>, vector<16x128xf32>,
    %c0_8 = arith.constant 0 : index
    %c0_9 = arith.constant 0 : index
    %18 = vector.load %arg1[%c0_8, %c0_9] : memref<896x128xf32, #tpu.memory_space<vmem>>, vector<384x128xf32>
    %c1_10 = arith.constant 1 : index
    %c0_11 = arith.constant 0 : index
    %c0_12 = arith.constant 0 : index
    %19 = vector.load %arg2[%c1_10, %c0_11, %c0_12] : memref<14x64x384xf32, #tpu.memory_space<vmem>>, vector<1x64x384xf32>
    %20 = vector.shape_cast %19 : vector<1x64x384xf32> to vector<64x384xf32>
    %cst_13 = arith.constant dense<0.000000e+00> : vector<64x128xf32>
    %21 = tpu.matmul %20, %18, %cst_13 {dimension_numbers = #tpu.dot_dimension_numbers<[1], [0], [0], [1], [0, 0, 1, 1], [], []>} : vector<64x384xf32>, vector<384x128xf32>, vector<64x128xf32> -> vector<64x128xf32>
    %22 = vector.extract_strided_slice %21 {offsets = [0, 0], sizes = [16, 128], strides = [1, 1]} : vector<64x128xf32> to vector<16x128xf32>
    %23 = vector.extract_strided_slice %21 {offsets = [16, 0], sizes = [16, 128], strides = [1, 1]} : vector<64x128xf32> to vector<16x128xf32>
    %24 = arith.maximumf %22, %23 : vector<16x128xf32>
    %25 = vector.extract_strided_slice %21 {offsets = [32, 0], sizes = [16, 128], strides = [1, 1]} : vector<64x128xf32> to vector<16x128xf32>
    %26 = vector.extract_strided_slice %21 {offsets = [48, 0], sizes = [16, 128], strides = [1, 1]} : vector<64x128xf32> to vector<16x128xf32>
    %27 = arith.maximumf %25, %26 : vector<16x128xf32>
    %28 = arith.maximumf %24, %27 : vector<16x128xf32>
    %29 = vector.broadcast %0 : f32 to vector<16x128xf32>
    %30 = arith.addf %28, %29 : vector<16x128xf32>
    %cst_14 = arith.constant 0.000000e+00 : f32
    %31 = vector.broadcast %cst_14 : f32 to vector<16x128xf32>
    %32 = arith.maximumf %30, %31 : vector<16x128xf32>
    %c16 = arith.constant 16 : index
    %c0_15 = arith.constant 0 : index
    %33 = vector.load %arg9[%c16, %c0_15] : memref<224x128xf32, #tpu.memory_space<vmem>>, vector<16x128xf32>
    tpu.vector_store %arg9[%c16, %c0_15], %32 {strides = array<i32>} : memref<224x128xf32, #tpu.memory_space<vmem>>, vector<16x128xf32>,
    %c0_16 = arith.constant 0 : index
    %c0_17 = arith.constant 0 : index
    %34 = vector.load %arg1[%c0_16, %c0_17] : memref<896x128xf32, #tpu.memory_space<vmem>>, vector<384x128xf32>
    %c2 = arith.constant 2 : index
    %c0_18 = arith.constant 0 : index
    %c0_19 = arith.constant 0 : index
    %35 = vector.load %arg2[%c2, %c0_18, %c0_19] : memref<14x64x384xf32, #tpu.memory_space<vmem>>, vector<1x64x384xf32>
    %36 = vector.shape_cast %35 : vector<1x64x384xf32> to vector<64x384xf32>
    %cst_20 = arith.constant dense<0.000000e+00> : vector<64x128xf32>
    %37 = tpu.matmul %36, %34, %cst_20 {dimension_numbers = #tpu.dot_dimension_numbers<[1], [0], [0], [1], [0, 0, 1, 1], [], []>} : vector<64x384xf32>, vector<384x128xf32>, vector<64x128xf32> -> vector<64x128xf32>
    %38 = vector.extract_strided_slice %37 {offsets = [0, 0], sizes = [16, 128], strides = [1, 1]} : vector<64x128xf32> to vector<16x128xf32>
    %39 = vector.extract_strided_slice %37 {offsets = [16, 0], sizes = [16, 128], strides = [1, 1]} : vector<64x128xf32> to vector<16x128xf32>
    %40 = arith.maximumf %38, %39 : vector<16x128xf32>
    %41 = vector.extract_strided_slice %37 {offsets = [32, 0], sizes = [16, 128], strides = [1, 1]} : vector<64x128xf32> to vector<16x128xf32>
    %42 = vector.extract_strided_slice %37 {offsets = [48, 0], sizes = [16, 128], strides = [1, 1]} : vector<64x128xf32> to vector<16x128xf32>
    %43 = arith.maximumf %41, %42 : vector<16x128xf32>
    %44 = arith.maximumf %40, %43 : vector<16x128xf32>
    %45 = vector.broadcast %0 : f32 to vector<16x128xf32>
    %46 = arith.addf %44, %45 : vector<16x128xf32>
    %cst_21 = arith.constant 0.000000e+00 : f32
    %47 = vector.broadcast %cst_21 : f32 to vector<16x128xf32>
    %48 = arith.maximumf %46, %47 : vector<16x128xf32>
    %c32 = arith.constant 32 : index
    %c0_22 = arith.constant 0 : index
    %49 = vector.load %arg9[%c32, %c0_22] : memref<224x128xf32, #tpu.memory_space<vmem>>, vector<16x128xf32>
    tpu.vector_store %arg9[%c32, %c0_22], %48 {strides = array<i32>} : memref<224x128xf32, #tpu.memory_space<vmem>>, vector<16x128xf32>,
    %c32_23 = arith.constant 32 : index
    %c0_24 = arith.constant 0 : index
    %50 = vector.load %arg1[%c32_23, %c0_24] : memref<896x128xf32, #tpu.memory_space<vmem>>, vector<384x128xf32>
    %c3 = arith.constant 3 : index
    %c0_25 = arith.constant 0 : index
    %c0_26 = arith.constant 0 : index
    %51 = vector.load %arg2[%c3, %c0_25, %c0_26] : memref<14x64x384xf32, #tpu.memory_space<vmem>>, vector<1x64x384xf32>
    %52 = vector.shape_cast %51 : vector<1x64x384xf32> to vector<64x384xf32>
    %cst_27 = arith.constant dense<0.000000e+00> : vector<64x128xf32>
    %53 = tpu.matmul %52, %50, %cst_27 {dimension_numbers = #tpu.dot_dimension_numbers<[1], [0], [0], [1], [0, 0, 1, 1], [], []>} : vector<64x384xf32>, vector<384x128xf32>, vector<64x128xf32> -> vector<64x128xf32>
    %54 = vector.extract_strided_slice %53 {offsets = [0, 0], sizes = [16, 128], strides = [1, 1]} : vector<64x128xf32> to vector<16x128xf32>
    %55 = vector.extract_strided_slice %53 {offsets = [16, 0], sizes = [16, 128], strides = [1, 1]} : vector<64x128xf32> to vector<16x128xf32>
    %56 = arith.maximumf %54, %55 : vector<16x128xf32>
    %57 = vector.extract_strided_slice %53 {offsets = [32, 0], sizes = [16, 128], strides = [1, 1]} : vector<64x128xf32> to vector<16x128xf32>
    %58 = vector.extract_strided_slice %53 {offsets = [48, 0], sizes = [16, 128], strides = [1, 1]} : vector<64x128xf32> to vector<16x128xf32>
    %59 = arith.maximumf %57, %58 : vector<16x128xf32>
    %60 = arith.maximumf %56, %59 : vector<16x128xf32>
    %61 = vector.broadcast %0 : f32 to vector<16x128xf32>
    %62 = arith.addf %60, %61 : vector<16x128xf32>
    %cst_28 = arith.constant 0.000000e+00 : f32
    %63 = vector.broadcast %cst_28 : f32 to vector<16x128xf32>
    %64 = arith.maximumf %62, %63 : vector<16x128xf32>
    %c48 = arith.constant 48 : index
    %c0_29 = arith.constant 0 : index
    %65 = vector.load %arg9[%c48, %c0_29] : memref<224x128xf32, #tpu.memory_space<vmem>>, vector<16x128xf32>
    tpu.vector_store %arg9[%c48, %c0_29], %64 {strides = array<i32>} : memref<224x128xf32, #tpu.memory_space<vmem>>, vector<16x128xf32>,
    %c96 = arith.constant 96 : index
    %c0_30 = arith.constant 0 : index
    %66 = vector.load %arg1[%c96, %c0_30] : memref<896x128xf32, #tpu.memory_space<vmem>>, vector<384x128xf32>
    %c4 = arith.constant 4 : index
    %c0_31 = arith.constant 0 : index
    %c0_32 = arith.constant 0 : index
    %67 = vector.load %arg2[%c4, %c0_31, %c0_32] : memref<14x64x384xf32, #tpu.memory_space<vmem>>, vector<1x64x384xf32>
    %68 = vector.shape_cast %67 : vector<1x64x384xf32> to vector<64x384xf32>
    %cst_33 = arith.constant dense<0.000000e+00> : vector<64x128xf32>
    %69 = tpu.matmul %68, %66, %cst_33 {dimension_numbers = #tpu.dot_dimension_numbers<[1], [0], [0], [1], [0, 0, 1, 1], [], []>} : vector<64x384xf32>, vector<384x128xf32>, vector<64x128xf32> -> vector<64x128xf32>
    %70 = vector.extract_strided_slice %69 {offsets = [0, 0], sizes = [16, 128], strides = [1, 1]} : vector<64x128xf32> to vector<16x128xf32>
    %71 = vector.extract_strided_slice %69 {offsets = [16, 0], sizes = [16, 128], strides = [1, 1]} : vector<64x128xf32> to vector<16x128xf32>
    %72 = arith.maximumf %70, %71 : vector<16x128xf32>
    %73 = vector.extract_strided_slice %69 {offsets = [32, 0], sizes = [16, 128], strides = [1, 1]} : vector<64x128xf32> to vector<16x128xf32>
    %74 = vector.extract_strided_slice %69 {offsets = [48, 0], sizes = [16, 128], strides = [1, 1]} : vector<64x128xf32> to vector<16x128xf32>
    %75 = arith.maximumf %73, %74 : vector<16x128xf32>
    %76 = arith.maximumf %72, %75 : vector<16x128xf32>
    %77 = vector.broadcast %0 : f32 to vector<16x128xf32>
    %78 = arith.addf %76, %77 : vector<16x128xf32>
    %cst_34 = arith.constant 0.000000e+00 : f32
    %79 = vector.broadcast %cst_34 : f32 to vector<16x128xf32>
    %80 = arith.maximumf %78, %79 : vector<16x128xf32>
    %c64 = arith.constant 64 : index
    %c0_35 = arith.constant 0 : index
    %81 = vector.load %arg9[%c64, %c0_35] : memref<224x128xf32, #tpu.memory_space<vmem>>, vector<16x128xf32>
    tpu.vector_store %arg9[%c64, %c0_35], %80 {strides = array<i32>} : memref<224x128xf32, #tpu.memory_space<vmem>>, vector<16x128xf32>,
    %c160 = arith.constant 160 : index
    %c0_36 = arith.constant 0 : index
    %82 = vector.load %arg1[%c160, %c0_36] : memref<896x128xf32, #tpu.memory_space<vmem>>, vector<384x128xf32>
    %c5 = arith.constant 5 : index
    %c0_37 = arith.constant 0 : index
    %c0_38 = arith.constant 0 : index
    %83 = vector.load %arg2[%c5, %c0_37, %c0_38] : memref<14x64x384xf32, #tpu.memory_space<vmem>>, vector<1x64x384xf32>
    %84 = vector.shape_cast %83 : vector<1x64x384xf32> to vector<64x384xf32>
    %cst_39 = arith.constant dense<0.000000e+00> : vector<64x128xf32>
    %85 = tpu.matmul %84, %82, %cst_39 {dimension_numbers = #tpu.dot_dimension_numbers<[1], [0], [0], [1], [0, 0, 1, 1], [], []>} : vector<64x384xf32>, vector<384x128xf32>, vector<64x128xf32> -> vector<64x128xf32>
    %86 = vector.extract_strided_slice %85 {offsets = [0, 0], sizes = [16, 128], strides = [1, 1]} : vector<64x128xf32> to vector<16x128xf32>
    %87 = vector.extract_strided_slice %85 {offsets = [16, 0], sizes = [16, 128], strides = [1, 1]} : vector<64x128xf32> to vector<16x128xf32>
    %88 = arith.maximumf %86, %87 : vector<16x128xf32>
    %89 = vector.extract_strided_slice %85 {offsets = [32, 0], sizes = [16, 128], strides = [1, 1]} : vector<64x128xf32> to vector<16x128xf32>
    %90 = vector.extract_strided_slice %85 {offsets = [48, 0], sizes = [16, 128], strides = [1, 1]} : vector<64x128xf32> to vector<16x128xf32>
    %91 = arith.maximumf %89, %90 : vector<16x128xf32>
    %92 = arith.maximumf %88, %91 : vector<16x128xf32>
    %93 = vector.broadcast %0 : f32 to vector<16x128xf32>
    %94 = arith.addf %92, %93 : vector<16x128xf32>
    %cst_40 = arith.constant 0.000000e+00 : f32
    %95 = vector.broadcast %cst_40 : f32 to vector<16x128xf32>
    %96 = arith.maximumf %94, %95 : vector<16x128xf32>
    %c80 = arith.constant 80 : index
    %c0_41 = arith.constant 0 : index
    %97 = vector.load %arg9[%c80, %c0_41] : memref<224x128xf32, #tpu.memory_space<vmem>>, vector<16x128xf32>
    tpu.vector_store %arg9[%c80, %c0_41], %96 {strides = array<i32>} : memref<224x128xf32, #tpu.memory_space<vmem>>, vector<16x128xf32>,
    %c224 = arith.constant 224 : index
    %c0_42 = arith.constant 0 : index
    %98 = vector.load %arg1[%c224, %c0_42] : memref<896x128xf32, #tpu.memory_space<vmem>>, vector<384x128xf32>
    %c6 = arith.constant 6 : index
    %c0_43 = arith.constant 0 : index
    %c0_44 = arith.constant 0 : index
    %99 = vector.load %arg2[%c6, %c0_43, %c0_44] : memref<14x64x384xf32, #tpu.memory_space<vmem>>, vector<1x64x384xf32>
    %100 = vector.shape_cast %99 : vector<1x64x384xf32> to vector<64x384xf32>
    %cst_45 = arith.constant dense<0.000000e+00> : vector<64x128xf32>
    %101 = tpu.matmul %100, %98, %cst_45 {dimension_numbers = #tpu.dot_dimension_numbers<[1], [0], [0], [1], [0, 0, 1, 1], [], []>} : vector<64x384xf32>, vector<384x128xf32>, vector<64x128xf32> -> vector<64x128xf32>
    %102 = vector.extract_strided_slice %101 {offsets = [0, 0], sizes = [16, 128], strides = [1, 1]} : vector<64x128xf32> to vector<16x128xf32>
    %103 = vector.extract_strided_slice %101 {offsets = [16, 0], sizes = [16, 128], strides = [1, 1]} : vector<64x128xf32> to vector<16x128xf32>
    %104 = arith.maximumf %102, %103 : vector<16x128xf32>
    %105 = vector.extract_strided_slice %101 {offsets = [32, 0], sizes = [16, 128], strides = [1, 1]} : vector<64x128xf32> to vector<16x128xf32>
    %106 = vector.extract_strided_slice %101 {offsets = [48, 0], sizes = [16, 128], strides = [1, 1]} : vector<64x128xf32> to vector<16x128xf32>
    %107 = arith.maximumf %105, %106 : vector<16x128xf32>
    %108 = arith.maximumf %104, %107 : vector<16x128xf32>
    %109 = vector.broadcast %0 : f32 to vector<16x128xf32>
    %110 = arith.addf %108, %109 : vector<16x128xf32>
    %cst_46 = arith.constant 0.000000e+00 : f32
    %111 = vector.broadcast %cst_46 : f32 to vector<16x128xf32>
    %112 = arith.maximumf %110, %111 : vector<16x128xf32>
    %c96_47 = arith.constant 96 : index
    %c0_48 = arith.constant 0 : index
    %113 = vector.load %arg9[%c96_47, %c0_48] : memref<224x128xf32, #tpu.memory_space<vmem>>, vector<16x128xf32>
    tpu.vector_store %arg9[%c96_47, %c0_48], %112 {strides = array<i32>} : memref<224x128xf32, #tpu.memory_space<vmem>>, vector<16x128xf32>,
    %c288 = arith.constant 288 : index
    %c0_49 = arith.constant 0 : index
    %114 = vector.load %arg1[%c288, %c0_49] : memref<896x128xf32, #tpu.memory_space<vmem>>, vector<384x128xf32>
    %c7 = arith.constant 7 : index
    %c0_50 = arith.constant 0 : index
    %c0_51 = arith.constant 0 : index
    %115 = vector.load %arg2[%c7, %c0_50, %c0_51] : memref<14x64x384xf32, #tpu.memory_space<vmem>>, vector<1x64x384xf32>
    %116 = vector.shape_cast %115 : vector<1x64x384xf32> to vector<64x384xf32>
    %cst_52 = arith.constant dense<0.000000e+00> : vector<64x128xf32>
    %117 = tpu.matmul %116, %114, %cst_52 {dimension_numbers = #tpu.dot_dimension_numbers<[1], [0], [0], [1], [0, 0, 1, 1], [], []>} : vector<64x384xf32>, vector<384x128xf32>, vector<64x128xf32> -> vector<64x128xf32>
    %118 = vector.extract_strided_slice %117 {offsets = [0, 0], sizes = [16, 128], strides = [1, 1]} : vector<64x128xf32> to vector<16x128xf32>
    %119 = vector.extract_strided_slice %117 {offsets = [16, 0], sizes = [16, 128], strides = [1, 1]} : vector<64x128xf32> to vector<16x128xf32>
    %120 = arith.maximumf %118, %119 : vector<16x128xf32>
    %121 = vector.extract_strided_slice %117 {offsets = [32, 0], sizes = [16, 128], strides = [1, 1]} : vector<64x128xf32> to vector<16x128xf32>
    %122 = vector.extract_strided_slice %117 {offsets = [48, 0], sizes = [16, 128], strides = [1, 1]} : vector<64x128xf32> to vector<16x128xf32>
    %123 = arith.maximumf %121, %122 : vector<16x128xf32>
    %124 = arith.maximumf %120, %123 : vector<16x128xf32>
    %125 = vector.broadcast %0 : f32 to vector<16x128xf32>
    %126 = arith.addf %124, %125 : vector<16x128xf32>
    %cst_53 = arith.constant 0.000000e+00 : f32
    %127 = vector.broadcast %cst_53 : f32 to vector<16x128xf32>
    %128 = arith.maximumf %126, %127 : vector<16x128xf32>
    %c112 = arith.constant 112 : index
    %c0_54 = arith.constant 0 : index
    %129 = vector.load %arg9[%c112, %c0_54] : memref<224x128xf32, #tpu.memory_space<vmem>>, vector<16x128xf32>
    tpu.vector_store %arg9[%c112, %c0_54], %128 {strides = array<i32>} : memref<224x128xf32, #tpu.memory_space<vmem>>, vector<16x128xf32>,
    %c352 = arith.constant 352 : index
    %c0_55 = arith.constant 0 : index
    %130 = vector.load %arg1[%c352, %c0_55] : memref<896x128xf32, #tpu.memory_space<vmem>>, vector<384x128xf32>
    %c8 = arith.constant 8 : index
    %c0_56 = arith.constant 0 : index
    %c0_57 = arith.constant 0 : index
    %131 = vector.load %arg2[%c8, %c0_56, %c0_57] : memref<14x64x384xf32, #tpu.memory_space<vmem>>, vector<1x64x384xf32>
    %132 = vector.shape_cast %131 : vector<1x64x384xf32> to vector<64x384xf32>
    %cst_58 = arith.constant dense<0.000000e+00> : vector<64x128xf32>
    %133 = tpu.matmul %132, %130, %cst_58 {dimension_numbers = #tpu.dot_dimension_numbers<[1], [0], [0], [1], [0, 0, 1, 1], [], []>} : vector<64x384xf32>, vector<384x128xf32>, vector<64x128xf32> -> vector<64x128xf32>
    %134 = vector.extract_strided_slice %133 {offsets = [0, 0], sizes = [16, 128], strides = [1, 1]} : vector<64x128xf32> to vector<16x128xf32>
    %135 = vector.extract_strided_slice %133 {offsets = [16, 0], sizes = [16, 128], strides = [1, 1]} : vector<64x128xf32> to vector<16x128xf32>
    %136 = arith.maximumf %134, %135 : vector<16x128xf32>
    %137 = vector.extract_strided_slice %133 {offsets = [32, 0], sizes = [16, 128], strides = [1, 1]} : vector<64x128xf32> to vector<16x128xf32>
    %138 = vector.extract_strided_slice %133 {offsets = [48, 0], sizes = [16, 128], strides = [1, 1]} : vector<64x128xf32> to vector<16x128xf32>
    %139 = arith.maximumf %137, %138 : vector<16x128xf32>
    %140 = arith.maximumf %136, %139 : vector<16x128xf32>
    %141 = vector.broadcast %0 : f32 to vector<16x128xf32>
    %142 = arith.addf %140, %141 : vector<16x128xf32>
    %cst_59 = arith.constant 0.000000e+00 : f32
    %143 = vector.broadcast %cst_59 : f32 to vector<16x128xf32>
    %144 = arith.maximumf %142, %143 : vector<16x128xf32>
    %c128 = arith.constant 128 : index
    %c0_60 = arith.constant 0 : index
    %145 = vector.load %arg9[%c128, %c0_60] : memref<224x128xf32, #tpu.memory_space<vmem>>, vector<16x128xf32>
    tpu.vector_store %arg9[%c128, %c0_60], %144 {strides = array<i32>} : memref<224x128xf32, #tpu.memory_space<vmem>>, vector<16x128xf32>,
    %c416 = arith.constant 416 : index
    %c0_61 = arith.constant 0 : index
    %146 = vector.load %arg1[%c416, %c0_61] : memref<896x128xf32, #tpu.memory_space<vmem>>, vector<384x128xf32>
    %c9 = arith.constant 9 : index
    %c0_62 = arith.constant 0 : index
    %c0_63 = arith.constant 0 : index
    %147 = vector.load %arg2[%c9, %c0_62, %c0_63] : memref<14x64x384xf32, #tpu.memory_space<vmem>>, vector<1x64x384xf32>
    %148 = vector.shape_cast %147 : vector<1x64x384xf32> to vector<64x384xf32>
    %cst_64 = arith.constant dense<0.000000e+00> : vector<64x128xf32>
    %149 = tpu.matmul %148, %146, %cst_64 {dimension_numbers = #tpu.dot_dimension_numbers<[1], [0], [0], [1], [0, 0, 1, 1], [], []>} : vector<64x384xf32>, vector<384x128xf32>, vector<64x128xf32> -> vector<64x128xf32>
    %150 = vector.extract_strided_slice %149 {offsets = [0, 0], sizes = [16, 128], strides = [1, 1]} : vector<64x128xf32> to vector<16x128xf32>
    %151 = vector.extract_strided_slice %149 {offsets = [16, 0], sizes = [16, 128], strides = [1, 1]} : vector<64x128xf32> to vector<16x128xf32>
    %152 = arith.maximumf %150, %151 : vector<16x128xf32>
    %153 = vector.extract_strided_slice %149 {offsets = [32, 0], sizes = [16, 128], strides = [1, 1]} : vector<64x128xf32> to vector<16x128xf32>
    %154 = vector.extract_strided_slice %149 {offsets = [48, 0], sizes = [16, 128], strides = [1, 1]} : vector<64x128xf32> to vector<16x128xf32>
    %155 = arith.maximumf %153, %154 : vector<16x128xf32>
    %156 = arith.maximumf %152, %155 : vector<16x128xf32>
    %157 = vector.broadcast %0 : f32 to vector<16x128xf32>
    %158 = arith.addf %156, %157 : vector<16x128xf32>
    %cst_65 = arith.constant 0.000000e+00 : f32
    %159 = vector.broadcast %cst_65 : f32 to vector<16x128xf32>
    %160 = arith.maximumf %158, %159 : vector<16x128xf32>
    %c144 = arith.constant 144 : index
    %c0_66 = arith.constant 0 : index
    %161 = vector.load %arg9[%c144, %c0_66] : memref<224x128xf32, #tpu.memory_space<vmem>>, vector<16x128xf32>
    tpu.vector_store %arg9[%c144, %c0_66], %160 {strides = array<i32>} : memref<224x128xf32, #tpu.memory_space<vmem>>, vector<16x128xf32>,
    %c480 = arith.constant 480 : index
    %c0_67 = arith.constant 0 : index
    %162 = vector.load %arg1[%c480, %c0_67] : memref<896x128xf32, #tpu.memory_space<vmem>>, vector<384x128xf32>
    %c10 = arith.constant 10 : index
    %c0_68 = arith.constant 0 : index
    %c0_69 = arith.constant 0 : index
    %163 = vector.load %arg2[%c10, %c0_68, %c0_69] : memref<14x64x384xf32, #tpu.memory_space<vmem>>, vector<1x64x384xf32>
    %164 = vector.shape_cast %163 : vector<1x64x384xf32> to vector<64x384xf32>
    %cst_70 = arith.constant dense<0.000000e+00> : vector<64x128xf32>
    %165 = tpu.matmul %164, %162, %cst_70 {dimension_numbers = #tpu.dot_dimension_numbers<[1], [0], [0], [1], [0, 0, 1, 1], [], []>} : vector<64x384xf32>, vector<384x128xf32>, vector<64x128xf32> -> vector<64x128xf32>
    %166 = vector.extract_strided_slice %165 {offsets = [0, 0], sizes = [16, 128], strides = [1, 1]} : vector<64x128xf32> to vector<16x128xf32>
    %167 = vector.extract_strided_slice %165 {offsets = [16, 0], sizes = [16, 128], strides = [1, 1]} : vector<64x128xf32> to vector<16x128xf32>
    %168 = arith.maximumf %166, %167 : vector<16x128xf32>
    %169 = vector.extract_strided_slice %165 {offsets = [32, 0], sizes = [16, 128], strides = [1, 1]} : vector<64x128xf32> to vector<16x128xf32>
    %170 = vector.extract_strided_slice %165 {offsets = [48, 0], sizes = [16, 128], strides = [1, 1]} : vector<64x128xf32> to vector<16x128xf32>
    %171 = arith.maximumf %169, %170 : vector<16x128xf32>
    %172 = arith.maximumf %168, %171 : vector<16x128xf32>
    %173 = vector.broadcast %0 : f32 to vector<16x128xf32>
    %174 = arith.addf %172, %173 : vector<16x128xf32>
    %cst_71 = arith.constant 0.000000e+00 : f32
    %175 = vector.broadcast %cst_71 : f32 to vector<16x128xf32>
    %176 = arith.maximumf %174, %175 : vector<16x128xf32>
    %c160_72 = arith.constant 160 : index
    %c0_73 = arith.constant 0 : index
    %177 = vector.load %arg9[%c160_72, %c0_73] : memref<224x128xf32, #tpu.memory_space<vmem>>, vector<16x128xf32>
    tpu.vector_store %arg9[%c160_72, %c0_73], %176 {strides = array<i32>} : memref<224x128xf32, #tpu.memory_space<vmem>>, vector<16x128xf32>,
    %c512 = arith.constant 512 : index
    %c0_74 = arith.constant 0 : index
    %178 = vector.load %arg1[%c512, %c0_74] : memref<896x128xf32, #tpu.memory_space<vmem>>, vector<384x128xf32>
    %c11 = arith.constant 11 : index
    %c0_75 = arith.constant 0 : index
    %c0_76 = arith.constant 0 : index
    %179 = vector.load %arg2[%c11, %c0_75, %c0_76] : memref<14x64x384xf32, #tpu.memory_space<vmem>>, vector<1x64x384xf32>
    %180 = vector.shape_cast %179 : vector<1x64x384xf32> to vector<64x384xf32>
    %cst_77 = arith.constant dense<0.000000e+00> : vector<64x128xf32>
    %181 = tpu.matmul %180, %178, %cst_77 {dimension_numbers = #tpu.dot_dimension_numbers<[1], [0], [0], [1], [0, 0, 1, 1], [], []>} : vector<64x384xf32>, vector<384x128xf32>, vector<64x128xf32> -> vector<64x128xf32>
    %182 = vector.extract_strided_slice %181 {offsets = [0, 0], sizes = [16, 128], strides = [1, 1]} : vector<64x128xf32> to vector<16x128xf32>
    %183 = vector.extract_strided_slice %181 {offsets = [16, 0], sizes = [16, 128], strides = [1, 1]} : vector<64x128xf32> to vector<16x128xf32>
    %184 = arith.maximumf %182, %183 : vector<16x128xf32>
    %185 = vector.extract_strided_slice %181 {offsets = [32, 0], sizes = [16, 128], strides = [1, 1]} : vector<64x128xf32> to vector<16x128xf32>
    %186 = vector.extract_strided_slice %181 {offsets = [48, 0], sizes = [16, 128], strides = [1, 1]} : vector<64x128xf32> to vector<16x128xf32>
    %187 = arith.maximumf %185, %186 : vector<16x128xf32>
    %188 = arith.maximumf %184, %187 : vector<16x128xf32>
    %189 = vector.broadcast %0 : f32 to vector<16x128xf32>
    %190 = arith.addf %188, %189 : vector<16x128xf32>
    %cst_78 = arith.constant 0.000000e+00 : f32
    %191 = vector.broadcast %cst_78 : f32 to vector<16x128xf32>
    %192 = arith.maximumf %190, %191 : vector<16x128xf32>
    %c176 = arith.constant 176 : index
    %c0_79 = arith.constant 0 : index
    %193 = vector.load %arg9[%c176, %c0_79] : memref<224x128xf32, #tpu.memory_space<vmem>>, vector<16x128xf32>
    tpu.vector_store %arg9[%c176, %c0_79], %192 {strides = array<i32>} : memref<224x128xf32, #tpu.memory_space<vmem>>, vector<16x128xf32>,
    %c512_80 = arith.constant 512 : index
    %c0_81 = arith.constant 0 : index
    %194 = vector.load %arg1[%c512_80, %c0_81] : memref<896x128xf32, #tpu.memory_space<vmem>>, vector<384x128xf32>
    %c12 = arith.constant 12 : index
    %c0_82 = arith.constant 0 : index
    %c0_83 = arith.constant 0 : index
    %195 = vector.load %arg2[%c12, %c0_82, %c0_83] : memref<14x64x384xf32, #tpu.memory_space<vmem>>, vector<1x64x384xf32>
    %196 = vector.shape_cast %195 : vector<1x64x384xf32> to vector<64x384xf32>
    %cst_84 = arith.constant dense<0.000000e+00> : vector<64x128xf32>
    %197 = tpu.matmul %196, %194, %cst_84 {dimension_numbers = #tpu.dot_dimension_numbers<[1], [0], [0], [1], [0, 0, 1, 1], [], []>} : vector<64x384xf32>, vector<384x128xf32>, vector<64x128xf32> -> vector<64x128xf32>
    %198 = vector.extract_strided_slice %197 {offsets = [0, 0], sizes = [16, 128], strides = [1, 1]} : vector<64x128xf32> to vector<16x128xf32>
    %199 = vector.extract_strided_slice %197 {offsets = [16, 0], sizes = [16, 128], strides = [1, 1]} : vector<64x128xf32> to vector<16x128xf32>
    %200 = arith.maximumf %198, %199 : vector<16x128xf32>
    %201 = vector.extract_strided_slice %197 {offsets = [32, 0], sizes = [16, 128], strides = [1, 1]} : vector<64x128xf32> to vector<16x128xf32>
    %202 = vector.extract_strided_slice %197 {offsets = [48, 0], sizes = [16, 128], strides = [1, 1]} : vector<64x128xf32> to vector<16x128xf32>
    %203 = arith.maximumf %201, %202 : vector<16x128xf32>
    %204 = arith.maximumf %200, %203 : vector<16x128xf32>
    %205 = vector.broadcast %0 : f32 to vector<16x128xf32>
    %206 = arith.addf %204, %205 : vector<16x128xf32>
    %cst_85 = arith.constant 0.000000e+00 : f32
    %207 = vector.broadcast %cst_85 : f32 to vector<16x128xf32>
    %208 = arith.maximumf %206, %207 : vector<16x128xf32>
    %c192 = arith.constant 192 : index
    %c0_86 = arith.constant 0 : index
    %209 = vector.load %arg9[%c192, %c0_86] : memref<224x128xf32, #tpu.memory_space<vmem>>, vector<16x128xf32>
    tpu.vector_store %arg9[%c192, %c0_86], %208 {strides = array<i32>} : memref<224x128xf32, #tpu.memory_space<vmem>>, vector<16x128xf32>,
    %c512_87 = arith.constant 512 : index
    %c0_88 = arith.constant 0 : index
    %210 = vector.load %arg1[%c512_87, %c0_88] : memref<896x128xf32, #tpu.memory_space<vmem>>, vector<384x128xf32>
    %c13 = arith.constant 13 : index
    %c0_89 = arith.constant 0 : index
    %c0_90 = arith.constant 0 : index
    %211 = vector.load %arg2[%c13, %c0_89, %c0_90] : memref<14x64x384xf32, #tpu.memory_space<vmem>>, vector<1x64x384xf32>
    %212 = vector.shape_cast %211 : vector<1x64x384xf32> to vector<64x384xf32>
    %cst_91 = arith.constant dense<0.000000e+00> : vector<64x128xf32>
    %213 = tpu.matmul %212, %210, %cst_91 {dimension_numbers = #tpu.dot_dimension_numbers<[1], [0], [0], [1], [0, 0, 1, 1], [], []>} : vector<64x384xf32>, vector<384x128xf32>, vector<64x128xf32> -> vector<64x128xf32>
    %214 = vector.extract_strided_slice %213 {offsets = [0, 0], sizes = [16, 128], strides = [1, 1]} : vector<64x128xf32> to vector<16x128xf32>
    %215 = vector.extract_strided_slice %213 {offsets = [16, 0], sizes = [16, 128], strides = [1, 1]} : vector<64x128xf32> to vector<16x128xf32>
    %216 = arith.maximumf %214, %215 : vector<16x128xf32>
    %217 = vector.extract_strided_slice %213 {offsets = [32, 0], sizes = [16, 128], strides = [1, 1]} : vector<64x128xf32> to vector<16x128xf32>
    %218 = vector.extract_strided_slice %213 {offsets = [48, 0], sizes = [16, 128], strides = [1, 1]} : vector<64x128xf32> to vector<16x128xf32>
    %219 = arith.maximumf %217, %218 : vector<16x128xf32>
    %220 = arith.maximumf %216, %219 : vector<16x128xf32>
    %221 = vector.broadcast %0 : f32 to vector<16x128xf32>
    %222 = arith.addf %220, %221 : vector<16x128xf32>
    %cst_92 = arith.constant 0.000000e+00 : f32
    %223 = vector.broadcast %cst_92 : f32 to vector<16x128xf32>
    %224 = arith.maximumf %222, %223 : vector<16x128xf32>
    %c208 = arith.constant 208 : index
    %c0_93 = arith.constant 0 : index
    %225 = vector.load %arg9[%c208, %c0_93] : memref<224x128xf32, #tpu.memory_space<vmem>>, vector<16x128xf32>
    tpu.vector_store %arg9[%c208, %c0_93], %224 {strides = array<i32>} : memref<224x128xf32, #tpu.memory_space<vmem>>, vector<16x128xf32>,
    %c0_94 = arith.constant 0 : index
    %c0_95 = arith.constant 0 : index
    %226 = vector.load %arg9[%c0_94, %c0_95] : memref<224x128xf32, #tpu.memory_space<vmem>>, vector<192x128xf32>
    %c0_96 = arith.constant 0 : index
    %c0_97 = arith.constant 0 : index
    %c0_98 = arith.constant 0 : index
    %227 = vector.load %arg3[%c0_96, %c0_97, %c0_98] : memref<7x32x192xf32, #tpu.memory_space<vmem>>, vector<1x32x192xf32>
    %228 = vector.shape_cast %227 : vector<1x32x192xf32> to vector<32x192xf32>
    %cst_99 = arith.constant dense<0.000000e+00> : vector<32x128xf32>
    %229 = tpu.matmul %228, %226, %cst_99 {dimension_numbers = #tpu.dot_dimension_numbers<[1], [0], [0], [1], [0, 0, 1, 1], [], []>} : vector<32x192xf32>, vector<192x128xf32>, vector<32x128xf32> -> vector<32x128xf32>
    %230 = vector.extract_strided_slice %229 {offsets = [0, 0], sizes = [8, 128], strides = [1, 1]} : vector<32x128xf32> to vector<8x128xf32>
    %231 = vector.extract_strided_slice %229 {offsets = [8, 0], sizes = [8, 128], strides = [1, 1]} : vector<32x128xf32> to vector<8x128xf32>
    %232 = arith.maximumf %230, %231 : vector<8x128xf32>
    %233 = vector.extract_strided_slice %229 {offsets = [16, 0], sizes = [8, 128], strides = [1, 1]} : vector<32x128xf32> to vector<8x128xf32>
    %234 = vector.extract_strided_slice %229 {offsets = [24, 0], sizes = [8, 128], strides = [1, 1]} : vector<32x128xf32> to vector<8x128xf32>
    %235 = arith.maximumf %233, %234 : vector<8x128xf32>
    %236 = arith.maximumf %232, %235 : vector<8x128xf32>
    %237 = vector.broadcast %1 : f32 to vector<8x128xf32>
    %238 = arith.addf %236, %237 : vector<8x128xf32>
    %cst_100 = arith.constant 0.000000e+00 : f32
    %239 = vector.broadcast %cst_100 : f32 to vector<8x128xf32>
    %240 = arith.maximumf %238, %239 : vector<8x128xf32>
    %c0_101 = arith.constant 0 : index
    %c0_102 = arith.constant 0 : index
    %241 = vector.load %arg10[%c0_101, %c0_102] : memref<64x128xf32, #tpu.memory_space<vmem>>, vector<8x128xf32>
    tpu.vector_store %arg10[%c0_101, %c0_102], %240 {strides = array<i32>} : memref<64x128xf32, #tpu.memory_space<vmem>>, vector<8x128xf32>,
    %c0_103 = arith.constant 0 : index
    %c0_104 = arith.constant 0 : index
    %242 = vector.load %arg9[%c0_103, %c0_104] : memref<224x128xf32, #tpu.memory_space<vmem>>, vector<192x128xf32>
    %c1_105 = arith.constant 1 : index
    %c0_106 = arith.constant 0 : index
    %c0_107 = arith.constant 0 : index
    %243 = vector.load %arg3[%c1_105, %c0_106, %c0_107] : memref<7x32x192xf32, #tpu.memory_space<vmem>>, vector<1x32x192xf32>
    %244 = vector.shape_cast %243 : vector<1x32x192xf32> to vector<32x192xf32>
    %cst_108 = arith.constant dense<0.000000e+00> : vector<32x128xf32>
    %245 = tpu.matmul %244, %242, %cst_108 {dimension_numbers = #tpu.dot_dimension_numbers<[1], [0], [0], [1], [0, 0, 1, 1], [], []>} : vector<32x192xf32>, vector<192x128xf32>, vector<32x128xf32> -> vector<32x128xf32>
    %246 = vector.extract_strided_slice %245 {offsets = [0, 0], sizes = [8, 128], strides = [1, 1]} : vector<32x128xf32> to vector<8x128xf32>
    %247 = vector.extract_strided_slice %245 {offsets = [8, 0], sizes = [8, 128], strides = [1, 1]} : vector<32x128xf32> to vector<8x128xf32>
    %248 = arith.maximumf %246, %247 : vector<8x128xf32>
    %249 = vector.extract_strided_slice %245 {offsets = [16, 0], sizes = [8, 128], strides = [1, 1]} : vector<32x128xf32> to vector<8x128xf32>
    %250 = vector.extract_strided_slice %245 {offsets = [24, 0], sizes = [8, 128], strides = [1, 1]} : vector<32x128xf32> to vector<8x128xf32>
    %251 = arith.maximumf %249, %250 : vector<8x128xf32>
    %252 = arith.maximumf %248, %251 : vector<8x128xf32>
    %253 = vector.broadcast %1 : f32 to vector<8x128xf32>
    %254 = arith.addf %252, %253 : vector<8x128xf32>
    %cst_109 = arith.constant 0.000000e+00 : f32
    %255 = vector.broadcast %cst_109 : f32 to vector<8x128xf32>
    %256 = arith.maximumf %254, %255 : vector<8x128xf32>
    %c8_110 = arith.constant 8 : index
    %c0_111 = arith.constant 0 : index
    %257 = vector.load %arg10[%c8_110, %c0_111] : memref<64x128xf32, #tpu.memory_space<vmem>>, vector<8x128xf32>
    tpu.vector_store %arg10[%c8_110, %c0_111], %256 {strides = array<i32>} : memref<64x128xf32, #tpu.memory_space<vmem>>, vector<8x128xf32>,
    %c0_112 = arith.constant 0 : index
    %c0_113 = arith.constant 0 : index
    %258 = vector.load %arg9[%c0_112, %c0_113] : memref<224x128xf32, #tpu.memory_space<vmem>>, vector<192x128xf32>
    %c2_114 = arith.constant 2 : index
    %c0_115 = arith.constant 0 : index
    %c0_116 = arith.constant 0 : index
    %259 = vector.load %arg3[%c2_114, %c0_115, %c0_116] : memref<7x32x192xf32, #tpu.memory_space<vmem>>, vector<1x32x192xf32>
    %260 = vector.shape_cast %259 : vector<1x32x192xf32> to vector<32x192xf32>
    %cst_117 = arith.constant dense<0.000000e+00> : vector<32x128xf32>
    %261 = tpu.matmul %260, %258, %cst_117 {dimension_numbers = #tpu.dot_dimension_numbers<[1], [0], [0], [1], [0, 0, 1, 1], [], []>} : vector<32x192xf32>, vector<192x128xf32>, vector<32x128xf32> -> vector<32x128xf32>
    %262 = vector.extract_strided_slice %261 {offsets = [0, 0], sizes = [8, 128], strides = [1, 1]} : vector<32x128xf32> to vector<8x128xf32>
    %263 = vector.extract_strided_slice %261 {offsets = [8, 0], sizes = [8, 128], strides = [1, 1]} : vector<32x128xf32> to vector<8x128xf32>
    %264 = arith.maximumf %262, %263 : vector<8x128xf32>
    %265 = vector.extract_strided_slice %261 {offsets = [16, 0], sizes = [8, 128], strides = [1, 1]} : vector<32x128xf32> to vector<8x128xf32>
    %266 = vector.extract_strided_slice %261 {offsets = [24, 0], sizes = [8, 128], strides = [1, 1]} : vector<32x128xf32> to vector<8x128xf32>
    %267 = arith.maximumf %265, %266 : vector<8x128xf32>
    %268 = arith.maximumf %264, %267 : vector<8x128xf32>
    %269 = vector.broadcast %1 : f32 to vector<8x128xf32>
    %270 = arith.addf %268, %269 : vector<8x128xf32>
    %cst_118 = arith.constant 0.000000e+00 : f32
    %271 = vector.broadcast %cst_118 : f32 to vector<8x128xf32>
    %272 = arith.maximumf %270, %271 : vector<8x128xf32>
    %c16_119 = arith.constant 16 : index
    %c0_120 = arith.constant 0 : index
    %273 = vector.load %arg10[%c16_119, %c0_120] : memref<64x128xf32, #tpu.memory_space<vmem>>, vector<8x128xf32>
    tpu.vector_store %arg10[%c16_119, %c0_120], %272 {strides = array<i32>} : memref<64x128xf32, #tpu.memory_space<vmem>>, vector<8x128xf32>,
    %c16_121 = arith.constant 16 : index
    %c0_122 = arith.constant 0 : index
    %274 = vector.load %arg9[%c16_121, %c0_122] : memref<224x128xf32, #tpu.memory_space<vmem>>, vector<192x128xf32>
    %c3_123 = arith.constant 3 : index
    %c0_124 = arith.constant 0 : index
    %c0_125 = arith.constant 0 : index
    %275 = vector.load %arg3[%c3_123, %c0_124, %c0_125] : memref<7x32x192xf32, #tpu.memory_space<vmem>>, vector<1x32x192xf32>
    %276 = vector.shape_cast %275 : vector<1x32x192xf32> to vector<32x192xf32>
    %cst_126 = arith.constant dense<0.000000e+00> : vector<32x128xf32>
    %277 = tpu.matmul %276, %274, %cst_126 {dimension_numbers = #tpu.dot_dimension_numbers<[1], [0], [0], [1], [0, 0, 1, 1], [], []>} : vector<32x192xf32>, vector<192x128xf32>, vector<32x128xf32> -> vector<32x128xf32>
    %278 = vector.extract_strided_slice %277 {offsets = [0, 0], sizes = [8, 128], strides = [1, 1]} : vector<32x128xf32> to vector<8x128xf32>
    %279 = vector.extract_strided_slice %277 {offsets = [8, 0], sizes = [8, 128], strides = [1, 1]} : vector<32x128xf32> to vector<8x128xf32>
    %280 = arith.maximumf %278, %279 : vector<8x128xf32>
    %281 = vector.extract_strided_slice %277 {offsets = [16, 0], sizes = [8, 128], strides = [1, 1]} : vector<32x128xf32> to vector<8x128xf32>
    %282 = vector.extract_strided_slice %277 {offsets = [24, 0], sizes = [8, 128], strides = [1, 1]} : vector<32x128xf32> to vector<8x128xf32>
    %283 = arith.maximumf %281, %282 : vector<8x128xf32>
    %284 = arith.maximumf %280, %283 : vector<8x128xf32>
    %285 = vector.broadcast %1 : f32 to vector<8x128xf32>
    %286 = arith.addf %284, %285 : vector<8x128xf32>
    %cst_127 = arith.constant 0.000000e+00 : f32
    %287 = vector.broadcast %cst_127 : f32 to vector<8x128xf32>
    %288 = arith.maximumf %286, %287 : vector<8x128xf32>
    %c24 = arith.constant 24 : index
    %c0_128 = arith.constant 0 : index
    %289 = vector.load %arg10[%c24, %c0_128] : memref<64x128xf32, #tpu.memory_space<vmem>>, vector<8x128xf32>
    tpu.vector_store %arg10[%c24, %c0_128], %288 {strides = array<i32>} : memref<64x128xf32, #tpu.memory_space<vmem>>, vector<8x128xf32>,
    %c32_129 = arith.constant 32 : index
    %c0_130 = arith.constant 0 : index
    %290 = vector.load %arg9[%c32_129, %c0_130] : memref<224x128xf32, #tpu.memory_space<vmem>>, vector<192x128xf32>
    %c4_131 = arith.constant 4 : index
    %c0_132 = arith.constant 0 : index
    %c0_133 = arith.constant 0 : index
    %291 = vector.load %arg3[%c4_131, %c0_132, %c0_133] : memref<7x32x192xf32, #tpu.memory_space<vmem>>, vector<1x32x192xf32>
    %292 = vector.shape_cast %291 : vector<1x32x192xf32> to vector<32x192xf32>
    %cst_134 = arith.constant dense<0.000000e+00> : vector<32x128xf32>
    %293 = tpu.matmul %292, %290, %cst_134 {dimension_numbers = #tpu.dot_dimension_numbers<[1], [0], [0], [1], [0, 0, 1, 1], [], []>} : vector<32x192xf32>, vector<192x128xf32>, vector<32x128xf32> -> vector<32x128xf32>
    %294 = vector.extract_strided_slice %293 {offsets = [0, 0], sizes = [8, 128], strides = [1, 1]} : vector<32x128xf32> to vector<8x128xf32>
    %295 = vector.extract_strided_slice %293 {offsets = [8, 0], sizes = [8, 128], strides = [1, 1]} : vector<32x128xf32> to vector<8x128xf32>
    %296 = arith.maximumf %294, %295 : vector<8x128xf32>
    %297 = vector.extract_strided_slice %293 {offsets = [16, 0], sizes = [8, 128], strides = [1, 1]} : vector<32x128xf32> to vector<8x128xf32>
    %298 = vector.extract_strided_slice %293 {offsets = [24, 0], sizes = [8, 128], strides = [1, 1]} : vector<32x128xf32> to vector<8x128xf32>
    %299 = arith.maximumf %297, %298 : vector<8x128xf32>
    %300 = arith.maximumf %296, %299 : vector<8x128xf32>
    %301 = vector.broadcast %1 : f32 to vector<8x128xf32>
    %302 = arith.addf %300, %301 : vector<8x128xf32>
    %cst_135 = arith.constant 0.000000e+00 : f32
    %303 = vector.broadcast %cst_135 : f32 to vector<8x128xf32>
    %304 = arith.maximumf %302, %303 : vector<8x128xf32>
    %c32_136 = arith.constant 32 : index
    %c0_137 = arith.constant 0 : index
    %305 = vector.load %arg10[%c32_136, %c0_137] : memref<64x128xf32, #tpu.memory_space<vmem>>, vector<8x128xf32>
    tpu.vector_store %arg10[%c32_136, %c0_137], %304 {strides = array<i32>} : memref<64x128xf32, #tpu.memory_space<vmem>>, vector<8x128xf32>,
    %c32_138 = arith.constant 32 : index
    %c0_139 = arith.constant 0 : index
    %306 = vector.load %arg9[%c32_138, %c0_139] : memref<224x128xf32, #tpu.memory_space<vmem>>, vector<192x128xf32>
    %c5_140 = arith.constant 5 : index
    %c0_141 = arith.constant 0 : index
    %c0_142 = arith.constant 0 : index
    %307 = vector.load %arg3[%c5_140, %c0_141, %c0_142] : memref<7x32x192xf32, #tpu.memory_space<vmem>>, vector<1x32x192xf32>
    %308 = vector.shape_cast %307 : vector<1x32x192xf32> to vector<32x192xf32>
    %cst_143 = arith.constant dense<0.000000e+00> : vector<32x128xf32>
    %309 = tpu.matmul %308, %306, %cst_143 {dimension_numbers = #tpu.dot_dimension_numbers<[1], [0], [0], [1], [0, 0, 1, 1], [], []>} : vector<32x192xf32>, vector<192x128xf32>, vector<32x128xf32> -> vector<32x128xf32>
    %310 = vector.extract_strided_slice %309 {offsets = [0, 0], sizes = [8, 128], strides = [1, 1]} : vector<32x128xf32> to vector<8x128xf32>
    %311 = vector.extract_strided_slice %309 {offsets = [8, 0], sizes = [8, 128], strides = [1, 1]} : vector<32x128xf32> to vector<8x128xf32>
    %312 = arith.maximumf %310, %311 : vector<8x128xf32>
    %313 = vector.extract_strided_slice %309 {offsets = [16, 0], sizes = [8, 128], strides = [1, 1]} : vector<32x128xf32> to vector<8x128xf32>
    %314 = vector.extract_strided_slice %309 {offsets = [24, 0], sizes = [8, 128], strides = [1, 1]} : vector<32x128xf32> to vector<8x128xf32>
    %315 = arith.maximumf %313, %314 : vector<8x128xf32>
    %316 = arith.maximumf %312, %315 : vector<8x128xf32>
    %317 = vector.broadcast %1 : f32 to vector<8x128xf32>
    %318 = arith.addf %316, %317 : vector<8x128xf32>
    %cst_144 = arith.constant 0.000000e+00 : f32
    %319 = vector.broadcast %cst_144 : f32 to vector<8x128xf32>
    %320 = arith.maximumf %318, %319 : vector<8x128xf32>
    %c40 = arith.constant 40 : index
    %c0_145 = arith.constant 0 : index
    %321 = vector.load %arg10[%c40, %c0_145] : memref<64x128xf32, #tpu.memory_space<vmem>>, vector<8x128xf32>
    tpu.vector_store %arg10[%c40, %c0_145], %320 {strides = array<i32>} : memref<64x128xf32, #tpu.memory_space<vmem>>, vector<8x128xf32>,
    %c32_146 = arith.constant 32 : index
    %c0_147 = arith.constant 0 : index
    %322 = vector.load %arg9[%c32_146, %c0_147] : memref<224x128xf32, #tpu.memory_space<vmem>>, vector<192x128xf32>
    %c6_148 = arith.constant 6 : index
    %c0_149 = arith.constant 0 : index
    %c0_150 = arith.constant 0 : index
    %323 = vector.load %arg3[%c6_148, %c0_149, %c0_150] : memref<7x32x192xf32, #tpu.memory_space<vmem>>, vector<1x32x192xf32>
    %324 = vector.shape_cast %323 : vector<1x32x192xf32> to vector<32x192xf32>
    %cst_151 = arith.constant dense<0.000000e+00> : vector<32x128xf32>
    %325 = tpu.matmul %324, %322, %cst_151 {dimension_numbers = #tpu.dot_dimension_numbers<[1], [0], [0], [1], [0, 0, 1, 1], [], []>} : vector<32x192xf32>, vector<192x128xf32>, vector<32x128xf32> -> vector<32x128xf32>
    %326 = vector.extract_strided_slice %325 {offsets = [0, 0], sizes = [8, 128], strides = [1, 1]} : vector<32x128xf32> to vector<8x128xf32>
    %327 = vector.extract_strided_slice %325 {offsets = [8, 0], sizes = [8, 128], strides = [1, 1]} : vector<32x128xf32> to vector<8x128xf32>
    %328 = arith.maximumf %326, %327 : vector<8x128xf32>
    %329 = vector.extract_strided_slice %325 {offsets = [16, 0], sizes = [8, 128], strides = [1, 1]} : vector<32x128xf32> to vector<8x128xf32>
    %330 = vector.extract_strided_slice %325 {offsets = [24, 0], sizes = [8, 128], strides = [1, 1]} : vector<32x128xf32> to vector<8x128xf32>
    %331 = arith.maximumf %329, %330 : vector<8x128xf32>
    %332 = arith.maximumf %328, %331 : vector<8x128xf32>
    %333 = vector.broadcast %1 : f32 to vector<8x128xf32>
    %334 = arith.addf %332, %333 : vector<8x128xf32>
    %cst_152 = arith.constant 0.000000e+00 : f32
    %335 = vector.broadcast %cst_152 : f32 to vector<8x128xf32>
    %336 = arith.maximumf %334, %335 : vector<8x128xf32>
    %c48_153 = arith.constant 48 : index
    %c0_154 = arith.constant 0 : index
    %337 = vector.load %arg10[%c48_153, %c0_154] : memref<64x128xf32, #tpu.memory_space<vmem>>, vector<8x128xf32>
    tpu.vector_store %arg10[%c48_153, %c0_154], %336 {strides = array<i32>} : memref<64x128xf32, #tpu.memory_space<vmem>>, vector<8x128xf32>,
    %cst_155 = arith.constant 1.000000e+00 : f32
    %338 = vector.broadcast %cst_155 : f32 to vector<8x128xf32>
    %c56 = arith.constant 56 : index
    %c0_156 = arith.constant 0 : index
    %339 = vector.load %arg10[%c56, %c0_156] : memref<64x128xf32, #tpu.memory_space<vmem>>, vector<8x128xf32>
    tpu.vector_store %arg10[%c56, %c0_156], %338 {strides = array<i32>} : memref<64x128xf32, #tpu.memory_space<vmem>>, vector<8x128xf32>,
    %c0_157 = arith.constant 0 : index
    %c0_158 = arith.constant 0 : index
    %340 = vector.load %arg4[%c0_157, %c0_158] : memref<50x64xf32, #tpu.memory_space<vmem>>, vector<50x64xf32>
    %c0_159 = arith.constant 0 : index
    %c0_160 = arith.constant 0 : index
    %341 = vector.load %arg10[%c0_159, %c0_160] : memref<64x128xf32, #tpu.memory_space<vmem>>, vector<64x128xf32>
    %cst_161 = arith.constant dense<0.000000e+00> : vector<50x128xf32>
    %342 = tpu.matmul %340, %341, %cst_161 {dimension_numbers = #tpu.dot_dimension_numbers<[1], [0], [0], [1], [0, 0, 1, 1], [], []>} : vector<50x64xf32>, vector<64x128xf32>, vector<50x128xf32> -> vector<50x128xf32>
    %cst_162 = arith.constant 0.000000e+00 : f32
    %343 = vector.broadcast %cst_162 : f32 to vector<50x128xf32>
    %344 = arith.maximumf %342, %343 : vector<50x128xf32>
    %c0_163 = arith.constant 0 : index
    %c0_164 = arith.constant 0 : index
    %345 = vector.load %arg5[%c0_163, %c0_164] : memref<10x50xf32, #tpu.memory_space<vmem>>, vector<10x50xf32>
    %cst_165 = arith.constant dense<0.000000e+00> : vector<10x128xf32>
    %346 = tpu.matmul %345, %344, %cst_165 {dimension_numbers = #tpu.dot_dimension_numbers<[1], [0], [0], [1], [0, 0, 1, 1], [], []>} : vector<10x50xf32>, vector<50x128xf32>, vector<10x128xf32> -> vector<10x128xf32>
    %c0_166 = arith.constant 0 : index
    %c0_167 = arith.constant 0 : index
    %347 = vector.load %arg6[%c0_166, %c0_167] : memref<10x1xf32, #tpu.memory_space<vmem>>, vector<10x1xf32>
    %348 = vector.broadcast %347 : vector<10x1xf32> to vector<10x128xf32>
    %349 = arith.addf %346, %348 : vector<10x128xf32>
    %c0_168 = arith.constant 0 : index
    %c0_169 = arith.constant 0 : index
    %350 = vector.load %arg8[%c0_168, %c0_169] : memref<10x128xf32, #tpu.memory_space<vmem>>, vector<10x128xf32>
    tpu.vector_store %arg8[%c0_168, %c0_169], %349 {strides = array<i32>} : memref<10x128xf32, #tpu.memory_space<vmem>>, vector<10x128xf32>,
    return
  }
  func.func @transform_0(%arg0: i32) -> (i32, i32) {
    %c0_i32 = arith.constant 0 : i32
    %c0_i32_0 = arith.constant 0 : i32
    return %c0_i32, %arg0 : i32, i32
  }
  func.func @transform_1(%arg0: i32) -> (i32, i32, i32) {
    %c0_i32 = arith.constant 0 : i32
    %c0_i32_0 = arith.constant 0 : i32
    %c0_i32_1 = arith.constant 0 : i32
    %c0_i32_2 = arith.constant 0 : i32
    return %c0_i32, %c0_i32_0, %c0_i32_1 : i32, i32, i32
  }
  func.func @transform_2(%arg0: i32) -> (i32, i32, i32) {
    %c0_i32 = arith.constant 0 : i32
    %c0_i32_0 = arith.constant 0 : i32
    %c0_i32_1 = arith.constant 0 : i32
    %c0_i32_2 = arith.constant 0 : i32
    return %c0_i32, %c0_i32_0, %c0_i32_1 : i32, i32, i32
  }
  func.func @transform_3(%arg0: i32) -> (i32, i32) {
    %c0_i32 = arith.constant 0 : i32
    %c0_i32_0 = arith.constant 0 : i32
    %c0_i32_1 = arith.constant 0 : i32
    return %c0_i32, %c0_i32_0 : i32, i32
  }
  func.func @transform_4(%arg0: i32) -> (i32, i32) {
    %c0_i32 = arith.constant 0 : i32
    %c0_i32_0 = arith.constant 0 : i32
    %c0_i32_1 = arith.constant 0 : i32
    return %c0_i32, %c0_i32_0 : i32, i32
  }
  func.func @transform_5(%arg0: i32) -> (i32, i32) {
    %c0_i32 = arith.constant 0 : i32
    %c0_i32_0 = arith.constant 0 : i32
    %c0_i32_1 = arith.constant 0 : i32
    return %c0_i32, %c0_i32_0 : i32, i32
  }
  func.func @transform_6(%arg0: i32) -> i32 {
    %c0_i32 = arith.constant 0 : i32
    %c0_i32_0 = arith.constant 0 : i32
    return %c0_i32 : i32
  }
  func.func @transform_7(%arg0: i32) -> (i32, i32) {
    %c0_i32 = arith.constant 0 : i32
    %c0_i32_0 = arith.constant 0 : i32
    return %c0_i32, %arg0 : i32, i32
  }
}

</mosaic_0001>

<bundles_post_ra>
// kernel: tpu_custom_call.1
= control target key start
LH: loop header
LB: loop body
LE: loop exit
PB: predicated region body
PF: predicated region fallthrough
CT: control target
= control target key end

     0   :  { %12 = vsyncpa [#allocation5], 0  ;;  %s9753_s0 = inlined_call_operand.hbm [shape: f32[896,128], index: 0, kind: input, shape index: {}]   ;;  %s9754_s1 = inlined_call_operand.hbm [shape: f32[14,64,384], index: 1, kind: input, shape index: {}]   ;;  %s9755_s2 = inlined_call_operand.hbm [shape: f32[7,32,192], index: 2, kind: input, shape index: {}]   ;;  %s9756_s3 = inlined_call_operand.hbm [shape: f32[50,64], index: 3, kind: input, shape index: {}]   ;;  %s9757_s4 = inlined_call_operand.hbm [shape: f32[10,50], index: 4, kind: input, shape index: {}]   ;;  %s9758_s5 = inlined_call_operand.vmem [shape: f32[10,1], index: 5, kind: input, shape index: {}]   ;;  %s9759_s6 = inlined_call_operand.hbm [shape: f32[2], index: 6, kind: input, shape index: {}]   ;;  %s9760_s7 = inlined_call_operand.hbm [shape: f32[10,128], index: 7, kind: output, shape index: {}]  }
   0x1   :  { %13 = vsyncpa [#allocation9], 0 }
   0x2   :  { %14 = vsyncpa [#allocation12], 0 }
   0x3   :  { %15 = vsyncpa [#allocation7], 0 }
   0x4   :  { %16 = vsyncpa [#allocation6], 0  ;;  %s7466_s24 = smov [#allocation8]  }
   0x5   :  { %s34_s25 = sshll.u32 %s7466_s24, 4  ;;  %s35_s25 = int_to_ptr.vmem [resolvable:$true] %s34_s25 }
   0x6   :  { %s7336_s26 = scalar_lea.vmem %s35_s25, 43008  ;;  %p7341_p1 = scmp.lt.s32.totalorder %s35_s25, %s35_s25 }
   0x7   :  { %p7337_p0 = scmp.ne.s32.totalorder %s35_s25, %s7336_s26  ;;  %p7342_p2 = scmp.lt.s32.totalorder %s7336_s26, %s7336_s26 }
   0x9   :  { %p7343_p3 = por %p7342_p2, %p7341_p1 }
   0xb   :  { %p7344_p4 = pnand %p7343_p3, %p7337_p0 }
   0xd   :  { %7347 = shalt.err (!%p7344_p4)
}
   0xe   :  { %s7467_s27 = smov 384   ;;  %s7468_s28 = smov 24  }
   0xf   :  { %40 = dma.hbm_to_vmem [thread:$0]  %s9754_s1, 43008, %s35_s25, [#allocation9], %s7467_s27, %s7467_s27, %s7468_s28  }
  0x10   :  { %s7469_s8 = smov [#allocation11]   ;;  %s7470_s10 = smov [#allocation4]  }
  0x11   :  { %s58_s9 = sshll.u32 %s7469_s8, 4  ;;  %s22_s11 = sshll.u32 %s7470_s10, 4  ;;  %s59_s9 = int_to_ptr.vmem [resolvable:$true] %s58_s9  ;;  %s23_s11 = int_to_ptr.vmem [resolvable:$true] %s22_s11 }
  0x12   :  { %s7356_s12 = scalar_lea.vmem %s59_s9, 896  ;;  %p7361_p6 = scmp.lt.s32.totalorder %s59_s9, %s59_s9 }
  0x13   :  { %p7357_p5 = scmp.ne.s32.totalorder %s59_s9, %s7356_s12  ;;  %p7362_p7 = scmp.lt.s32.totalorder %s7356_s12, %s7356_s12 }
  0x15   :  { %p7363_p8 = por %p7362_p7, %p7361_p6 }
  0x17   :  { %p7364_p9 = pnand %p7363_p8, %p7357_p5 }
  0x19   :  { %7367 = shalt.err (!%p7364_p9)
}
  0x1a   :  { %s7471_s13 = smov 128   ;;  %s7472_s14 = smov 8  }
  0x1b   :  { %64 = dma.hbm_to_vmem [thread:$0]  %s9756_s3, 896, %s59_s9, [#allocation12], %s7471_s13, %s7471_s13, %s7472_s14  }
  0x1c   :  { %s7376_s1 = scalar_lea.vmem %s23_s11, 14336  ;;  %p7381_p11 = scmp.lt.s32.totalorder %s23_s11, %s23_s11 }
  0x1d   :  { %p7377_p10 = scmp.ne.s32.totalorder %s23_s11, %s7376_s1  ;;  %p7382_p12 = scmp.lt.s32.totalorder %s7376_s1, %s7376_s1 }
  0x1f   :  { %p7383_p13 = por %p7382_p12, %p7381_p11 }
  0x21   :  { %p7384_p0 = pnand %p7383_p13, %p7377_p10 }
  0x23   :  { %7387 = shalt.err (!%p7384_p0)
}
  0x24   :  { %28 = dma.hbm_to_vmem [thread:$0]  %s9753_s0, 14336, %s23_s11, [#allocation5], %s7471_s13, %s7471_s13, %s7472_s14  }
  0x25   :  { %s7473_s19 = smov [#allocation10]  }
  0x26   :  { %s46_s20 = sshll.u32 %s7473_s19, 4  ;;  %s47_s20 = int_to_ptr.vmem [resolvable:$true] %s46_s20 }
  0x27   :  { %s7396_s21 = scalar_lea.vmem %s47_s20, 7168  ;;  %p7401_p2 = scmp.lt.s32.totalorder %s47_s20, %s47_s20 }
  0x28   :  { %p7397_p1 = scmp.ne.s32.totalorder %s47_s20, %s7396_s21  ;;  %p7402_p3 = scmp.lt.s32.totalorder %s7396_s21, %s7396_s21 }
  0x2a   :  { %p7403_p4 = por %p7402_p3, %p7401_p2 }
  0x2c   :  { %p7404_p5 = pnand %p7403_p4, %p7397_p1 }
  0x2e   :  { %7407 = shalt.err (!%p7404_p5)
}
  0x2f   :  { %s7474_s3 = smov 256   ;;  %s7475_s22 = smov 16  }
  0x30   :  { %52 = dma.hbm_to_vmem [thread:$0]  %s9755_s2, 7168, %s47_s20, [#allocation9], %s7474_s3, %s7474_s3, %s7475_s22  }
  0x31   :  { %s7476_s25 = smov [#allocation13]  }
  0x32   :  { %s70_s26 = sshll.u32 %s7476_s25, 4  ;;  %s71_s26 = int_to_ptr.vmem [resolvable:$true] %s70_s26 }
  0x33   :  { %s7416_s0 = scalar_lea.vmem %s71_s26, 256  ;;  %p7421_p7 = scmp.lt.s32.totalorder %s71_s26, %s71_s26 }
  0x34   :  { %p7417_p6 = scmp.ne.s32.totalorder %s71_s26, %s7416_s0  ;;  %p7422_p8 = scmp.lt.s32.totalorder %s7416_s0, %s7416_s0 }
  0x36   :  { %p7423_p9 = por %p7422_p8, %p7421_p7 }
  0x38   :  { %p7424_p10 = pnand %p7423_p9, %p7417_p6 }
  0x3a   :  { %7427 = shalt.err (!%p7424_p10)
}
  0x3b   :  { %76 = dma.hbm_to_vmem [thread:$0]  %s9757_s4, 256, %s71_s26, [#allocation12], %s7471_s13, %s7471_s13, %s7472_s14  }
  0x3c   :  { %s7477_s29 = smov [#allocation14]  }
  0x3d   :  { %86 = dma.hbm_to_smem %s9759_s6, 16, %s7477_s29, [#allocation7]  }
  0x3e   :  { %7456 = dma.done.wait [#allocation5], 14336  }
  0x3f   :  { %7457 = vsyncadd [#allocation5], 4294952960 }
  0x40   :  { %7458 = dma.done.wait [#allocation9], 50176  }
  0x41   :  { %7459 = vsyncadd [#allocation9], 4294917120 }
  0x42   :  { %7460 = dma.done.wait [#allocation12], 1152  }
  0x43   :  { %7461 = vsyncadd [#allocation12], 4294966144 }
  0x44   :  { %7462 = dma.done.wait [#allocation7], 16  }
  0x45   :  { %7463 = vsyncadd [#allocation7], 4294967280 }
  0x46   :  { %105 = sfence }
  0x47   :  { %v7550_v0 = vld [vmem:[#allocation4 + $0xf8] sm:$0xff]  ;;  %v7554_v2 = vld [vmem:[#allocation4 + $0xf0] sm:$0xff]  ;;  %v7563_v5 = vld [vmem:[#allocation4 + $0xe8] sm:$0xff]  ;;  %s9063_s4 = sld [smem:[#allocation14]]  ;;  %vm4270_vm0 = vcmask 523264   ;;  %vm7480_vm1 = vmmov 0  }
  0x48   :  { %v7552_v1 = vld [vmem:[#allocation4 + $0x78] sm:$0xff]  ;;  %5496 = vmatprep.subr.mxu0 %v7550_v0  ;;  %v7559_v4 = vld [vmem:[#allocation4 + $0x70] sm:$0xff]  ;;  %v7569_v7 = vld [vmem:[#allocation4 + $0x68] sm:$0xff]  ;;  %s5457_s6 = sld [smem:[#allocation14 + $0x1]]  ;;  %vm5349_vm2 = vcmask 408576   ;;  %vm5356_vm3 = vcmask 1041408  }
  0x49   :  { %v7557_v3 = vld [vmem:[#allocation4 + $0x178] sm:$0xff]  ;;  %5497 = vmatpush3.msra.mxu0 %v7552_v1  ;;  %v7565_v6 = vld [vmem:[#allocation4 + $0x170] sm:$0xff]  ;;  %v7571_v8 = vld [vmem:[#allocation4 + $0x168] sm:$0xff] }
  0x4a   :  { %6640 = vmatprep.subr.mxu1 %v7557_v3  ;;  %5498 = vmatprep.subr.mxu0 %v7554_v2  ;;  %v7575_v9 = vld [vmem:[#allocation4 + $0xe0] sm:$0xff]  ;;  %v7585_v12 = vld [vmem:[#allocation4 + $0xd8] sm:$0xff]  ;;  %v7595_v15 = vld [vmem:[#allocation4 + $0xd0] sm:$0xff] }
  0x4b   :  { %6641 = vmatpush3.msra.mxu1 %v7557_v3  ;;  %5499 = vmatpush3.msra.mxu0 %v7559_v4  ;;  %v7579_v10 = vld [vmem:[#allocation4 + $0x60] sm:$0xff]  ;;  %v7589_v13 = vld [vmem:[#allocation4 + $0x58] sm:$0xff]  ;;  %v7599_v16 = vld [vmem:[#allocation4 + $0x50] sm:$0xff] }
  0x4c   :  { %6642 = vmatprep.subr.mxu1 %v7565_v6  ;;  %5500 = vmatprep.subr.mxu0 %v7563_v5  ;;  %v7581_v11 = vld [vmem:[#allocation4 + $0x160] sm:$0xff]  ;;  %v7591_v14 = vld [vmem:[#allocation4 + $0x158] sm:$0xff]  ;;  %v7601_v17 = vld [vmem:[#allocation4 + $0x150] sm:$0xff] }
  0x4d   :  { %6643 = vmatpush3.msra.mxu1 %v7565_v6  ;;  %5501 = vmatpush3.msra.mxu0 %v7569_v7  ;;  %v7605_v18 = vld [vmem:[#allocation4 + $0xc8] sm:$0xff]  ;;  %v7615_v21 = vld [vmem:[#allocation4 + $0xc0] sm:$0xff]  ;;  %v7625_v24 = vld [vmem:[#allocation4 + $0xb8] sm:$0xff] }
  0x4e   :  { %6644 = vmatprep.subr.mxu1 %v7571_v8  ;;  %5502 = vmatprep.subr.mxu0 %v7575_v9  ;;  %v7609_v19 = vld [vmem:[#allocation4 + $0x48] sm:$0xff]  ;;  %v7619_v22 = vld [vmem:[#allocation4 + $0x40] sm:$0xff]  ;;  %v7629_v25 = vld [vmem:[#allocation4 + $0x38] sm:$0xff] }
  0x4f   :  { %6645 = vmatpush3.msra.mxu1 %v7571_v8  ;;  %5503 = vmatpush3.msra.mxu0 %v7579_v10  ;;  %v7611_v20 = vld [vmem:[#allocation4 + $0x148] sm:$0xff]  ;;  %v7621_v23 = vld [vmem:[#allocation4 + $0x140] sm:$0xff]  ;;  %v7631_v26 = vld [vmem:[#allocation4 + $0x138] sm:$0xff] }
  0x50   :  { %6646 = vmatprep.subr.mxu1 %v7581_v11  ;;  %5504 = vmatprep.subr.mxu0 %v7585_v12  ;;  %v7635_v27 = vld [vmem:[#allocation4 + $0xb0] sm:$0xff]  ;;  %v7645_v30 = vld [vmem:[#allocation4 + $0xa8] sm:$0xff]  ;;  %v7655_v33 = vld [vmem:[#allocation4 + $0xa0] sm:$0xff] }
  0x51   :  { %6647 = vmatpush3.msra.mxu1 %v7581_v11  ;;  %5505 = vmatpush3.msra.mxu0 %v7589_v13  ;;  %v7639_v28 = vld [vmem:[#allocation4 + $0x30] sm:$0xff]  ;;  %v7649_v31 = vld [vmem:[#allocation4 + $0x28] sm:$0xff]  ;;  %v7659_v34 = vld [vmem:[#allocation4 + $0x20] sm:$0xff] }
  0x52   :  { %6648 = vmatprep.subr.mxu1 %v7591_v14  ;;  %5506 = vmatprep.subr.mxu0 %v7595_v15  ;;  %v7641_v29 = vld [vmem:[#allocation4 + $0x130] sm:$0xff]  ;;  %v7651_v32 = vld [vmem:[#allocation4 + $0x128] sm:$0xff]  ;;  %v7661_v35 = vld [vmem:[#allocation4 + $0x120] sm:$0xff] }
  0x53   :  { %6649 = vmatpush3.msra.mxu1 %v7591_v14  ;;  %5507 = vmatpush3.msra.mxu0 %v7599_v16  ;;  %v7665_v36 = vld [vmem:[#allocation4 + $0x98] sm:$0xff]  ;;  %v7675_v39 = vld [vmem:[#allocation4 + $0x90] sm:$0xff]  ;;  %v7685_v42 = vld [vmem:[#allocation4 + $0x88] sm:$0xff] }
  0x54   :  { %6650 = vmatprep.subr.mxu1 %v7601_v17  ;;  %5508 = vmatprep.subr.mxu0 %v7605_v18  ;;  %v7669_v37 = vld [vmem:[#allocation4 + $0x18] sm:$0xff]  ;;  %v7679_v40 = vld [vmem:[#allocation4 + $0x10] sm:$0xff]  ;;  %v7689_v43 = vld [vmem:[#allocation4 + $0x8] sm:$0xff] }
  0x55   :  { %6651 = vmatpush3.msra.mxu1 %v7601_v17  ;;  %5509 = vmatpush3.msra.mxu0 %v7609_v19  ;;  %v7671_v38 = vld [vmem:[#allocation4 + $0x118] sm:$0xff]  ;;  %v7681_v41 = vld [vmem:[#allocation4 + $0x110] sm:$0xff]  ;;  %v7691_v44 = vld [vmem:[#allocation4 + $0x108] sm:$0xff] }
  0x56   :  { %6652 = vmatprep.subr.mxu1 %v7611_v20  ;;  %5510 = vmatprep.subr.mxu0 %v7615_v21  ;;  %v7695_v45 = vld [vmem:[#allocation4 + $0x80] sm:$0xff]  ;;  %v157_v46 = vld [vmem:[#allocation8 + $0x8] sm:$0xff]  ;;  %v158_v50 = vld [vmem:[#allocation8 + $0x10] sm:$0xff] }
  0x57   :  { %6653 = vmatpush3.msra.mxu1 %v7611_v20  ;;  %5511 = vmatpush3.msra.mxu0 %v7619_v22  ;;  %v7699_v47 = vld [vmem:[#allocation4] sm:$0xff]  ;;  %v161_v51 = vld [vmem:[#allocation8 + $0x28] sm:$0xff]  ;;  %v159_v53 = vld [vmem:[#allocation8 + $0x18] sm:$0xff] }
  0x58   :  { %6654 = vmatprep.subr.mxu1 %v7621_v23  ;;  %5512 = vmatprep.subr.mxu0 %v7625_v24  ;;  %v156_v48 = vld [vmem:[#allocation8] sm:$0xff]  ;;  %v163_v54 = vld [vmem:[#allocation8 + $0x38] sm:$0xff]  ;;  %v162_v55 = vld [vmem:[#allocation8 + $0x30] sm:$0xff] }
  0x59   :  { %6655 = vmatpush3.msra.mxu1 %v7621_v23  ;;  %5513 = vmatpush3.msra.mxu0 %v7629_v25  ;;  %v7703_v49 = vld [vmem:[#allocation4 + $0x100] sm:$0xff]  ;;  %v167_v57 = vld [vmem:[#allocation8 + $0x58] sm:$0xff]  ;;  %v166_v58 = vld [vmem:[#allocation8 + $0x50] sm:$0xff] }
  0x5a   :  { %6656 = vmatprep.subr.mxu1 %v7631_v26  ;;  %5514 = vmatprep.subr.mxu0 %v7635_v27  ;;  %v160_v52 = vld [vmem:[#allocation8 + $0x20] sm:$0xff]  ;;  %v165_v59 = vld [vmem:[#allocation8 + $0x48] sm:$0xff]  ;;  %v170_v62 = vld [vmem:[#allocation8 + $0x70] sm:$0xff] }
  0x5b   :  { %6657 = vmatpush3.msra.mxu1 %v7631_v26  ;;  %5515 = vmatpush3.msra.mxu0 %v7639_v28  ;;  %v164_v56 = vld [vmem:[#allocation8 + $0x40] sm:$0xff]  ;;  %v169_v60 = vld [vmem:[#allocation8 + $0x68] sm:$0xff] }
  0x5c   :  { %6658 = vmatprep.subr.mxu1 %v7641_v29  ;;  %5516 = vmatprep.subr.mxu0 %v7645_v30  ;;  %v168_v61 = vld [vmem:[#allocation8 + $0x60] sm:$0xff]  ;;  %v173_v63 = vld [vmem:[#allocation8 + $0x88] sm:$0xff] }
  0x5d   :  { %6659 = vmatpush3.msra.mxu1 %v7641_v29  ;;  %5517 = vmatpush3.msra.mxu0 %v7649_v31 }
  0x5e   :  { %6660 = vmatprep.subr.mxu1 %v7651_v32  ;;  %5518 = vmatprep.subr.mxu0 %v7655_v33 }
  0x5f   :  { %6661 = vmatpush3.msra.mxu1 %v7651_v32  ;;  %5519 = vmatpush3.msra.mxu0 %v7659_v34 }
  0x60   :  { %6662 = vmatprep.subr.mxu1 %v7661_v35  ;;  %5520 = vmatprep.subr.mxu0 %v7665_v36 }
  0x61   :  { %6663 = vmatpush3.msra.mxu1 %v7661_v35  ;;  %5521 = vmatpush3.msra.mxu0 %v7669_v37 }
  0x62   :  { %6664 = vmatprep.subr.mxu1 %v7671_v38  ;;  %5522 = vmatprep.subr.mxu0 %v7675_v39 }
  0x63   :  { %6665 = vmatpush3.msra.mxu1 %v7671_v38  ;;  %5523 = vmatpush3.msra.mxu0 %v7679_v40 }
  0x64   :  { %6666 = vmatprep.subr.mxu1 %v7681_v41  ;;  %5524 = vmatprep.subr.mxu0 %v7685_v42 }
  0x65   :  { %6667 = vmatpush3.msra.mxu1 %v7681_v41  ;;  %5525 = vmatpush3.msra.mxu0 %v7689_v43 }
  0x66   :  { %6668 = vmatprep.subr.mxu1 %v7691_v44  ;;  %5526 = vmatprep.subr.mxu0 %v7695_v45 }
  0x67   :  { %244 = vmatprep.mubr.f32.mxu0 %v157_v46  ;;  %5527 = vmatpush3.msra.mxu0 %v7699_v47  ;;  %v172_v46 = vld [vmem:[#allocation8 + $0x80] sm:$0xff] }
  0x68   :  { %6669 = vmatpush3.msra.mxu1 %v7691_v44  ;;  %245 = vmatmul.mubr.f32.vlgmr.msra.gmra.mxu0 %v156_v48  ;;  %v171_v48 = vld [vmem:[#allocation8 + $0x78] sm:$0xff] }
  0x69   :  { %6670 = vmatprep.subr.mxu1 %v7703_v49  ;;  %5576 = vmatprep.subr.mxu0 %v7550_v0 }
  0x6a   :  { %6671 = vmatpush3.msra.mxu1 %v7703_v49  ;;  %6672 = vmatprep.mubr.f32.mxu1 %v158_v50  ;;  %v175_v50 = vld [vmem:[#allocation8 + $0x98] sm:$0xff] }
  0x6b   :  { %5577 = vmatpush3.msra.mxu0 %v7552_v1  ;;  %6673 = vmatmul.mubr.f32.vlgmr.msra.gmra.mxu1 %v161_v51  ;;  %v174_v51 = vld [vmem:[#allocation8 + $0x90] sm:$0xff] }
  0x6c   :  { %5578 = vmatprep.subr.mxu0 %v7554_v2  ;;  %6684 = vmatprep.subr.mxu1 %v7557_v3 }
  0x6d   :  { %249 = vmatprep.mubr.f32.mxu0 %v160_v52  ;;  %5579 = vmatpush3.msra.mxu0 %v7559_v4  ;;  %v176_v52 = vld [vmem:[#allocation8 + $0xa0] sm:$0xff] }
  0x6e   :  { %6685 = vmatpush3.msra.mxu1 %v7557_v3  ;;  %250 = vmatmul.mubr.f32.gmra.mxu0 %v159_v53  ;;  %v179_v53 = vld [vmem:[#allocation8 + $0xb8] sm:$0xff] }
  0x6f   :  { %5580 = vmatprep.subr.mxu0 %v7563_v5  ;;  %6686 = vmatprep.subr.mxu1 %v7565_v6 }
  0x70   :  { %5581 = vmatpush3.msra.mxu0 %v7569_v7  ;;  %6687 = vmatpush3.msra.mxu1 %v7565_v6 }
  0x71   :  { %5582 = vmatprep.subr.mxu0 %v7575_v9  ;;  %6688 = vmatprep.subr.mxu1 %v7571_v8 }
  0x72   :  { %254 = vmatprep.mubr.f32.mxu0 %v163_v54  ;;  %5583 = vmatpush3.msra.mxu0 %v7579_v10  ;;  %v178_v54 = vld [vmem:[#allocation8 + $0xb0] sm:$0xff] }
  0x73   :  { %6689 = vmatpush3.msra.mxu1 %v7571_v8  ;;  %255 = vmatmul.mubr.f32.gmra.mxu0 %v162_v55  ;;  %v177_v55 = vld [vmem:[#allocation8 + $0xa8] sm:$0xff] }
  0x74   :  { %5584 = vmatprep.subr.mxu0 %v7585_v12  ;;  %6690 = vmatprep.subr.mxu1 %v7581_v11 }
  0x75   :  { %6675 = vmatprep.mubr.f32.mxu1 %v164_v56  ;;  %5585 = vmatpush3.msra.mxu0 %v7589_v13  ;;  %v453_v56 = vld [vmem:[#allocation8 + $0xc8] sm:$0xff] }
  0x76   :  { %6691 = vmatpush3.msra.mxu1 %v7581_v11  ;;  %5586 = vmatprep.subr.mxu0 %v7595_v15 }
  0x77   :  { %6676 = vmatmul.mubr.f32.gmra.mxu1 %v167_v57  ;;  %6692 = vmatprep.subr.mxu1 %v7591_v14  ;;  %v452_v57 = vld [vmem:[#allocation8 + $0xc0] sm:$0xff] }
  0x78   :  { %259 = vmatprep.mubr.f32.mxu0 %v166_v58  ;;  %5587 = vmatpush3.msra.mxu0 %v7599_v16  ;;  %v454_v58 = vld [vmem:[#allocation8 + $0xd0] sm:$0xff] }
  0x79   :  { %6693 = vmatpush3.msra.mxu1 %v7591_v14  ;;  %260 = vmatmul.mubr.f32.gmra.mxu0 %v165_v59  ;;  %v457_v59 = vld [vmem:[#allocation8 + $0xe8] sm:$0xff] }
  0x7a   :  { %5588 = vmatprep.subr.mxu0 %v7605_v18  ;;  %6694 = vmatprep.subr.mxu1 %v7601_v17 }
  0x7b   :  { %5589 = vmatpush3.msra.mxu0 %v7609_v19  ;;  %6695 = vmatpush3.msra.mxu1 %v7601_v17 }
  0x7c   :  { %5590 = vmatprep.subr.mxu0 %v7615_v21  ;;  %6696 = vmatprep.subr.mxu1 %v7611_v20 }
  0x7d   :  { %264 = vmatprep.mubr.f32.mxu0 %v169_v60  ;;  %5591 = vmatpush3.msra.mxu0 %v7619_v22  ;;  %v456_v60 = vld [vmem:[#allocation8 + $0xe0] sm:$0xff] }
  0x7e   :  { %6697 = vmatpush3.msra.mxu1 %v7611_v20  ;;  %265 = vmatmul.mubr.f32.gmra.mxu0 %v168_v61  ;;  %v455_v61 = vld [vmem:[#allocation8 + $0xd8] sm:$0xff] }
  0x7f   :  { %5592 = vmatprep.subr.mxu0 %v7625_v24  ;;  %6698 = vmatprep.subr.mxu1 %v7621_v23 }
  0x80   :  { %6678 = vmatprep.mubr.f32.mxu1 %v170_v62  ;;  %5593 = vmatpush3.msra.mxu0 %v7629_v25  ;;  %v459_v62 = vld [vmem:[#allocation8 + $0xf8] sm:$0xff] }
  0x81   :  { %6699 = vmatpush3.msra.mxu1 %v7621_v23  ;;  %5594 = vmatprep.subr.mxu0 %v7635_v27 }
  0x82   :  { %6679 = vmatmul.mubr.f32.gmra.mxu1 %v173_v63  ;;  %6700 = vmatprep.subr.mxu1 %v7631_v26  ;;  %v458_v63 = vld [vmem:[#allocation8 + $0xf0] sm:$0xff] }
  0x83   :  { %269 = vmatprep.mubr.f32.mxu0 %v172_v46  ;;  %5595 = vmatpush3.msra.mxu0 %v7639_v28  ;;  %v460_v46 = vld [vmem:[#allocation8 + $0x100] sm:$0xff] }
  0x84   :  { %6701 = vmatpush3.msra.mxu1 %v7631_v26  ;;  %270 = vmatmul.mubr.f32.gmra.mxu0 %v171_v48  ;;  %v463_v48 = vld [vmem:[#allocation8 + $0x118] sm:$0xff] }
  0x85   :  { %5596 = vmatprep.subr.mxu0 %v7645_v30  ;;  %6702 = vmatprep.subr.mxu1 %v7641_v29 }
  0x86   :  { %5597 = vmatpush3.msra.mxu0 %v7649_v31  ;;  %6703 = vmatpush3.msra.mxu1 %v7641_v29 }
  0x87   :  { %5598 = vmatprep.subr.mxu0 %v7655_v33  ;;  %6704 = vmatprep.subr.mxu1 %v7651_v32 }
  0x88   :  { %274 = vmatprep.mubr.f32.mxu0 %v175_v50  ;;  %5599 = vmatpush3.msra.mxu0 %v7659_v34  ;;  %v462_v50 = vld [vmem:[#allocation8 + $0x110] sm:$0xff] }
  0x89   :  { %6705 = vmatpush3.msra.mxu1 %v7651_v32  ;;  %275 = vmatmul.mubr.f32.gmra.mxu0 %v174_v51  ;;  %v461_v51 = vld [vmem:[#allocation8 + $0x108] sm:$0xff] }
  0x8a   :  { %5600 = vmatprep.subr.mxu0 %v7665_v36  ;;  %6706 = vmatprep.subr.mxu1 %v7661_v35 }
  0x8b   :  { %6681 = vmatprep.mubr.f32.mxu1 %v176_v52  ;;  %5601 = vmatpush3.msra.mxu0 %v7669_v37  ;;  %v465_v52 = vld [vmem:[#allocation8 + $0x128] sm:$0xff] }
  0x8c   :  { %6707 = vmatpush3.msra.mxu1 %v7661_v35  ;;  %5602 = vmatprep.subr.mxu0 %v7675_v39 }
  0x8d   :  { %6682 = vmatmul.mubr.f32.gmra.mxu1 %v179_v53  ;;  %6708 = vmatprep.subr.mxu1 %v7671_v38  ;;  %v464_v53 = vld [vmem:[#allocation8 + $0x120] sm:$0xff] }
  0x8e   :  { %279 = vmatprep.mubr.f32.mxu0 %v178_v54  ;;  %5603 = vmatpush3.msra.mxu0 %v7679_v40  ;;  %v466_v54 = vld [vmem:[#allocation8 + $0x130] sm:$0xff] }
  0x8f   :  { %6709 = vmatpush3.msra.mxu1 %v7671_v38  ;;  %280 = vmatmul.mubr.f32.gmra.mxu0 %v177_v55  ;;  %v469_v55 = vld [vmem:[#allocation8 + $0x148] sm:$0xff] }
  0x90   :  { %5604 = vmatprep.subr.mxu0 %v7685_v42  ;;  %6710 = vmatprep.subr.mxu1 %v7681_v41 }
  0x91   :  { %5605 = vmatpush3.msra.mxu0 %v7689_v43  ;;  %6711 = vmatpush3.msra.mxu1 %v7681_v41 }
  0x92   :  { %5606 = vmatprep.subr.mxu0 %v7695_v45  ;;  %6712 = vmatprep.subr.mxu1 %v7691_v44 }
  0x93   :  { %5607 = vmatpush3.msra.mxu0 %v7699_v47  ;;  %540 = vmatprep.mubr.f32.mxu0 %v453_v56  ;;  %v468_v56 = vld [vmem:[#allocation8 + $0x140] sm:$0xff] }
  0x94   :  { %6713 = vmatpush3.msra.mxu1 %v7691_v44  ;;  %541 = vmatmul.mubr.f32.vlgmr.msra.gmra.mxu0 %v452_v57  ;;  %v467_v57 = vld [vmem:[#allocation8 + $0x138] sm:$0xff] }
  0x95   :  { %6714 = vmatprep.subr.mxu1 %v7703_v49  ;;  %5656 = vmatprep.subr.mxu0 %v7550_v0 }
  0x96   :  { %6715 = vmatpush3.msra.mxu1 %v7703_v49  ;;  %6716 = vmatprep.mubr.f32.mxu1 %v454_v58  ;;  %v471_v58 = vld [vmem:[#allocation8 + $0x158] sm:$0xff] }
  0x97   :  { %5657 = vmatpush3.msra.mxu0 %v7552_v1  ;;  %6717 = vmatmul.mubr.f32.vlgmr.msra.gmra.mxu1 %v457_v59  ;;  %v470_v59 = vld [vmem:[#allocation8 + $0x150] sm:$0xff] }
  0x98   :  { %5658 = vmatprep.subr.mxu0 %v7554_v2  ;;  %6728 = vmatprep.subr.mxu1 %v7557_v3 }
  0x99   :  { %545 = vmatprep.mubr.f32.mxu0 %v456_v60  ;;  %5659 = vmatpush3.msra.mxu0 %v7559_v4  ;;  %v472_v60 = vld [vmem:[#allocation8 + $0x160] sm:$0xff] }
  0x9a   :  { %6729 = vmatpush3.msra.mxu1 %v7557_v3  ;;  %546 = vmatmul.mubr.f32.gmra.mxu0 %v455_v61  ;;  %v475_v61 = vld [vmem:[#allocation8 + $0x178] sm:$0xff] }
  0x9b   :  { %5660 = vmatprep.subr.mxu0 %v7563_v5  ;;  %6730 = vmatprep.subr.mxu1 %v7565_v6 }
  0x9c   :  { %5661 = vmatpush3.msra.mxu0 %v7569_v7  ;;  %6731 = vmatpush3.msra.mxu1 %v7565_v6 }
  0x9d   :  { %5662 = vmatprep.subr.mxu0 %v7575_v9  ;;  %6732 = vmatprep.subr.mxu1 %v7571_v8 }
  0x9e   :  { %550 = vmatprep.mubr.f32.mxu0 %v459_v62  ;;  %5663 = vmatpush3.msra.mxu0 %v7579_v10  ;;  %v474_v62 = vld [vmem:[#allocation8 + $0x170] sm:$0xff] }
  0x9f   :  { %6733 = vmatpush3.msra.mxu1 %v7571_v8  ;;  %551 = vmatmul.mubr.f32.gmra.mxu0 %v458_v63  ;;  %v473_v63 = vld [vmem:[#allocation8 + $0x168] sm:$0xff] }
  0xa0   :  { %5664 = vmatprep.subr.mxu0 %v7585_v12  ;;  %6734 = vmatprep.subr.mxu1 %v7581_v11 }
  0xa1   :  { %6719 = vmatprep.mubr.f32.mxu1 %v460_v46  ;;  %5665 = vmatpush3.msra.mxu0 %v7589_v13  ;;  %v747_v46 = vld [vmem:[#allocation8 + $0x180] sm:$0xff] }
  0xa2   :  { %6735 = vmatpush3.msra.mxu1 %v7581_v11  ;;  %5666 = vmatprep.subr.mxu0 %v7595_v15 }
  0xa3   :  { %6720 = vmatmul.mubr.f32.gmra.mxu1 %v463_v48  ;;  %6736 = vmatprep.subr.mxu1 %v7591_v14  ;;  %v752_v48 = vld [vmem:[#allocation8 + $0x1a8] sm:$0xff] }
  0xa4   :  { %555 = vmatprep.mubr.f32.mxu0 %v462_v50  ;;  %5667 = vmatpush3.msra.mxu0 %v7599_v16  ;;  %v751_v50 = vld [vmem:[#allocation8 + $0x1a0] sm:$0xff] }
  0xa5   :  { %6737 = vmatpush3.msra.mxu1 %v7591_v14  ;;  %556 = vmatmul.mubr.f32.gmra.mxu0 %v461_v51  ;;  %v7844_v51 = vld [vmem:[#allocation4 + $0x190] sm:$0xff] }
  0xa6   :  { %5668 = vmatprep.subr.mxu0 %v7605_v18  ;;  %6738 = vmatprep.subr.mxu1 %v7601_v17 }
  0xa7   :  { %5669 = vmatpush3.msra.mxu0 %v7609_v19  ;;  %6739 = vmatpush3.msra.mxu1 %v7601_v17 }
  0xa8   :  { %5670 = vmatprep.subr.mxu0 %v7615_v21  ;;  %6740 = vmatprep.subr.mxu1 %v7611_v20 }
  0xa9   :  { %560 = vmatprep.mubr.f32.mxu0 %v465_v52  ;;  %5671 = vmatpush3.msra.mxu0 %v7619_v22  ;;  %v754_v52 = vld [vmem:[#allocation8 + $0x1b8] sm:$0xff] }
  0xaa   :  { %6741 = vmatpush3.msra.mxu1 %v7611_v20  ;;  %561 = vmatmul.mubr.f32.gmra.mxu0 %v464_v53  ;;  %v7956_v53 = vld [vmem:[#allocation4 + $0x1b8] sm:$0xff] }
  0xab   :  { %5672 = vmatprep.subr.mxu0 %v7625_v24  ;;  %6742 = vmatprep.subr.mxu1 %v7621_v23 }
  0xac   :  { %6722 = vmatprep.mubr.f32.mxu1 %v466_v54  ;;  %5673 = vmatpush3.msra.mxu0 %v7629_v25  ;;  %v1052_v54 = vld [vmem:[#allocation8 + $0x290] sm:$0xff] }
  0xad   :  { %6743 = vmatpush3.msra.mxu1 %v7621_v23  ;;  %5674 = vmatprep.subr.mxu0 %v7635_v27 }
  0xae   :  { %6723 = vmatmul.mubr.f32.gmra.mxu1 %v469_v55  ;;  %6744 = vmatprep.subr.mxu1 %v7631_v26  ;;  %v7960_v55 = vld [vmem:[#allocation4 + $0xb0] sm:$0xff] }
  0xaf   :  { %565 = vmatprep.mubr.f32.mxu0 %v468_v56  ;;  %5675 = vmatpush3.msra.mxu0 %v7639_v28  ;;  %v1051_v56 = vld [vmem:[#allocation8 + $0x288] sm:$0xff] }
  0xb0   :  { %6745 = vmatpush3.msra.mxu1 %v7631_v26  ;;  %566 = vmatmul.mubr.f32.gmra.mxu0 %v467_v57  ;;  %v7963_v57 = vld [vmem:[#allocation4 + $0x128] sm:$0xff] }
  0xb1   :  { %5676 = vmatprep.subr.mxu0 %v7645_v30  ;;  %6746 = vmatprep.subr.mxu1 %v7641_v29 }
  0xb2   :  { %5677 = vmatpush3.msra.mxu0 %v7649_v31  ;;  %6747 = vmatpush3.msra.mxu1 %v7641_v29 }
  0xb3   :  { %5678 = vmatprep.subr.mxu0 %v7655_v33  ;;  %6748 = vmatprep.subr.mxu1 %v7651_v32 }
  0xb4   :  { %570 = vmatprep.mubr.f32.mxu0 %v471_v58  ;;  %5679 = vmatpush3.msra.mxu0 %v7659_v34  ;;  %v7966_v58 = vld [vmem:[#allocation4 + $0x1b0] sm:$0xff] }
  0xb5   :  { %6749 = vmatpush3.msra.mxu1 %v7651_v32  ;;  %571 = vmatmul.mubr.f32.gmra.mxu0 %v470_v59  ;;  %v7968_v59 = vld [vmem:[#allocation4 + $0xa8] sm:$0xff] }
  0xb6   :  { %5680 = vmatprep.subr.mxu0 %v7665_v36  ;;  %6750 = vmatprep.subr.mxu1 %v7661_v35 }
  0xb7   :  { %6725 = vmatprep.mubr.f32.mxu1 %v472_v60  ;;  %5681 = vmatpush3.msra.mxu0 %v7669_v37  ;;  %v748_v37 = vld [vmem:[#allocation8 + $0x188] sm:$0xff]  ;;  %v7972_v60 = vld [vmem:[#allocation4 + $0x120] sm:$0xff] }
  0xb8   :  { %6751 = vmatpush3.msra.mxu1 %v7661_v35  ;;  %5682 = vmatprep.subr.mxu0 %v7675_v39 }
  0xb9   :  { %6726 = vmatmul.mubr.f32.gmra.mxu1 %v475_v61  ;;  %6752 = vmatprep.subr.mxu1 %v7671_v38  ;;  %v7975_v61 = vld [vmem:[#allocation4 + $0x1a8] sm:$0xff] }
  0xba   :  { %575 = vmatprep.mubr.f32.mxu0 %v474_v62  ;;  %5683 = vmatpush3.msra.mxu0 %v7679_v40  ;;  %v749_v40 = vld [vmem:[#allocation8 + $0x190] sm:$0xff]  ;;  %v1055_v62 = vld [vmem:[#allocation8 + $0x2a8] sm:$0xff] }
  0xbb   :  { %6753 = vmatpush3.msra.mxu1 %v7671_v38  ;;  %576 = vmatmul.mubr.f32.gmra.mxu0 %v473_v63  ;;  %v7979_v63 = vld [vmem:[#allocation4 + $0xa0] sm:$0xff] }
  0xbc   :  { %5684 = vmatprep.subr.mxu0 %v7685_v42  ;;  %6754 = vmatprep.subr.mxu1 %v7681_v41 }
  0xbd   :  { %5685 = vmatpush3.msra.mxu0 %v7689_v43  ;;  %6755 = vmatpush3.msra.mxu1 %v7681_v41  ;;  %v7839_v43 = vld [vmem:[#allocation4 + $0x198] sm:$0xff] }
  0xbe   :  { %5686 = vmatprep.subr.mxu0 %v7695_v45  ;;  %6756 = vmatprep.subr.mxu1 %v7691_v44 }
  0xbf   :  { %5687 = vmatpush3.msra.mxu0 %v7699_v47  ;;  %835 = vmatprep.mubr.f32.mxu0 %v748_v37  ;;  %v750_v47 = vld [vmem:[#allocation8 + $0x198] sm:$0xff]  ;;  %v1054_v37 = vld [vmem:[#allocation8 + $0x2a0] sm:$0xff] }
  0xc0   :  { %6757 = vmatpush3.msra.mxu1 %v7691_v44  ;;  %836 = vmatmul.mubr.f32.vlgmr.msra.gmra.mxu0 %v747_v46  ;;  %v7983_v46 = vld [vmem:[#allocation4 + $0x118] sm:$0xff] }
  0xc1   :  { %6758 = vmatprep.subr.mxu1 %v7703_v49  ;;  %5736 = vmatprep.subr.mxu0 %v7671_v38  ;;  %v7849_v38 = vld [vmem:[#allocation4 + $0x188] sm:$0xff] }
  0xc2   :  { %6759 = vmatpush3.msra.mxu1 %v7703_v49  ;;  %6760 = vmatprep.mubr.f32.mxu1 %v749_v40  ;;  %v7986_v40 = vld [vmem:[#allocation4 + $0x1a0] sm:$0xff] }
  0xc3   :  { %5737 = vmatpush3.msra.mxu0 %v7665_v36  ;;  %6761 = vmatmul.mubr.f32.vlgmr.msra.gmra.mxu1 %v752_v48  ;;  %v753_v36 = vld [vmem:[#allocation8 + $0x1b0] sm:$0xff] }
  0xc4   :  { %5738 = vmatprep.subr.mxu0 %v7681_v41  ;;  %6772 = vmatprep.subr.mxu1 %v7839_v43  ;;  %v755_v41 = vld [vmem:[#allocation8 + $0x1c0] sm:$0xff]  ;;  %v1056_v48 = vld [vmem:[#allocation8 + $0x2b0] sm:$0xff] }
  0xc5   :  { %840 = vmatprep.mubr.f32.mxu0 %v751_v50  ;;  %5739 = vmatpush3.msra.mxu0 %v7675_v39  ;;  %v7856_v39 = vld [vmem:[#allocation4 + $0x180] sm:$0xff]  ;;  %v1295_v50 = vld [vmem:[#allocation4 + $0x98] sm:$0xff] }
  0xc6   :  { %6773 = vmatpush3.msra.mxu1 %v7839_v43  ;;  %841 = vmatmul.mubr.f32.gmra.mxu0 %v750_v47  ;;  %v1059_v47 = vld [vmem:[#allocation8 + $0x2c8] sm:$0xff] }
  0xc7   :  { %5740 = vmatprep.subr.mxu0 %v7691_v44  ;;  %6774 = vmatprep.subr.mxu1 %v7844_v51  ;;  %v758_v44 = vld [vmem:[#allocation8 + $0x1d8] sm:$0xff] }
  0xc8   :  { %5741 = vmatpush3.msra.mxu0 %v7685_v42  ;;  %6775 = vmatpush3.msra.mxu1 %v7844_v51  ;;  %v757_v42 = vld [vmem:[#allocation8 + $0x1d0] sm:$0xff] }
  0xc9   :  { %5742 = vmatprep.subr.mxu0 %v7703_v49  ;;  %6776 = vmatprep.subr.mxu1 %v7849_v38  ;;  %v756_v49 = vld [vmem:[#allocation8 + $0x1c8] sm:$0xff] }
  0xca   :  { %845 = vmatprep.mubr.f32.mxu0 %v754_v52  ;;  %5743 = vmatpush3.msra.mxu0 %v7695_v45  ;;  %v7953_v45 = vld [vmem:[#allocation4 + $0x130] sm:$0xff] }
  0xcb   :  { %6777 = vmatpush3.msra.mxu1 %v7849_v38  ;;  %846 = vmatmul.mubr.f32.gmra.mxu0 %v753_v36  ;;  %v7991_v52 = vld [vmem:[#allocation4 + $0x110] sm:$0xff]  ;;  %v1058_v36 = vld [vmem:[#allocation8 + $0x2c0] sm:$0xff] }
  0xcc   :  { %5744 = vmatprep.subr.mxu0 %v7550_v0  ;;  %6778 = vmatprep.subr.mxu1 %v7856_v39  ;;  %v760_v0 = vld [vmem:[#allocation8 + $0x1e8] sm:$0xff] }
  0xcd   :  { %6763 = vmatprep.mubr.f32.mxu1 %v755_v41  ;;  %5745 = vmatpush3.msra.mxu0 %v7552_v1  ;;  %v759_v1 = vld [vmem:[#allocation8 + $0x1e0] sm:$0xff]  ;;  %v1294_v41 = vld [vmem:[#allocation4 + $0x90] sm:$0xff] }
  0xce   :  { %6779 = vmatpush3.msra.mxu1 %v7856_v39  ;;  %5746 = vmatprep.subr.mxu0 %v7554_v2  ;;  %v761_v2 = vld [vmem:[#allocation8 + $0x1f0] sm:$0xff] }
  0xcf   :  { %6764 = vmatmul.mubr.f32.gmra.mxu1 %v758_v44  ;;  %6780 = vmatprep.subr.mxu1 %v7557_v3  ;;  %v1057_v44 = vld [vmem:[#allocation8 + $0x2b8] sm:$0xff] }
  0xd0   :  { %850 = vmatprep.mubr.f32.mxu0 %v757_v42  ;;  %5747 = vmatpush3.msra.mxu0 %v7559_v4  ;;  %v763_v4 = vld [vmem:[#allocation8 + $0x200] sm:$0xff]  ;;  %v7996_v42 = vld [vmem:[#allocation4 + $0x108] sm:$0xff] }
  0xd1   :  { %6781 = vmatpush3.msra.mxu1 %v7557_v3  ;;  %851 = vmatmul.mubr.f32.gmra.mxu0 %v756_v49  ;;  %v764_v3 = vld [vmem:[#allocation8 + $0x208] sm:$0xff] }
  0xd2   :  { %5748 = vmatprep.subr.mxu0 %v7563_v5  ;;  %6782 = vmatprep.subr.mxu1 %v7565_v6  ;;  %v762_v5 = vld [vmem:[#allocation8 + $0x1f8] sm:$0xff]  ;;  %v1293_v49 = vld [vmem:[#allocation4 + $0x88] sm:$0xff] }
  0xd3   :  { %5749 = vmatpush3.msra.mxu0 %v7569_v7  ;;  %6783 = vmatpush3.msra.mxu1 %v7565_v6  ;;  %v766_v6 = vld [vmem:[#allocation8 + $0x218] sm:$0xff]  ;;  %v765_v7 = vld [vmem:[#allocation8 + $0x210] sm:$0xff] }
  0xd4   :  { %5750 = vmatprep.subr.mxu0 %v7575_v9  ;;  %6784 = vmatprep.subr.mxu1 %v7571_v8  ;;  %v770_v9 = vld [vmem:[#allocation8 + $0x238] sm:$0xff] }
  0xd5   :  { %855 = vmatprep.mubr.f32.mxu0 %v760_v0  ;;  %5751 = vmatpush3.msra.mxu0 %v7579_v10  ;;  %v769_v10 = vld [vmem:[#allocation8 + $0x230] sm:$0xff]  ;;  %v8000_v0 = vld [vmem:[#allocation4 + $0x100] sm:$0xff] }
  0xd6   :  { %6785 = vmatpush3.msra.mxu1 %v7571_v8  ;;  %856 = vmatmul.mubr.f32.gmra.mxu0 %v759_v1  ;;  %v767_v8 = vld [vmem:[#allocation8 + $0x220] sm:$0xff]  ;;  %v1061_v1 = vld [vmem:[#allocation8 + $0x2d8] sm:$0xff] }
  0xd7   :  { %5752 = vmatprep.subr.mxu0 %v7585_v12  ;;  %6786 = vmatprep.subr.mxu1 %v7581_v11  ;;  %v1043_v12 = vld [vmem:[#allocation8 + $0x248] sm:$0xff] }
  0xd8   :  { %6766 = vmatprep.mubr.f32.mxu1 %v761_v2  ;;  %5753 = vmatpush3.msra.mxu0 %v7589_v13  ;;  %v1042_v13 = vld [vmem:[#allocation8 + $0x240] sm:$0xff] }
  0xd9   :  { %6787 = vmatpush3.msra.mxu1 %v7581_v11  ;;  %5754 = vmatprep.subr.mxu0 %v7595_v15  ;;  %v768_v11 = vld [vmem:[#allocation8 + $0x228] sm:$0xff]  ;;  %v1044_v15 = vld [vmem:[#allocation8 + $0x250] sm:$0xff]  ;;  %v1292_v2 = vld [vmem:[#allocation4 + $0x80] sm:$0xff] }
  0xda   :  { %6767 = vmatmul.mubr.f32.gmra.mxu1 %v764_v3  ;;  %6788 = vmatprep.subr.mxu1 %v7591_v14  ;;  %v1060_v3 = vld [vmem:[#allocation8 + $0x2d0] sm:$0xff] }
  0xdb   :  { %860 = vmatprep.mubr.f32.mxu0 %v763_v4  ;;  %5755 = vmatpush3.msra.mxu0 %v7599_v16  ;;  %v7910_v16 = vld [vmem:[#allocation4 + $0xd8] sm:$0xff] }
  0xdc   :  { %6789 = vmatpush3.msra.mxu1 %v7591_v14  ;;  %861 = vmatmul.mubr.f32.gmra.mxu0 %v762_v5  ;;  %v7907_v14 = vld [vmem:[#allocation4 + $0x158] sm:$0xff]  ;;  %v1062_v5 = vld [vmem:[#allocation8 + $0x2e0] sm:$0xff] }
  0xdd   :  { %5756 = vmatprep.subr.mxu0 %v7605_v18  ;;  %6790 = vmatprep.subr.mxu1 %v7601_v17  ;;  %v7913_v18 = vld [vmem:[#allocation4 + $0x150] sm:$0xff]  ;;  %v8006_v4 = vld [vmem:[#allocation4 + $0xf8] sm:$0xff] }
  0xde   :  { %5757 = vmatpush3.msra.mxu0 %v7609_v19  ;;  %6791 = vmatpush3.msra.mxu1 %v7601_v17  ;;  %v1047_v17 = vld [vmem:[#allocation8 + $0x268] sm:$0xff]  ;;  %v7917_v19 = vld [vmem:[#allocation4 + $0x1d8] sm:$0xff] }
  0xdf   :  { %5758 = vmatprep.subr.mxu0 %v7615_v21  ;;  %6792 = vmatprep.subr.mxu1 %v7611_v20  ;;  %v7920_v21 = vld [vmem:[#allocation4 + $0xd0] sm:$0xff] }
  0xe0   :  { %865 = vmatprep.mubr.f32.mxu0 %v766_v6  ;;  %5759 = vmatpush3.msra.mxu0 %v7619_v22  ;;  %v1045_v22 = vld [vmem:[#allocation8 + $0x258] sm:$0xff] }
  0xe1   :  { %6793 = vmatpush3.msra.mxu1 %v7611_v20  ;;  %866 = vmatmul.mubr.f32.gmra.mxu0 %v765_v7  ;;  %v1046_v20 = vld [vmem:[#allocation8 + $0x260] sm:$0xff]  ;;  %v1291_v6 = vld [vmem:[#allocation4 + $0x78] sm:$0xff] }
  0xe2   :  { %5760 = vmatprep.subr.mxu0 %v7625_v24  ;;  %6794 = vmatprep.subr.mxu1 %v7621_v23  ;;  %v7926_v24 = vld [vmem:[#allocation4 + $0x1d0] sm:$0xff]  ;;  %v1065_v7 = vld [vmem:[#allocation8 + $0x2f8] sm:$0xff] }
  0xe3   :  { %6769 = vmatprep.mubr.f32.mxu1 %v767_v8  ;;  %5761 = vmatpush3.msra.mxu0 %v7629_v25  ;;  %v7928_v25 = vld [vmem:[#allocation4 + $0xc8] sm:$0xff]  ;;  %v8011_v8 = vld [vmem:[#allocation4 + $0xf0] sm:$0xff] }
  0xe4   :  { %6795 = vmatpush3.msra.mxu1 %v7621_v23  ;;  %5762 = vmatprep.subr.mxu0 %v7635_v27  ;;  %v7923_v23 = vld [vmem:[#allocation4 + $0x148] sm:$0xff] }
  0xe5   :  { %6770 = vmatmul.mubr.f32.gmra.mxu1 %v770_v9  ;;  %6796 = vmatprep.subr.mxu1 %v7631_v26  ;;  %v7935_v27 = vld [vmem:[#allocation4 + $0x1c8] sm:$0xff]  ;;  %v8014_v9 = vld [vmem:[#allocation4 + $0x178] sm:$0xff] }
  0xe6   :  { %870 = vmatprep.mubr.f32.mxu0 %v769_v10  ;;  %5763 = vmatpush3.msra.mxu0 %v7639_v28  ;;  %v1049_v28 = vld [vmem:[#allocation8 + $0x278] sm:$0xff]  ;;  %v1064_v10 = vld [vmem:[#allocation8 + $0x2f0] sm:$0xff] }
  0xe7   :  { %6797 = vmatpush3.msra.mxu1 %v7631_v26  ;;  %871 = vmatmul.mubr.f32.gmra.mxu0 %v768_v11  ;;  %v7932_v26 = vld [vmem:[#allocation4 + $0x140] sm:$0xff]  ;;  %v1290_v11 = vld [vmem:[#allocation4 + $0x70] sm:$0xff] }
  0xe8   :  { %5764 = vmatprep.subr.mxu0 %v7645_v30  ;;  %6798 = vmatprep.subr.mxu1 %v7641_v29  ;;  %v1048_v30 = vld [vmem:[#allocation8 + $0x270] sm:$0xff] }
  0xe9   :  { %5765 = vmatpush3.msra.mxu0 %v7649_v31  ;;  %6799 = vmatpush3.msra.mxu1 %v7641_v29  ;;  %v7939_v29 = vld [vmem:[#allocation4 + $0xc0] sm:$0xff]  ;;  %v7943_v31 = vld [vmem:[#allocation4 + $0x138] sm:$0xff] }
  0xea   :  { %5766 = vmatprep.subr.mxu0 %v7655_v33  ;;  %6800 = vmatprep.subr.mxu1 %v7651_v32  ;;  %v1050_v33 = vld [vmem:[#allocation8 + $0x280] sm:$0xff] }
  0xeb   :  { %5767 = vmatpush3.msra.mxu0 %v7659_v34  ;;  %1130 = vmatprep.mubr.f32.mxu0 %v1043_v12  ;;  %v7950_v34 = vld [vmem:[#allocation4 + $0xb8] sm:$0xff]  ;;  %v1063_v12 = vld [vmem:[#allocation8 + $0x2e8] sm:$0xff] }
  0xec   :  { %6801 = vmatpush3.msra.mxu1 %v7651_v32  ;;  %1131 = vmatmul.mubr.f32.vlgmr.msra.gmra.mxu0 %v1042_v13  ;;  %v7946_v32 = vld [vmem:[#allocation4 + $0x1c0] sm:$0xff]  ;;  %v8018_v13 = vld [vmem:[#allocation4 + $0xe8] sm:$0xff] }
  0xed   :  { %6802 = vmatprep.subr.mxu1 %v7661_v35  ;;  %5816 = vmatprep.subr.mxu0 %v7907_v14 }
  0xee   :  { %6803 = vmatpush3.msra.mxu1 %v7661_v35  ;;  %6804 = vmatprep.mubr.f32.mxu1 %v1044_v15  ;;  %v1053_v35 = vld [vmem:[#allocation8 + $0x298] sm:$0xff]  ;;  %v8021_v15 = vld [vmem:[#allocation4 + $0x170] sm:$0xff] }
  0xef   :  { %5817 = vmatpush3.msra.mxu0 %v7910_v16  ;;  %6805 = vmatmul.mubr.f32.vlgmr.msra.gmra.mxu1 %v1047_v17  ;;  %v1289_v17 = vld [vmem:[#allocation4 + $0x68] sm:$0xff] }
  0xf0   :  { %5818 = vmatprep.subr.mxu0 %v7913_v18  ;;  %6816 = vmatprep.subr.mxu1 %v7917_v19 }
  0xf1   :  { %1135 = vmatprep.mubr.f32.mxu0 %v1046_v20  ;;  %5819 = vmatpush3.msra.mxu0 %v7920_v21  ;;  %v8024_v20 = vld [vmem:[#allocation4 + $0xe0] sm:$0xff] }
  0xf2   :  { %6817 = vmatpush3.msra.mxu1 %v7917_v19  ;;  %1136 = vmatmul.mubr.f32.gmra.mxu0 %v1045_v22  ;;  %v8027_v22 = vld [vmem:[#allocation4 + $0x168] sm:$0xff] }
  0xf3   :  { %5820 = vmatprep.subr.mxu0 %v7923_v23  ;;  %6818 = vmatprep.subr.mxu1 %v7926_v24 }
  0xf4   :  { %5821 = vmatpush3.msra.mxu0 %v7928_v25  ;;  %6819 = vmatpush3.msra.mxu1 %v7926_v24 }
  0xf5   :  { %5822 = vmatprep.subr.mxu0 %v7932_v26  ;;  %6820 = vmatprep.subr.mxu1 %v7935_v27 }
  0xf6   :  { %1140 = vmatprep.mubr.f32.mxu0 %v1049_v28  ;;  %5823 = vmatpush3.msra.mxu0 %v7939_v29  ;;  %v1288_v28 = vld [vmem:[#allocation4 + $0x60] sm:$0xff] }
  0xf7   :  { %6821 = vmatpush3.msra.mxu1 %v7935_v27  ;;  %1141 = vmatmul.mubr.f32.gmra.mxu0 %v1048_v30  ;;  %v1338_v30 = vld [vmem:[#allocation8 + $0x308] sm:$0xff] }
  0xf8   :  { %5824 = vmatprep.subr.mxu0 %v7943_v31  ;;  %6822 = vmatprep.subr.mxu1 %v7946_v32 }
  0xf9   :  { %6807 = vmatprep.mubr.f32.mxu1 %v1050_v33  ;;  %5825 = vmatpush3.msra.mxu0 %v7950_v34  ;;  %v1337_v33 = vld [vmem:[#allocation8 + $0x300] sm:$0xff] }
  0xfa   :  { %6823 = vmatpush3.msra.mxu1 %v7946_v32  ;;  %5826 = vmatprep.subr.mxu0 %v7953_v45 }
  0xfb   :  { %6808 = vmatmul.mubr.f32.gmra.mxu1 %v1053_v35  ;;  %6824 = vmatprep.subr.mxu1 %v7956_v53  ;;  %v8032_v35 = vld [vmem:[#allocation4 + $0x160] sm:$0xff] }
  0xfc   :  { %1145 = vmatprep.mubr.f32.mxu0 %v1052_v54  ;;  %5827 = vmatpush3.msra.mxu0 %v7960_v55  ;;  %v1339_v54 = vld [vmem:[#allocation8 + $0x310] sm:$0xff] }
  0xfd   :  { %6825 = vmatpush3.msra.mxu1 %v7956_v53  ;;  %1146 = vmatmul.mubr.f32.gmra.mxu0 %v1051_v56  ;;  %v1342_v56 = vld [vmem:[#allocation8 + $0x328] sm:$0xff] }
  0xfe   :  { %5828 = vmatprep.subr.mxu0 %v7963_v57  ;;  %6826 = vmatprep.subr.mxu1 %v7966_v58 }
  0xff   :  { %5829 = vmatpush3.msra.mxu0 %v7968_v59  ;;  %6827 = vmatpush3.msra.mxu1 %v7966_v58 }
 0x100   :  { %5830 = vmatprep.subr.mxu0 %v7972_v60  ;;  %6828 = vmatprep.subr.mxu1 %v7975_v61 }
 0x101   :  { %1150 = vmatprep.mubr.f32.mxu0 %v1055_v62  ;;  %5831 = vmatpush3.msra.mxu0 %v7979_v63  ;;  %v8039_v62 = vld [vmem:[#allocation4 + $0x218] sm:$0xff] }
 0x102   :  { %6829 = vmatpush3.msra.mxu1 %v7975_v61  ;;  %1151 = vmatmul.mubr.f32.gmra.mxu0 %v1054_v37  ;;  %v1341_v37 = vld [vmem:[#allocation8 + $0x320] sm:$0xff] }
 0x103   :  { %5832 = vmatprep.subr.mxu0 %v7983_v46  ;;  %6830 = vmatprep.subr.mxu1 %v7986_v40 }
 0x104   :  { %6810 = vmatprep.mubr.f32.mxu1 %v1056_v48  ;;  %5833 = vmatpush3.msra.mxu0 %v1295_v50  ;;  %v1340_v48 = vld [vmem:[#allocation8 + $0x318] sm:$0xff]  ;;  %v8044_v50 = vld [vmem:[#allocation4 + $0x210] sm:$0xff] }
 0x105   :  { %6831 = vmatpush3.msra.mxu1 %v7986_v40  ;;  %5834 = vmatprep.subr.mxu0 %v7991_v52 }
 0x106   :  { %6811 = vmatmul.mubr.f32.gmra.mxu1 %v1059_v47  ;;  %6832 = vmatprep.subr.mxu1 %v7839_v43  ;;  %v1344_v47 = vld [vmem:[#allocation8 + $0x338] sm:$0xff] }
 0x107   :  { %1155 = vmatprep.mubr.f32.mxu0 %v1058_v36  ;;  %5835 = vmatpush3.msra.mxu0 %v1294_v41  ;;  %v8056_v36 = vld [vmem:[#allocation4 + $0x200] sm:$0xff] }
 0x108   :  { %6833 = vmatpush3.msra.mxu1 %v7839_v43  ;;  %1156 = vmatmul.mubr.f32.gmra.mxu0 %v1057_v44  ;;  %v1345_v41 = vld [vmem:[#allocation8 + $0x340] sm:$0xff]  ;;  %v8062_v44 = vld [vmem:[#allocation4 + $0x1f8] sm:$0xff] }
 0x109   :  { %5836 = vmatprep.subr.mxu0 %v7996_v42  ;;  %6834 = vmatprep.subr.mxu1 %v7844_v51 }
 0x10a   :  { %5837 = vmatpush3.msra.mxu0 %v1293_v49  ;;  %6835 = vmatpush3.msra.mxu1 %v7844_v51  ;;  %v1346_v49 = vld [vmem:[#allocation8 + $0x348] sm:$0xff] }
 0x10b   :  { %5838 = vmatprep.subr.mxu0 %v8000_v0  ;;  %6836 = vmatprep.subr.mxu1 %v7849_v38 }
 0x10c   :  { %1160 = vmatprep.mubr.f32.mxu0 %v1061_v1  ;;  %5839 = vmatpush3.msra.mxu0 %v1292_v2  ;;  %v8068_v1 = vld [vmem:[#allocation4 + $0x1f0] sm:$0xff] }
 0x10d   :  { %6837 = vmatpush3.msra.mxu1 %v7849_v38  ;;  %1161 = vmatmul.mubr.f32.gmra.mxu0 %v1060_v3  ;;  %v8073_v3 = vld [vmem:[#allocation4 + $0x1e8] sm:$0xff] }
 0x10e   :  { %5840 = vmatprep.subr.mxu0 %v8006_v4  ;;  %6838 = vmatprep.subr.mxu1 %v7856_v39 }
 0x10f   :  { %6813 = vmatprep.mubr.f32.mxu1 %v1062_v5  ;;  %5841 = vmatpush3.msra.mxu0 %v1291_v6  ;;  %v1350_v5 = vld [vmem:[#allocation8 + $0x368] sm:$0xff] }
 0x110   :  { %6839 = vmatpush3.msra.mxu1 %v7856_v39  ;;  %5842 = vmatprep.subr.mxu0 %v8011_v8 }
 0x111   :  { %6814 = vmatmul.mubr.f32.gmra.mxu1 %v1065_v7  ;;  %6840 = vmatprep.subr.mxu1 %v8014_v9  ;;  %v1349_v7 = vld [vmem:[#allocation8 + $0x360] sm:$0xff] }
 0x112   :  { %1165 = vmatprep.mubr.f32.mxu0 %v1064_v10  ;;  %5843 = vmatpush3.msra.mxu0 %v1290_v11  ;;  %v8080_v10 = vld [vmem:[#allocation4 + $0x1e0] sm:$0xff]  ;;  %v1351_v11 = vld [vmem:[#allocation8 + $0x370] sm:$0xff] }
 0x113   :  { %6841 = vmatpush3.msra.mxu1 %v8014_v9  ;;  %1166 = vmatmul.mubr.f32.gmra.mxu0 %v1063_v12  ;;  %v1354_v12 = vld [vmem:[#allocation8 + $0x388] sm:$0xff] }
 0x114   :  { %5844 = vmatprep.subr.mxu0 %v8018_v13  ;;  %6842 = vmatprep.subr.mxu1 %v8021_v15 }
 0x115   :  { %5845 = vmatpush3.msra.mxu0 %v1289_v17  ;;  %6843 = vmatpush3.msra.mxu1 %v8021_v15 }
 0x116   :  { %5846 = vmatprep.subr.mxu0 %v8024_v20  ;;  %6844 = vmatprep.subr.mxu1 %v8027_v22 }
 0x117   :  { %5847 = vmatpush3.msra.mxu0 %v1288_v28  ;;  %1425 = vmatprep.mubr.f32.mxu0 %v1338_v30  ;;  %v1353_v28 = vld [vmem:[#allocation8 + $0x380] sm:$0xff] }
 0x118   :  { %6845 = vmatpush3.msra.mxu1 %v8027_v22  ;;  %1426 = vmatmul.mubr.f32.vlgmr.msra.gmra.mxu0 %v1337_v33 }
 0x119   :  { %6846 = vmatprep.subr.mxu1 %v8032_v35  ;;  %5896 = vmatprep.subr.mxu0 %v7839_v43  ;;  %v8049_v43 = vld [vmem:[#allocation4 + $0x208] sm:$0xff] }
 0x11a   :  { %6847 = vmatpush3.msra.mxu1 %v8032_v35  ;;  %6848 = vmatprep.mubr.f32.mxu1 %v1339_v54  ;;  %v1352_v54 = vld [vmem:[#allocation8 + $0x378] sm:$0xff] }
 0x11b   :  { %5897 = vmatpush3.msra.mxu0 %v7983_v46  ;;  %6849 = vmatmul.mubr.f32.vlgmr.msra.gmra.mxu1 %v1342_v56 }
 0x11c   :  { %5898 = vmatprep.subr.mxu0 %v7844_v51  ;;  %6860 = vmatprep.subr.mxu1 %v8039_v62  ;;  %v1343_v51 = vld [vmem:[#allocation8 + $0x330] sm:$0xff] }
 0x11d   :  { %1430 = vmatprep.mubr.f32.mxu0 %v1341_v37  ;;  %5899 = vmatpush3.msra.mxu0 %v7991_v52 }
 0x11e   :  { %6861 = vmatpush3.msra.mxu1 %v8039_v62  ;;  %1431 = vmatmul.mubr.f32.gmra.mxu0 %v1340_v48 }
 0x11f   :  { %5900 = vmatprep.subr.mxu0 %v7849_v38  ;;  %6862 = vmatprep.subr.mxu1 %v8044_v50  ;;  %v1348_v38 = vld [vmem:[#allocation8 + $0x358] sm:$0xff] }
 0x120   :  { %5901 = vmatpush3.msra.mxu0 %v7996_v42  ;;  %6863 = vmatpush3.msra.mxu1 %v8044_v50 }
 0x121   :  { %5902 = vmatprep.subr.mxu0 %v7856_v39  ;;  %6864 = vmatprep.subr.mxu1 %v8049_v43  ;;  %v1347_v39 = vld [vmem:[#allocation8 + $0x350] sm:$0xff] }
 0x122   :  { %1435 = vmatprep.mubr.f32.mxu0 %v1344_v47  ;;  %5903 = vmatpush3.msra.mxu0 %v8000_v0 }
 0x123   :  { %6865 = vmatpush3.msra.mxu1 %v8049_v43  ;;  %1436 = vmatmul.mubr.f32.gmra.mxu0 %v1343_v51 }
 0x124   :  { %5904 = vmatprep.subr.mxu0 %v8014_v9  ;;  %6866 = vmatprep.subr.mxu1 %v8056_v36 }
 0x125   :  { %6851 = vmatprep.mubr.f32.mxu1 %v1345_v41  ;;  %5905 = vmatpush3.msra.mxu0 %v8006_v4 }
 0x126   :  { %6867 = vmatpush3.msra.mxu1 %v8056_v36  ;;  %5906 = vmatprep.subr.mxu0 %v8021_v15 }
 0x127   :  { %6852 = vmatmul.mubr.f32.gmra.mxu1 %v1348_v38  ;;  %6868 = vmatprep.subr.mxu1 %v8062_v44 }
 0x128   :  { %1440 = vmatprep.mubr.f32.mxu0 %v1347_v39  ;;  %5907 = vmatpush3.msra.mxu0 %v8011_v8  ;;  %v5528_v2 = vpop.f32.mrf.mxu0 }
 0x129   :  { %6869 = vmatpush3.msra.mxu1 %v8062_v44  ;;  %1441 = vmatmul.mubr.f32.gmra.mxu0 %v1346_v49  ;;  %v1357_v49 = vld [vmem:[#allocation8 + $0x3a0] sm:$0xff] }
 0x12a   :  { %5908 = vmatprep.subr.mxu0 %v8027_v22  ;;  %6870 = vmatprep.subr.mxu1 %v8068_v1  ;;  %v5529_v6 = vpop.f32.mrf.mxu0 }
 0x12b   :  { %5909 = vmatpush3.msra.mxu0 %v8018_v13  ;;  %6871 = vmatpush3.msra.mxu1 %v8068_v1  ;;  %v6674_v30 = vpop.f32.mrf.mxu1  ;;  %v5530_v51 = vadd.f32 %v5529_v6, %v5528_v2 }
 0x12c   :  { %5910 = vmatprep.subr.mxu0 %v8032_v35  ;;  %6872 = vmatprep.subr.mxu1 %v8073_v3 }
 0x12d   :  { %1445 = vmatprep.mubr.f32.mxu0 %v1350_v5  ;;  %5911 = vmatpush3.msra.mxu0 %v8024_v20  ;;  %v351_v47 = vpop.f32.mrf.mxu1 }
 0x12e   :  { %6873 = vmatpush3.msra.mxu1 %v8073_v3  ;;  %1446 = vmatmul.mubr.f32.gmra.mxu0 %v1349_v7  ;;  %v5531_v17 = vpop.f32.mrf.mxu0  ;;  %v8103_v2 = vadd.f32 %v5530_v51, %v351_v47  ;;  %v8131_v47 = vld [vmem:[#allocation4 + $0x258] sm:$0xff]  ;;  %v1636_v51 = vld [vmem:[#allocation8 + $0x3e0] sm:$0xff] }
 0x12f   :  { %5912 = vmatprep.subr.mxu0 %v7907_v14  ;;  %6874 = vmatprep.subr.mxu1 %v8080_v10 }
 0x130   :  { %6854 = vmatprep.mubr.f32.mxu1 %v1351_v11  ;;  %5913 = vmatpush3.msra.mxu0 %v7910_v16  ;;  %v5532_v33 = vpop.f32.mrf.mxu0  ;;  %v1356_v16 = vld [vmem:[#allocation8 + $0x398] sm:$0xff]  ;;  %v1359_v11 = vld [vmem:[#allocation8 + $0x3b0] sm:$0xff] }
 0x131   :  { %6875 = vmatpush3.msra.mxu1 %v8080_v10  ;;  %5914 = vmatprep.subr.mxu0 %v7913_v18  ;;  %v5533_v56 = vadd.f32 %v5532_v33, %v5531_v17  ;;  %v1358_v17 = vld [vmem:[#allocation8 + $0x3a8] sm:$0xff] }
 0x132   :  { %6855 = vmatmul.mubr.f32.gmra.mxu1 %v1354_v12  ;;  %6876 = vmatprep.subr.mxu1 %v7917_v19  ;;  %v1633_v33 = vld [vmem:[#allocation8 + $0x3c8] sm:$0xff] }
 0x133   :  { %1450 = vmatprep.mubr.f32.mxu0 %v1353_v28  ;;  %5915 = vmatpush3.msra.mxu0 %v7920_v21  ;;  %v8092_v37 = vadd.f32 %v6674_v30, %v5533_v56  ;;  %v5534_v48 = vpop.f32.mrf.mxu0  ;;  %v1355_v21 = vld [vmem:[#allocation8 + $0x390] sm:$0xff] }
 0x134   :  { %6877 = vmatpush3.msra.mxu1 %v7917_v19  ;;  %1451 = vmatmul.mubr.f32.gmra.mxu0 %v1352_v54 }
 0x135   :  { %5916 = vmatprep.subr.mxu0 %v7923_v23  ;;  %6878 = vmatprep.subr.mxu1 %v7926_v24  ;;  %v5535_v41 = vpop.f32.mrf.mxu0 }
 0x136   :  { %5917 = vmatpush3.msra.mxu0 %v7928_v25  ;;  %6879 = vmatpush3.msra.mxu1 %v7926_v24  ;;  %v5536_v38 = vadd.f32 %v5535_v41, %v5534_v48  ;;  %v1360_v25 = vld [vmem:[#allocation8 + $0x3b8] sm:$0xff]  ;;  %v1634_v48 = vld [vmem:[#allocation8 + $0x3d0] sm:$0xff] }
 0x137   :  { %5918 = vmatprep.subr.mxu0 %v7932_v26  ;;  %v6677_v39 = vpop.f32.mrf.mxu1  ;;  %6880 = vmatprep.subr.mxu1 %v7935_v27 }
 0x138   :  { %1455 = vmatprep.mubr.f32.mxu0 %v1356_v16  ;;  %5919 = vmatpush3.msra.mxu0 %v7939_v29 }
 0x139   :  { %6881 = vmatpush3.msra.mxu1 %v7935_v27  ;;  %v361_v5 = vpop.f32.mrf.mxu1  ;;  %1456 = vmatmul.mubr.f32.gmra.mxu0 %v1355_v21  ;;  %v5537_v6 = vpop.f32.mrf.mxu0  ;;  %v1635_v21 = vld [vmem:[#allocation8 + $0x3d8] sm:$0xff] }
 0x13a   :  { %5920 = vmatprep.subr.mxu0 %v7943_v31  ;;  %v8105_v7 = vadd.f32 %v5536_v38, %v361_v5  ;;  %6882 = vmatprep.subr.mxu1 %v7946_v32 }
 0x13b   :  { %6857 = vmatprep.mubr.f32.mxu1 %v1357_v49  ;;  %5921 = vmatpush3.msra.mxu0 %v7950_v34  ;;  %v5538_v12 = vpop.f32.mrf.mxu0 }
 0x13c   :  { %6883 = vmatpush3.msra.mxu1 %v7946_v32  ;;  %v390_v29 = vmax.f32 %v8103_v2, %v8105_v7  ;;  %5922 = vmatprep.subr.mxu0 %v7953_v45  ;;  %v5539_v28 = vadd.f32 %v5538_v12, %v5537_v6 }
 0x13d   :  { %6858 = vmatmul.mubr.f32.gmra.mxu1 %v1360_v25  ;;  %6884 = vmatprep.subr.mxu1 %v7956_v53 }
 0x13e   :  { %1460 = vmatprep.mubr.f32.mxu0 %v1359_v11  ;;  %5923 = vmatpush3.msra.mxu0 %v7960_v55  ;;  %v8116_v30 = vadd.f32 %v6677_v39, %v5539_v28  ;;  %v5540_v34 = vpop.f32.mrf.mxu0  ;;  %v1632_v55 = vld [vmem:[#allocation8 + $0x3c0] sm:$0xff]  ;;  %v8136_v39 = vld [vmem:[#allocation4 + $0x250] sm:$0xff]  ;;  %v1643_v28 = vld [vmem:[#allocation8 + $0x418] sm:$0xff] }
 0x13f   :  { %6885 = vmatpush3.msra.mxu1 %v7956_v53  ;;  %1461 = vmatmul.mubr.f32.gmra.mxu0 %v1358_v17  ;;  %v1640_v17 = vld [vmem:[#allocation8 + $0x400] sm:$0xff] }
 0x140   :  { %5924 = vmatprep.subr.mxu0 %v7963_v57  ;;  %6886 = vmatprep.subr.mxu1 %v7966_v58  ;;  %v391_v54 = vmax.f32 %v8092_v37, %v8116_v30  ;;  %v5541_v56 = vpop.f32.mrf.mxu0 }
 0x141   :  { %5925 = vmatpush3.msra.mxu0 %v7968_v59  ;;  %6887 = vmatpush3.msra.mxu1 %v7966_v58  ;;  %v1637_v59 = vld [vmem:[#allocation8 + $0x3e8] sm:$0xff]  ;;  %v5542_v25 = vadd.f32 %v5541_v56, %v5540_v34  ;;  %v8156_v56 = vld [vmem:[#allocation4 + $0x238] sm:$0xff] }
 0x142   :  { %5926 = vmatprep.subr.mxu0 %v7972_v60  ;;  %6888 = vmatprep.subr.mxu1 %v7975_v61 }
 0x143   :  { %5927 = vmatpush3.msra.mxu0 %v7979_v63  ;;  %1720 = vmatprep.mubr.f32.mxu0 %v1633_v33  ;;  %v6680_v63 = vpop.f32.mrf.mxu1 }
 0x144   :  { %6889 = vmatpush3.msra.mxu1 %v7975_v61  ;;  %1721 = vmatmul.mubr.f32.vlgmr.msra.gmra.mxu0 %v1632_v55  ;;  %v5543_v16 = vpop.f32.mrf.mxu0  ;;  %v1642_v55 = vld [vmem:[#allocation8 + $0x410] sm:$0xff] }
 0x145   :  { %6890 = vmatprep.subr.mxu1 %v7986_v40  ;;  %5976 = vmatprep.subr.mxu0 %v7917_v19  ;;  %v371_v5 = vpop.f32.mrf.mxu1 }
 0x146   :  { %6891 = vmatpush3.msra.mxu1 %v7986_v40  ;;  %6892 = vmatprep.mubr.f32.mxu1 %v1634_v48  ;;  %v5544_v41 = vpop.f32.mrf.mxu0  ;;  %v372_v34 = vadd.f32 %v5542_v25, %v371_v5  ;;  %v8203_v5 = vld [vmem:[#allocation4 + $0x180] sm:$0xff] }
 0x147   :  { %5977 = vmatpush3.msra.mxu0 %v7907_v14  ;;  %6893 = vmatmul.mubr.f32.vlgmr.msra.gmra.mxu1 %v1637_v59  ;;  %v5545_v38 = vadd.f32 %v5544_v41, %v5543_v16  ;;  %v8143_v14 = vld [vmem:[#allocation4 + $0x248] sm:$0xff]  ;;  %v8162_v16 = vld [vmem:[#allocation4 + $0x230] sm:$0xff] }
 0x148   :  { %5978 = vmatprep.subr.mxu0 %v7926_v24  ;;  %6904 = vmatprep.subr.mxu1 %v8131_v47  ;;  %v1639_v24 = vld [vmem:[#allocation8 + $0x3f8] sm:$0xff]  ;;  %v1645_v41 = vld [vmem:[#allocation8 + $0x428] sm:$0xff] }
 0x149   :  { %1725 = vmatprep.mubr.f32.mxu0 %v1636_v51  ;;  %5979 = vmatpush3.msra.mxu0 %v7913_v18  ;;  %v8140_v19 = vadd.f32 %v6680_v63, %v5545_v38  ;;  %v5546_v49 = vpop.f32.mrf.mxu0  ;;  %v1638_v18 = vld [vmem:[#allocation8 + $0x3f0] sm:$0xff] }
 0x14a   :  { %6905 = vmatpush3.msra.mxu1 %v8131_v47  ;;  %1726 = vmatmul.mubr.f32.gmra.mxu0 %v1635_v21  ;;  %v1646_v21 = vld [vmem:[#allocation8 + $0x430] sm:$0xff] }
 0x14b   :  { %5980 = vmatprep.subr.mxu0 %v7935_v27  ;;  %6906 = vmatprep.subr.mxu1 %v8136_v39  ;;  %v5547_v6 = vpop.f32.mrf.mxu0  ;;  %v8150_v27 = vld [vmem:[#allocation4 + $0x240] sm:$0xff]  ;;  %v8192_v38 = vld [vmem:[#allocation4 + $0x190] sm:$0xff] }
 0x14c   :  { %5981 = vmatpush3.msra.mxu0 %v7923_v23  ;;  %6907 = vmatpush3.msra.mxu1 %v8136_v39  ;;  %v5548_v11 = vadd.f32 %v5547_v6, %v5546_v49  ;;  %v1648_v49 = vld [vmem:[#allocation8 + $0x440] sm:$0xff]  ;;  %v1651_v6 = vld [vmem:[#allocation8 + $0x458] sm:$0xff] }
 0x14d   :  { %5982 = vmatprep.subr.mxu0 %v7946_v32  ;;  %v6683_v12 = vpop.f32.mrf.mxu1  ;;  %6908 = vmatprep.subr.mxu1 %v8143_v14 }
 0x14e   :  { %1730 = vmatprep.mubr.f32.mxu0 %v1639_v24  ;;  %5983 = vmatpush3.msra.mxu0 %v7932_v26 }
 0x14f   :  { %6909 = vmatpush3.msra.mxu1 %v8143_v14  ;;  %v381_v23 = vpop.f32.mrf.mxu1  ;;  %1731 = vmatmul.mubr.f32.gmra.mxu0 %v1638_v18  ;;  %v5549_v32 = vpop.f32.mrf.mxu0 }
 0x150   :  { %5984 = vmatprep.subr.mxu0 %v7956_v53  ;;  %v382_v33 = vadd.f32 %v5548_v11, %v381_v23  ;;  %6910 = vmatprep.subr.mxu1 %v8150_v27  ;;  %v1641_v53 = vld [vmem:[#allocation8 + $0x408] sm:$0xff] }
 0x151   :  { %6895 = vmatprep.mubr.f32.mxu1 %v1640_v17  ;;  %5985 = vmatpush3.msra.mxu0 %v7943_v31  ;;  %v5550_v48 = vpop.f32.mrf.mxu0 }
 0x152   :  { %6911 = vmatpush3.msra.mxu1 %v8150_v27  ;;  %v392_v26 = vmax.f32 %v372_v34, %v382_v33  ;;  %5986 = vmatprep.subr.mxu0 %v7966_v58  ;;  %v5551_v59 = vadd.f32 %v5550_v48, %v5549_v32  ;;  %v8172_v58 = vld [vmem:[#allocation4 + $0x228] sm:$0xff] }
 0x153   :  { %6896 = vmatmul.mubr.f32.gmra.mxu1 %v1643_v28  ;;  %6912 = vmatprep.subr.mxu1 %v8156_v56  ;;  %v1652_v28 = vld [vmem:[#allocation8 + $0x460] sm:$0xff] }
 0x154   :  { %1735 = vmatprep.mubr.f32.mxu0 %v1642_v55  ;;  %v8167_v51 = vmax.f32 %v390_v29, %v392_v26  ;;  %5987 = vmatpush3.msra.mxu0 %v7953_v45  ;;  %v387_v31 = vadd.f32 %v6683_v12, %v5551_v59  ;;  %v5608_v63 = vpop.f32.mrf.mxu0  ;;  %v1644_v45 = vld [vmem:[#allocation8 + $0x420] sm:$0xff]  ;;  %v8179_v29 = vld [vmem:[#allocation4 + $0x198] sm:$0xff]  ;;  %v1654_v26 = vld [vmem:[#allocation8 + $0x470] sm:$0xff] }
 0x155   :  { %6913 = vmatpush3.msra.mxu1 %v8156_v56  ;;  %1736 = vmatmul.mubr.f32.gmra.mxu0 %v1641_v53  ;;  %v1653_v53 = vld [vmem:[#allocation8 + $0x468] sm:$0xff] }
 0x156   :  { %9799 = vst [vmem:[#allocation21_spill] sm:$0xff] %v8167_v51  ;;  %5988 = vmatprep.subr.mxu0 %v7975_v61  ;;  %6914 = vmatprep.subr.mxu1 %v8162_v16  ;;  %v393_v2 = vmax.f32 %v8140_v19, %v387_v31  ;;  %v5609_v7 = vpop.f32.mrf.mxu0  ;;  %v8182_v61 = vld [vmem:[#allocation4 + $0x220] sm:$0xff]  ;;  %v3415_v51 = vld [vmem:[#allocation8 + $0x8a8] sm:$0xff] }
 0x157   :  { %5989 = vmatpush3.msra.mxu0 %v7963_v57  ;;  %6915 = vmatpush3.msra.mxu1 %v8162_v16  ;;  %v6718_v37 = vpop.f32.mrf.mxu1  ;;  %v5610_v11 = vadd.f32 %v5609_v7, %v5608_v63  ;;  %v1928_v63 = vld [vmem:[#allocation8 + $0x488] sm:$0xff]  ;;  %v1929_v7 = vld [vmem:[#allocation8 + $0x490] sm:$0xff] }
 0x158   :  { %5990 = vmatprep.subr.mxu0 %v7986_v40  ;;  %6916 = vmatprep.subr.mxu1 %v8172_v58  ;;  %v8187_v57 = vmax.f32 %v391_v54, %v393_v2  ;;  %v1649_v40 = vld [vmem:[#allocation8 + $0x448] sm:$0xff] }
 0x159   :  { %1740 = vmatprep.mubr.f32.mxu0 %v1645_v41  ;;  %5991 = vmatpush3.msra.mxu0 %v7972_v60  ;;  %v1647_v60 = vld [vmem:[#allocation8 + $0x438] sm:$0xff]  ;;  %v8198_v54 = vld [vmem:[#allocation4 + $0x188] sm:$0xff]  ;;  %v647_v18 = vpop.f32.mrf.mxu1 }
 0x15a   :  { %9800 = vst [vmem:[#allocation22_spill] sm:$0xff] %v8187_v57  ;;  %6917 = vmatpush3.msra.mxu1 %v8172_v58  ;;  %1741 = vmatmul.mubr.f32.gmra.mxu0 %v1644_v45  ;;  %v5611_v19 = vpop.f32.mrf.mxu0  ;;  %v8216_v32 = vadd.f32 %v5610_v11, %v647_v18  ;;  %v1933_v11 = vld [vmem:[#allocation8 + $0x4b0] sm:$0xff] }
 0x15b   :  { %5992 = vmatprep.subr.mxu0 %v8179_v29  ;;  %6918 = vmatprep.subr.mxu1 %v8182_v61 }
 0x15c   :  { %6898 = vmatprep.mubr.f32.mxu1 %v1646_v21  ;;  %5993 = vmatpush3.msra.mxu0 %v7983_v46  ;;  %v5612_v30 = vpop.f32.mrf.mxu0  ;;  %v8244_v21 = vld [vmem:[#allocation4 + $0x298] sm:$0xff] }
 0x15d   :  { %6919 = vmatpush3.msra.mxu1 %v8182_v61  ;;  %5994 = vmatprep.subr.mxu0 %v8192_v38  ;;  %v5613_v24 = vadd.f32 %v5612_v30, %v5611_v19  ;;  %v8249_v30 = vld [vmem:[#allocation4 + $0x290] sm:$0xff] }
 0x15e   :  { %6899 = vmatmul.mubr.f32.gmra.mxu1 %v1649_v40  ;;  %6920 = vmatprep.subr.mxu1 %v8039_v62  ;;  %v1931_v40 = vld [vmem:[#allocation8 + $0x4a0] sm:$0xff] }
 0x15f   :  { %1745 = vmatprep.mubr.f32.mxu0 %v1648_v49  ;;  %5995 = vmatpush3.msra.mxu0 %v7991_v52  ;;  %v8205_v46 = vadd.f32 %v6718_v37, %v5613_v24  ;;  %v5614_v25 = vpop.f32.mrf.mxu0  ;;  %v1650_v52 = vld [vmem:[#allocation8 + $0x450] sm:$0xff]  ;;  %v1930_v49 = vld [vmem:[#allocation8 + $0x498] sm:$0xff]  ;;  %v8256_v24 = vld [vmem:[#allocation4 + $0x288] sm:$0xff] }
 0x160   :  { %6921 = vmatpush3.msra.mxu1 %v8039_v62  ;;  %1746 = vmatmul.mubr.f32.gmra.mxu0 %v1647_v60 }
 0x161   :  { %5996 = vmatprep.subr.mxu0 %v8198_v54  ;;  %6922 = vmatprep.subr.mxu1 %v8044_v50  ;;  %v5615_v12 = vpop.f32.mrf.mxu0 }
 0x162   :  { %5997 = vmatpush3.msra.mxu0 %v7996_v42  ;;  %6923 = vmatpush3.msra.mxu1 %v8044_v50  ;;  %v5616_v17 = vadd.f32 %v5615_v12, %v5614_v25  ;;  %v1655_v42 = vld [vmem:[#allocation8 + $0x478] sm:$0xff] }
 0x163   :  { %5998 = vmatprep.subr.mxu0 %v8203_v5  ;;  %v6721_v23 = vpop.f32.mrf.mxu1  ;;  %6924 = vmatprep.subr.mxu1 %v8049_v43 }
 0x164   :  { %1750 = vmatprep.mubr.f32.mxu0 %v1651_v6  ;;  %5999 = vmatpush3.msra.mxu0 %v8000_v0 }
 0x165   :  { %6925 = vmatpush3.msra.mxu1 %v8049_v43  ;;  %v657_v34 = vpop.f32.mrf.mxu1  ;;  %1751 = vmatmul.mubr.f32.gmra.mxu0 %v1650_v52  ;;  %v5617_v33 = vpop.f32.mrf.mxu0 }
 0x166   :  { %6000 = vmatprep.subr.mxu0 %v8014_v9  ;;  %v8218_v55 = vadd.f32 %v5616_v17, %v657_v34  ;;  %6926 = vmatprep.subr.mxu1 %v8056_v36  ;;  %v1935_v17 = vld [vmem:[#allocation8 + $0x4c0] sm:$0xff] }
 0x167   :  { %6901 = vmatprep.mubr.f32.mxu1 %v1652_v28  ;;  %6001 = vmatpush3.msra.mxu0 %v8006_v4  ;;  %v5618_v48 = vpop.f32.mrf.mxu0  ;;  %v1938_v28 = vld [vmem:[#allocation8 + $0x4d8] sm:$0xff] }
 0x168   :  { %6927 = vmatpush3.msra.mxu1 %v8056_v36  ;;  %v686_v0 = vmax.f32 %v8216_v32, %v8218_v55  ;;  %6002 = vmatprep.subr.mxu0 %v8021_v15  ;;  %v5619_v59 = vadd.f32 %v5618_v48, %v5617_v33  ;;  %v8269_v33 = vld [vmem:[#allocation4 + $0x278] sm:$0xff] }
 0x169   :  { %6902 = vmatmul.mubr.f32.gmra.mxu1 %v1655_v42  ;;  %6928 = vmatprep.subr.mxu1 %v8062_v44 }
 0x16a   :  { %1755 = vmatprep.mubr.f32.mxu0 %v1654_v26  ;;  %6003 = vmatpush3.msra.mxu0 %v8011_v8  ;;  %v8229_v31 = vadd.f32 %v6721_v23, %v5619_v59  ;;  %v5620_v4 = vpop.f32.mrf.mxu0  ;;  %v1927_v8 = vld [vmem:[#allocation8 + $0x480] sm:$0xff]  ;;  %v1937_v26 = vld [vmem:[#allocation8 + $0x4d0] sm:$0xff] }
 0x16b   :  { %6929 = vmatpush3.msra.mxu1 %v8062_v44  ;;  %1756 = vmatmul.mubr.f32.gmra.mxu0 %v1653_v53 }
 0x16c   :  { %6004 = vmatprep.subr.mxu0 %v8027_v22  ;;  %6930 = vmatprep.subr.mxu1 %v8068_v1  ;;  %v687_v41 = vmax.f32 %v8205_v46, %v8229_v31  ;;  %v5621_v2 = vpop.f32.mrf.mxu0  ;;  %v2179_v46 = vld [vmem:[#allocation4 + $0x150] sm:$0xff] }
 0x16d   :  { %6005 = vmatpush3.msra.mxu0 %v8018_v13  ;;  %6931 = vmatpush3.msra.mxu1 %v8068_v1  ;;  %v1932_v13 = vld [vmem:[#allocation8 + $0x4a8] sm:$0xff]  ;;  %v5622_v6 = vadd.f32 %v5621_v2, %v5620_v4  ;;  %v8275_v4 = vld [vmem:[#allocation4 + $0x270] sm:$0xff] }
 0x16e   :  { %6006 = vmatprep.subr.mxu0 %v8032_v35  ;;  %6932 = vmatprep.subr.mxu1 %v8073_v3 }
 0x16f   :  { %6007 = vmatpush3.msra.mxu0 %v8024_v20  ;;  %2015 = vmatprep.mubr.f32.mxu0 %v1928_v63  ;;  %v6724_v20 = vpop.f32.mrf.mxu1 }
 0x170   :  { %6933 = vmatpush3.msra.mxu1 %v8073_v3  ;;  %2016 = vmatmul.mubr.f32.vlgmr.msra.gmra.mxu0 %v1927_v8  ;;  %v5623_v45 = vpop.f32.mrf.mxu0  ;;  %v1940_v8 = vld [vmem:[#allocation8 + $0x4e8] sm:$0xff] }
 0x171   :  { %6934 = vmatprep.subr.mxu1 %v8080_v10  ;;  %6056 = vmatprep.subr.mxu0 %v8039_v62  ;;  %v667_v25 = vpop.f32.mrf.mxu1 }
 0x172   :  { %6935 = vmatpush3.msra.mxu1 %v8080_v10  ;;  %6936 = vmatprep.mubr.f32.mxu1 %v1929_v7  ;;  %v5624_v19 = vpop.f32.mrf.mxu0  ;;  %v668_v34 = vadd.f32 %v5622_v6, %v667_v25  ;;  %v1941_v7 = vld [vmem:[#allocation8 + $0x4f0] sm:$0xff]  ;;  %v1946_v25 = vld [vmem:[#allocation8 + $0x518] sm:$0xff] }
 0x173   :  { %6057 = vmatpush3.msra.mxu0 %v8179_v29  ;;  %6937 = vmatmul.mubr.f32.vlgmr.msra.gmra.mxu1 %v1932_v13  ;;  %v5625_v37 = vadd.f32 %v5624_v19, %v5623_v45  ;;  %v2180_v13 = vld [vmem:[#allocation4 + $0x158] sm:$0xff]  ;;  %v8305_v45 = vld [vmem:[#allocation4 + $0x1d0] sm:$0xff]  ;;  %v8310_v19 = vld [vmem:[#allocation4 + $0x1c8] sm:$0xff] }
 0x174   :  { %6058 = vmatprep.subr.mxu0 %v8044_v50  ;;  %6948 = vmatprep.subr.mxu1 %v8244_v21  ;;  %v1934_v50 = vld [vmem:[#allocation8 + $0x4b8] sm:$0xff] }
 0x175   :  { %2020 = vmatprep.mubr.f32.mxu0 %v1931_v40  ;;  %6059 = vmatpush3.msra.mxu0 %v8192_v38  ;;  %v8253_v62 = vadd.f32 %v6724_v20, %v5625_v37  ;;  %v5626_v60 = vpop.f32.mrf.mxu0  ;;  %v1943_v20 = vld [vmem:[#allocation8 + $0x500] sm:$0xff]  ;;  %v2178_v37 = vld [vmem:[#allocation4 + $0x148] sm:$0xff] }
 0x176   :  { %6949 = vmatpush3.msra.mxu1 %v8244_v21  ;;  %2021 = vmatmul.mubr.f32.gmra.mxu0 %v1930_v49 }
 0x177   :  { %6060 = vmatprep.subr.mxu0 %v8049_v43  ;;  %6950 = vmatprep.subr.mxu1 %v8249_v30  ;;  %v5627_v18 = vpop.f32.mrf.mxu0  ;;  %v8263_v43 = vld [vmem:[#allocation4 + $0x280] sm:$0xff] }
 0x178   :  { %6061 = vmatpush3.msra.mxu0 %v8198_v54  ;;  %6951 = vmatpush3.msra.mxu1 %v8249_v30  ;;  %v5628_v12 = vadd.f32 %v5627_v18, %v5626_v60  ;;  %v2177_v18 = vld [vmem:[#allocation4 + $0x140] sm:$0xff] }
 0x179   :  { %6062 = vmatprep.subr.mxu0 %v8056_v36  ;;  %v6727_v52 = vpop.f32.mrf.mxu1  ;;  %6952 = vmatprep.subr.mxu1 %v8256_v24 }
 0x17a   :  { %2025 = vmatprep.mubr.f32.mxu0 %v1934_v50  ;;  %6063 = vmatpush3.msra.mxu0 %v8203_v5 }
 0x17b   :  { %6953 = vmatpush3.msra.mxu1 %v8256_v24  ;;  %v677_v23 = vpop.f32.mrf.mxu1  ;;  %2026 = vmatmul.mubr.f32.gmra.mxu0 %v1933_v11  ;;  %v5629_v36 = vpop.f32.mrf.mxu0 }
 0x17c   :  { %6064 = vmatprep.subr.mxu0 %v8062_v44  ;;  %v678_v42 = vadd.f32 %v5628_v12, %v677_v23  ;;  %6954 = vmatprep.subr.mxu1 %v8263_v43  ;;  %v1936_v44 = vld [vmem:[#allocation8 + $0x4c8] sm:$0xff] }
 0x17d   :  { %6939 = vmatprep.mubr.f32.mxu1 %v1935_v17  ;;  %6065 = vmatpush3.msra.mxu0 %v8014_v9  ;;  %v5630_v53 = vpop.f32.mrf.mxu0  ;;  %v8322_v17 = vld [vmem:[#allocation4 + $0x1b8] sm:$0xff] }
 0x17e   :  { %6955 = vmatpush3.msra.mxu1 %v8263_v43  ;;  %v688_v48 = vmax.f32 %v668_v34, %v678_v42  ;;  %6066 = vmatprep.subr.mxu0 %v8068_v1  ;;  %v5631_v59 = vadd.f32 %v5630_v53, %v5629_v36  ;;  %v8285_v1 = vld [vmem:[#allocation4 + $0x268] sm:$0xff]  ;;  %v1947_v34 = vld [vmem:[#allocation8 + $0x520] sm:$0xff]  ;;  %v2176_v36 = vld [vmem:[#allocation4 + $0x138] sm:$0xff] }
 0x17f   :  { %6940 = vmatmul.mubr.f32.gmra.mxu1 %v1938_v28  ;;  %6956 = vmatprep.subr.mxu1 %v8269_v33 }
 0x180   :  { %2030 = vmatprep.mubr.f32.mxu0 %v1937_v26  ;;  %v8280_v63 = vmax.f32 %v686_v0, %v688_v48  ;;  %6067 = vmatpush3.msra.mxu0 %v8021_v15  ;;  %v683_v9 = vadd.f32 %v6727_v52, %v5631_v59  ;;  %v5688_v2 = vpop.f32.mrf.mxu0  ;;  %v1939_v15 = vld [vmem:[#allocation8 + $0x4e0] sm:$0xff]  ;;  %v8292_v0 = vld [vmem:[#allocation4 + $0x1d8] sm:$0xff]  ;;  %v1945_v52 = vld [vmem:[#allocation8 + $0x510] sm:$0xff] }
 0x181   :  { %6957 = vmatpush3.msra.mxu1 %v8269_v33  ;;  %2031 = vmatmul.mubr.f32.gmra.mxu0 %v1936_v44  ;;  %v1950_v26 = vld [vmem:[#allocation8 + $0x538] sm:$0xff]  ;;  %v8327_v48 = vld [vmem:[#allocation4 + $0x1b0] sm:$0xff] }
 0x182   :  { %9801 = vst [vmem:[#allocation23_spill] sm:$0xff] %v8280_v63  ;;  %6068 = vmatprep.subr.mxu0 %v8073_v3  ;;  %6958 = vmatprep.subr.mxu1 %v8275_v4  ;;  %v689_v32 = vmax.f32 %v8253_v62, %v683_v9  ;;  %v5689_v55 = vpop.f32.mrf.mxu0  ;;  %v8295_v3 = vld [vmem:[#allocation4 + $0x260] sm:$0xff]  ;;  %v1949_v9 = vld [vmem:[#allocation8 + $0x530] sm:$0xff]  ;;  %v8888_v63 = vld [vmem:[#allocation4 + $0x248] sm:$0xff] }
 0x183   :  { %6069 = vmatpush3.msra.mxu0 %v8027_v22  ;;  %6959 = vmatpush3.msra.mxu1 %v8275_v4  ;;  %v6762_v31 = vpop.f32.mrf.mxu1  ;;  %v8314_v62 = vld [vmem:[#allocation4 + $0x1c0] sm:$0xff]  ;;  %v5690_v11 = vadd.f32 %v5689_v55, %v5688_v2  ;;  %v2175_v2 = vld [vmem:[#allocation4 + $0x130] sm:$0xff]  ;;  %v1948_v55 = vld [vmem:[#allocation8 + $0x528] sm:$0xff] }
 0x184   :  { %6070 = vmatprep.subr.mxu0 %v8080_v10  ;;  %6960 = vmatprep.subr.mxu1 %v8285_v1  ;;  %v8300_v22 = vmax.f32 %v687_v41, %v689_v32  ;;  %v1944_v10 = vld [vmem:[#allocation8 + $0x508] sm:$0xff]  ;;  %v1942_v41 = vld [vmem:[#allocation8 + $0x4f8] sm:$0xff] }
 0x185   :  { %2035 = vmatprep.mubr.f32.mxu0 %v1940_v8  ;;  %6071 = vmatpush3.msra.mxu0 %v8032_v35  ;;  %v942_v6 = vpop.f32.mrf.mxu1 }
 0x186   :  { %9802 = vst [vmem:[#allocation24_spill] sm:$0xff] %v8300_v22  ;;  %6961 = vmatpush3.msra.mxu1 %v8285_v1  ;;  %2036 = vmatmul.mubr.f32.gmra.mxu0 %v1939_v15  ;;  %v5691_v40 = vpop.f32.mrf.mxu0  ;;  %v8329_v53 = vadd.f32 %v5690_v11, %v942_v6  ;;  %v8338_v15 = vld [vmem:[#allocation4 + $0x1a8] sm:$0xff]  ;;  %v8357_v6 = vld [vmem:[#allocation4 + $0x2d8] sm:$0xff] }
 0x187   :  { %6072 = vmatprep.subr.mxu0 %v8292_v0  ;;  %6962 = vmatprep.subr.mxu1 %v8295_v3 }
 0x188   :  { %6942 = vmatprep.mubr.f32.mxu1 %v1941_v7  ;;  %6073 = vmatpush3.msra.mxu0 %v2180_v13  ;;  %v5692_v35 = vpop.f32.mrf.mxu0  ;;  %v2174_v13 = vld [vmem:[#allocation4 + $0x128] sm:$0xff] }
 0x189   :  { %6963 = vmatpush3.msra.mxu1 %v8295_v3  ;;  %6074 = vmatprep.subr.mxu0 %v8305_v45  ;;  %v5693_v49 = vadd.f32 %v5692_v35, %v5691_v40 }
 0x18a   :  { %6943 = vmatmul.mubr.f32.gmra.mxu1 %v1944_v10  ;;  %6964 = vmatprep.subr.mxu1 %v8131_v47  ;;  %v8342_v10 = vld [vmem:[#allocation4 + $0x1a0] sm:$0xff] }
 0x18b   :  { %2040 = vmatprep.mubr.f32.mxu0 %v1943_v20  ;;  %6075 = vmatpush3.msra.mxu0 %v2179_v46  ;;  %v8316_v60 = vadd.f32 %v6762_v31, %v5693_v49  ;;  %v5694_v50 = vpop.f32.mrf.mxu0  ;;  %v2173_v46 = vld [vmem:[#allocation4 + $0x120] sm:$0xff]  ;;  %v2223_v31 = vld [vmem:[#allocation8 + $0x548] sm:$0xff] }
 0x18c   :  { %6965 = vmatpush3.msra.mxu1 %v8131_v47  ;;  %2041 = vmatmul.mubr.f32.gmra.mxu0 %v1942_v41  ;;  %v2222_v49 = vld [vmem:[#allocation8 + $0x540] sm:$0xff] }
 0x18d   :  { %6076 = vmatprep.subr.mxu0 %v8310_v19  ;;  %6966 = vmatprep.subr.mxu1 %v8136_v39  ;;  %v5695_v12 = vpop.f32.mrf.mxu0 }
 0x18e   :  { %6077 = vmatpush3.msra.mxu0 %v2178_v37  ;;  %6967 = vmatpush3.msra.mxu1 %v8136_v39  ;;  %v5696_v23 = vadd.f32 %v5695_v12, %v5694_v50  ;;  %v2224_v37 = vld [vmem:[#allocation8 + $0x550] sm:$0xff]  ;;  %v2227_v50 = vld [vmem:[#allocation8 + $0x568] sm:$0xff] }
 0x18f   :  { %6078 = vmatprep.subr.mxu0 %v8314_v62  ;;  %v6765_v28 = vpop.f32.mrf.mxu1  ;;  %6968 = vmatprep.subr.mxu1 %v8143_v14 }
 0x190   :  { %2045 = vmatprep.mubr.f32.mxu0 %v1946_v25  ;;  %6079 = vmatpush3.msra.mxu0 %v2177_v18  ;;  %v2226_v18 = vld [vmem:[#allocation8 + $0x560] sm:$0xff] }
 0x191   :  { %6969 = vmatpush3.msra.mxu1 %v8143_v14  ;;  %v952_v42 = vpop.f32.mrf.mxu1  ;;  %2046 = vmatmul.mubr.f32.gmra.mxu0 %v1945_v52  ;;  %v5697_v44 = vpop.f32.mrf.mxu0  ;;  %v2225_v52 = vld [vmem:[#allocation8 + $0x558] sm:$0xff] }
 0x192   :  { %6080 = vmatprep.subr.mxu0 %v8322_v17  ;;  %v8331_v59 = vadd.f32 %v5696_v23, %v952_v42  ;;  %6970 = vmatprep.subr.mxu1 %v8150_v27 }
 0x193   :  { %6945 = vmatprep.mubr.f32.mxu1 %v1947_v34  ;;  %6081 = vmatpush3.msra.mxu0 %v2176_v36  ;;  %v5698_v32 = vpop.f32.mrf.mxu0  ;;  %v8369_v36 = vld [vmem:[#allocation4 + $0x2c8] sm:$0xff] }
 0x194   :  { %6971 = vmatpush3.msra.mxu1 %v8150_v27  ;;  %v981_v8 = vmax.f32 %v8329_v53, %v8331_v59  ;;  %6082 = vmatprep.subr.mxu0 %v8327_v48  ;;  %v5699_v7 = vadd.f32 %v5698_v32, %v5697_v44 }
 0x195   :  { %6946 = vmatmul.mubr.f32.gmra.mxu1 %v1950_v26  ;;  %6972 = vmatprep.subr.mxu1 %v8156_v56 }
 0x196   :  { %2050 = vmatprep.mubr.f32.mxu0 %v1949_v9  ;;  %6083 = vmatpush3.msra.mxu0 %v2175_v2  ;;  %v8344_v40 = vadd.f32 %v6765_v28, %v5699_v7  ;;  %v5700_v20 = vpop.f32.mrf.mxu0  ;;  %v8362_v28 = vld [vmem:[#allocation4 + $0x2d0] sm:$0xff] }
 0x197   :  { %6973 = vmatpush3.msra.mxu1 %v8156_v56  ;;  %2051 = vmatmul.mubr.f32.gmra.mxu0 %v1948_v55  ;;  %v2228_v9 = vld [vmem:[#allocation8 + $0x570] sm:$0xff]  ;;  %v2230_v55 = vld [vmem:[#allocation8 + $0x580] sm:$0xff] }
 0x198   :  { %6084 = vmatprep.subr.mxu0 %v8338_v15  ;;  %6974 = vmatprep.subr.mxu1 %v8162_v16  ;;  %v982_v35 = vmax.f32 %v8316_v60, %v8344_v40  ;;  %v5701_v41 = vpop.f32.mrf.mxu0 }
 0x199   :  { %6085 = vmatpush3.msra.mxu0 %v2174_v13  ;;  %6975 = vmatpush3.msra.mxu1 %v8162_v16  ;;  %v5702_v26 = vadd.f32 %v5701_v41, %v5700_v20  ;;  %v2233_v13 = vld [vmem:[#allocation8 + $0x598] sm:$0xff]  ;;  %v2232_v41 = vld [vmem:[#allocation8 + $0x590] sm:$0xff] }
 0x19a   :  { %6086 = vmatprep.subr.mxu0 %v8342_v10  ;;  %6976 = vmatprep.subr.mxu1 %v8172_v58  ;;  %v6768_v11 = vpop.f32.mrf.mxu1 }
 0x19b   :  { %6087 = vmatpush3.msra.mxu0 %v2173_v46  ;;  %2310 = vmatprep.mubr.f32.mxu0 %v2223_v31  ;;  %v8382_v31 = vld [vmem:[#allocation4 + $0x2b8] sm:$0xff] }
 0x19c   :  { %6977 = vmatpush3.msra.mxu1 %v8172_v58  ;;  %2311 = vmatmul.mubr.f32.vlgmr.msra.gmra.mxu0 %v2222_v49  ;;  %v5703_v25 = vpop.f32.mrf.mxu0  ;;  %v962_v42 = vpop.f32.mrf.mxu1 }
 0x19d   :  { %6978 = vmatprep.subr.mxu1 %v8182_v61  ;;  %6136 = vmatprep.subr.mxu0 %v8131_v47  ;;  %v963_v20 = vadd.f32 %v5702_v26, %v962_v42  ;;  %v2238_v26 = vld [vmem:[#allocation8 + $0x5c0] sm:$0xff] }
 0x19e   :  { %6979 = vmatpush3.msra.mxu1 %v8182_v61  ;;  %6980 = vmatprep.mubr.f32.mxu1 %v2224_v37  ;;  %v5704_v12 = vpop.f32.mrf.mxu0 }
 0x19f   :  { %6137 = vmatpush3.msra.mxu0 %v8292_v0  ;;  %6981 = vmatmul.mubr.f32.vlgmr.msra.gmra.mxu1 %v2227_v50  ;;  %v5705_v23 = vadd.f32 %v5704_v12, %v5703_v25  ;;  %v8388_v25 = vld [vmem:[#allocation4 + $0x2b0] sm:$0xff] }
 0x1a0   :  { %6138 = vmatprep.subr.mxu0 %v8136_v39  ;;  %6992 = vmatprep.subr.mxu1 %v8357_v6  ;;  %v2229_v39 = vld [vmem:[#allocation8 + $0x578] sm:$0xff] }
 0x1a1   :  { %2315 = vmatprep.mubr.f32.mxu0 %v2226_v18  ;;  %6139 = vmatpush3.msra.mxu0 %v8305_v45  ;;  %v8366_v47 = vadd.f32 %v6768_v11, %v5705_v23  ;;  %v5706_v34 = vpop.f32.mrf.mxu0  ;;  %v8405_v23 = vld [vmem:[#allocation4 + $0x218] sm:$0xff] }
 0x1a2   :  { %6993 = vmatpush3.msra.mxu1 %v8357_v6  ;;  %2316 = vmatmul.mubr.f32.gmra.mxu0 %v2225_v52  ;;  %v2235_v52 = vld [vmem:[#allocation8 + $0x5a8] sm:$0xff] }
 0x1a3   :  { %6140 = vmatprep.subr.mxu0 %v8143_v14  ;;  %6994 = vmatprep.subr.mxu1 %v8362_v28  ;;  %v5707_v44 = vpop.f32.mrf.mxu0  ;;  %v8376_v14 = vld [vmem:[#allocation4 + $0x2c0] sm:$0xff] }
 0x1a4   :  { %6141 = vmatpush3.msra.mxu0 %v8310_v19  ;;  %6995 = vmatpush3.msra.mxu1 %v8362_v28  ;;  %v5708_v2 = vadd.f32 %v5707_v44, %v5706_v34  ;;  %v2236_v34 = vld [vmem:[#allocation8 + $0x5b0] sm:$0xff]  ;;  %v8424_v44 = vld [vmem:[#allocation4 + $0x208] sm:$0xff] }
 0x1a5   :  { %6142 = vmatprep.subr.mxu0 %v8150_v27  ;;  %v6771_v32 = vpop.f32.mrf.mxu1  ;;  %6996 = vmatprep.subr.mxu1 %v8369_v36 }
 0x1a6   :  { %2320 = vmatprep.mubr.f32.mxu0 %v2229_v39  ;;  %6143 = vmatpush3.msra.mxu0 %v8314_v62 }
 0x1a7   :  { %6997 = vmatpush3.msra.mxu1 %v8369_v36  ;;  %v972_v7 = vpop.f32.mrf.mxu1  ;;  %2321 = vmatmul.mubr.f32.gmra.mxu0 %v2228_v9  ;;  %v5709_v27 = vpop.f32.mrf.mxu0 }
 0x1a8   :  { %6144 = vmatprep.subr.mxu0 %v8156_v56  ;;  %v973_v46 = vadd.f32 %v5708_v2, %v972_v7  ;;  %6998 = vmatprep.subr.mxu1 %v8376_v14  ;;  %v2231_v56 = vld [vmem:[#allocation8 + $0x588] sm:$0xff]  ;;  %v8429_v2 = vld [vmem:[#allocation4 + $0x200] sm:$0xff] }
 0x1a9   :  { %6983 = vmatprep.mubr.f32.mxu1 %v2230_v55  ;;  %6145 = vmatpush3.msra.mxu0 %v8322_v17  ;;  %v5710_v37 = vpop.f32.mrf.mxu0  ;;  %v2241_v55 = vld [vmem:[#allocation8 + $0x5d8] sm:$0xff] }
 0x1aa   :  { %6999 = vmatpush3.msra.mxu1 %v8376_v14  ;;  %v983_v49 = vmax.f32 %v963_v20, %v973_v46  ;;  %6146 = vmatprep.subr.mxu0 %v8162_v16  ;;  %v5711_v50 = vadd.f32 %v5710_v37, %v5709_v27  ;;  %v8398_v16 = vld [vmem:[#allocation4 + $0x2a8] sm:$0xff]  ;;  %v8438_v27 = vld [vmem:[#allocation4 + $0x1f8] sm:$0xff] }
 0x1ab   :  { %6984 = vmatmul.mubr.f32.gmra.mxu1 %v2233_v13  ;;  %7000 = vmatprep.subr.mxu1 %v8382_v31 }
 0x1ac   :  { %2325 = vmatprep.mubr.f32.mxu0 %v2232_v41  ;;  %v8393_v18 = vmax.f32 %v981_v8, %v983_v49  ;;  %6147 = vmatpush3.msra.mxu0 %v8327_v48  ;;  %v978_v11 = vadd.f32 %v6771_v32, %v5711_v50  ;;  %v5768_v12 = vpop.f32.mrf.mxu0  ;;  %v2234_v8 = vld [vmem:[#allocation8 + $0x5a0] sm:$0xff]  ;;  %v8444_v50 = vld [vmem:[#allocation4 + $0x1f0] sm:$0xff] }
 0x1ad   :  { %7001 = vmatpush3.msra.mxu1 %v8382_v31  ;;  %2326 = vmatmul.mubr.f32.gmra.mxu0 %v2231_v56  ;;  %v2242_v49 = vld [vmem:[#allocation8 + $0x5e0] sm:$0xff]  ;;  %v2245_v56 = vld [vmem:[#allocation8 + $0x5f8] sm:$0xff] }
 0x1ae   :  { %9803 = vst [vmem:[#allocation25_spill] sm:$0xff] %v8393_v18  ;;  %6148 = vmatprep.subr.mxu0 %v8172_v58  ;;  %7002 = vmatprep.subr.mxu1 %v8388_v25  ;;  %v984_v53 = vmax.f32 %v8366_v47, %v978_v11  ;;  %v5769_v59 = vpop.f32.mrf.mxu0  ;;  %v8408_v58 = vld [vmem:[#allocation4 + $0x2a0] sm:$0xff]  ;;  %v8418_v47 = vld [vmem:[#allocation4 + $0x210] sm:$0xff]  ;;  %v3417_v18 = vld [vmem:[#allocation8 + $0x8b8] sm:$0xff] }
 0x1af   :  { %6149 = vmatpush3.msra.mxu0 %v8338_v15  ;;  %7003 = vmatpush3.msra.mxu1 %v8388_v25  ;;  %v6806_v60 = vpop.f32.mrf.mxu1  ;;  %v5770_v13 = vadd.f32 %v5769_v59, %v5768_v12 }
 0x1b0   :  { %6150 = vmatprep.subr.mxu0 %v8182_v61  ;;  %7004 = vmatprep.subr.mxu1 %v8398_v16  ;;  %v8413_v39 = vmax.f32 %v982_v35, %v984_v53  ;;  %v2239_v61 = vld [vmem:[#allocation8 + $0x5c8] sm:$0xff]  ;;  %v2237_v35 = vld [vmem:[#allocation8 + $0x5b8] sm:$0xff]  ;;  %v2244_v53 = vld [vmem:[#allocation8 + $0x5f0] sm:$0xff] }
 0x1b1   :  { %2330 = vmatprep.mubr.f32.mxu0 %v2235_v52  ;;  %6151 = vmatpush3.msra.mxu0 %v8342_v10  ;;  %v1237_v7 = vpop.f32.mrf.mxu1 }
 0x1b2   :  { %9804 = vst [vmem:[#allocation26_spill] sm:$0xff] %v8413_v39  ;;  %7005 = vmatpush3.msra.mxu1 %v8398_v16  ;;  %2331 = vmatmul.mubr.f32.gmra.mxu0 %v2234_v8  ;;  %v5771_v42 = vpop.f32.mrf.mxu0  ;;  %v8446_v11 = vadd.f32 %v5770_v13, %v1237_v7  ;;  %v2517_v13 = vld [vmem:[#allocation8 + $0x600] sm:$0xff]  ;;  %v3421_v39 = vld [vmem:[#allocation8 + $0x8d8] sm:$0xff] }
 0x1b3   :  { %6152 = vmatprep.subr.mxu0 %v8405_v23  ;;  %7006 = vmatprep.subr.mxu1 %v8408_v58 }
 0x1b4   :  { %6986 = vmatprep.mubr.f32.mxu1 %v2236_v34  ;;  %6153 = vmatpush3.msra.mxu0 %v8179_v29  ;;  %v5772_v40 = vpop.f32.mrf.mxu0  ;;  %v2243_v34 = vld [vmem:[#allocation8 + $0x5e8] sm:$0xff] }
 0x1b5   :  { %7007 = vmatpush3.msra.mxu1 %v8408_v58  ;;  %6154 = vmatprep.subr.mxu0 %v8418_v47  ;;  %v5773_v9 = vadd.f32 %v5772_v40, %v5771_v42 }
 0x1b6   :  { %6987 = vmatmul.mubr.f32.gmra.mxu1 %v2239_v61  ;;  %7008 = vmatprep.subr.mxu1 %v8244_v21  ;;  %v8455_v61 = vld [vmem:[#allocation4 + $0x1e8] sm:$0xff] }
 0x1b7   :  { %2335 = vmatprep.mubr.f32.mxu0 %v2238_v26  ;;  %6155 = vmatpush3.msra.mxu0 %v8192_v38  ;;  %v8431_v29 = vadd.f32 %v6806_v60, %v5773_v9  ;;  %v5774_v32 = vpop.f32.mrf.mxu0  ;;  %v2240_v38 = vld [vmem:[#allocation8 + $0x5d0] sm:$0xff]  ;;  %v2469_v26 = vld [vmem:[#allocation4 + $0x168] sm:$0xff]  ;;  %v8459_v60 = vld [vmem:[#allocation4 + $0x1e0] sm:$0xff] }
 0x1b8   :  { %7009 = vmatpush3.msra.mxu1 %v8244_v21  ;;  %2336 = vmatmul.mubr.f32.gmra.mxu0 %v2237_v35  ;;  %v2468_v9 = vld [vmem:[#allocation4 + $0x160] sm:$0xff] }
 0x1b9   :  { %6156 = vmatprep.subr.mxu0 %v8424_v44  ;;  %7010 = vmatprep.subr.mxu1 %v8249_v30  ;;  %v5775_v20 = vpop.f32.mrf.mxu0 }
 0x1ba   :  { %6157 = vmatpush3.msra.mxu0 %v8198_v54  ;;  %7011 = vmatpush3.msra.mxu1 %v8249_v30  ;;  %v5776_v46 = vadd.f32 %v5775_v20, %v5774_v32  ;;  %v2471_v54 = vld [vmem:[#allocation4 + $0x178] sm:$0xff]  ;;  %v2518_v32 = vld [vmem:[#allocation8 + $0x608] sm:$0xff]  ;;  %v2519_v20 = vld [vmem:[#allocation8 + $0x610] sm:$0xff] }
 0x1bb   :  { %6158 = vmatprep.subr.mxu0 %v8429_v2  ;;  %v6809_v41 = vpop.f32.mrf.mxu1  ;;  %7012 = vmatprep.subr.mxu1 %v8256_v24 }
 0x1bc   :  { %2340 = vmatprep.mubr.f32.mxu0 %v2241_v55  ;;  %6159 = vmatpush3.msra.mxu0 %v8203_v5  ;;  %v2470_v5 = vld [vmem:[#allocation4 + $0x170] sm:$0xff] }
 0x1bd   :  { %7013 = vmatpush3.msra.mxu1 %v8256_v24  ;;  %v1247_v37 = vpop.f32.mrf.mxu1  ;;  %2341 = vmatmul.mubr.f32.gmra.mxu0 %v2240_v38  ;;  %v5777_v12 = vpop.f32.mrf.mxu0  ;;  %v2522_v38 = vld [vmem:[#allocation8 + $0x628] sm:$0xff] }
 0x1be   :  { %6160 = vmatprep.subr.mxu0 %v8438_v27  ;;  %v8448_v52 = vadd.f32 %v5776_v46, %v1247_v37  ;;  %7014 = vmatprep.subr.mxu1 %v8263_v43 }
 0x1bf   :  { %6989 = vmatprep.mubr.f32.mxu1 %v2242_v49  ;;  %6161 = vmatpush3.msra.mxu0 %v2471_v54  ;;  %v5778_v8 = vpop.f32.mrf.mxu0  ;;  %v2521_v49 = vld [vmem:[#allocation8 + $0x620] sm:$0xff] }
 0x1c0   :  { %7015 = vmatpush3.msra.mxu1 %v8263_v43  ;;  %v1276_v59 = vmax.f32 %v8446_v11, %v8448_v52  ;;  %6162 = vmatprep.subr.mxu0 %v8444_v50  ;;  %v5779_v42 = vadd.f32 %v5778_v8, %v5777_v12  ;;  %v8486_v8 = vld [vmem:[#allocation4 + $0x308] sm:$0xff] }
 0x1c1   :  { %6990 = vmatmul.mubr.f32.gmra.mxu1 %v2245_v56  ;;  %7016 = vmatprep.subr.mxu1 %v8269_v33  ;;  %v2520_v56 = vld [vmem:[#allocation8 + $0x618] sm:$0xff] }
 0x1c2   :  { %2345 = vmatprep.mubr.f32.mxu0 %v2244_v53  ;;  %6163 = vmatpush3.msra.mxu0 %v2470_v5  ;;  %v8461_v40 = vadd.f32 %v6809_v41, %v5779_v42  ;;  %v5780_v35 = vpop.f32.mrf.mxu0  ;;  %v8474_v41 = vld [vmem:[#allocation4 + $0x318] sm:$0xff]  ;;  %v8479_v53 = vld [vmem:[#allocation4 + $0x310] sm:$0xff] }
 0x1c3   :  { %7017 = vmatpush3.msra.mxu1 %v8269_v33  ;;  %2346 = vmatmul.mubr.f32.gmra.mxu0 %v2243_v34 }
 0x1c4   :  { %6164 = vmatprep.subr.mxu0 %v8455_v61  ;;  %7018 = vmatprep.subr.mxu1 %v8275_v4  ;;  %v1277_v55 = vmax.f32 %v8431_v29, %v8461_v40  ;;  %v5781_v7 = vpop.f32.mrf.mxu0 }
 0x1c5   :  { %6165 = vmatpush3.msra.mxu0 %v2469_v26  ;;  %7019 = vmatpush3.msra.mxu1 %v8275_v4  ;;  %v5782_v42 = vadd.f32 %v5781_v7, %v5780_v35  ;;  %v2528_v35 = vld [vmem:[#allocation8 + $0x658] sm:$0xff] }
 0x1c6   :  { %6166 = vmatprep.subr.mxu0 %v8459_v60  ;;  %7020 = vmatprep.subr.mxu1 %v8285_v1  ;;  %v6812_v54 = vpop.f32.mrf.mxu1 }
 0x1c7   :  { %6167 = vmatpush3.msra.mxu0 %v2468_v9  ;;  %2605 = vmatprep.mubr.f32.mxu0 %v2518_v32  ;;  %v2523_v9 = vld [vmem:[#allocation8 + $0x630] sm:$0xff] }
 0x1c8   :  { %7021 = vmatpush3.msra.mxu1 %v8285_v1  ;;  %2606 = vmatmul.mubr.f32.vlgmr.msra.gmra.mxu0 %v2517_v13  ;;  %v5783_v46 = vpop.f32.mrf.mxu0  ;;  %v1257_v34 = vpop.f32.mrf.mxu1 }
 0x1c9   :  { %7022 = vmatprep.subr.mxu1 %v8295_v3  ;;  %6216 = vmatprep.subr.mxu0 %v8244_v21  ;;  %v1258_v7 = vadd.f32 %v5782_v42, %v1257_v34 }
 0x1ca   :  { %7023 = vmatpush3.msra.mxu1 %v8295_v3  ;;  %7024 = vmatprep.mubr.f32.mxu1 %v2519_v20  ;;  %v5784_v37 = vpop.f32.mrf.mxu0  ;;  %v2525_v20 = vld [vmem:[#allocation8 + $0x640] sm:$0xff] }
 0x1cb   :  { %6217 = vmatpush3.msra.mxu0 %v8405_v23  ;;  %7025 = vmatmul.mubr.f32.vlgmr.msra.gmra.mxu1 %v2522_v38  ;;  %v5785_v12 = vadd.f32 %v5784_v37, %v5783_v46 }
 0x1cc   :  { %6218 = vmatprep.subr.mxu0 %v8249_v30  ;;  %7036 = vmatprep.subr.mxu1 %v8474_v41  ;;  %v2524_v30 = vld [vmem:[#allocation8 + $0x638] sm:$0xff] }
 0x1cd   :  { %2610 = vmatprep.mubr.f32.mxu0 %v2521_v49  ;;  %6219 = vmatpush3.msra.mxu0 %v8418_v47  ;;  %v8483_v21 = vadd.f32 %v6812_v54, %v5785_v12  ;;  %v5786_v5 = vpop.f32.mrf.mxu0  ;;  %v8499_v49 = vld [vmem:[#allocation4 + $0x2f8] sm:$0xff]  ;;  %v2527_v54 = vld [vmem:[#allocation8 + $0x650] sm:$0xff] }
 0x1ce   :  { %7037 = vmatpush3.msra.mxu1 %v8474_v41  ;;  %2611 = vmatmul.mubr.f32.gmra.mxu0 %v2520_v56 }
 0x1cf   :  { %6220 = vmatprep.subr.mxu0 %v8256_v24  ;;  %7038 = vmatprep.subr.mxu1 %v8479_v53  ;;  %v5787_v26 = vpop.f32.mrf.mxu0  ;;  %v8493_v24 = vld [vmem:[#allocation4 + $0x300] sm:$0xff] }
 0x1d0   :  { %6221 = vmatpush3.msra.mxu0 %v8424_v44  ;;  %7039 = vmatpush3.msra.mxu1 %v8479_v53  ;;  %v5788_v32 = vadd.f32 %v5787_v26, %v5786_v5  ;;  %v8505_v5 = vld [vmem:[#allocation4 + $0x2f0] sm:$0xff]  ;;  %v2530_v26 = vld [vmem:[#allocation8 + $0x668] sm:$0xff] }
 0x1d1   :  { %6222 = vmatprep.subr.mxu0 %v8263_v43  ;;  %v6815_v13 = vpop.f32.mrf.mxu1  ;;  %7040 = vmatprep.subr.mxu1 %v8486_v8 }
 0x1d2   :  { %2615 = vmatprep.mubr.f32.mxu0 %v2524_v30  ;;  %6223 = vmatpush3.msra.mxu0 %v8429_v2 }
 0x1d3   :  { %7041 = vmatpush3.msra.mxu1 %v8486_v8  ;;  %v1267_v38 = vpop.f32.mrf.mxu1  ;;  %2616 = vmatmul.mubr.f32.gmra.mxu0 %v2523_v9  ;;  %v5789_v43 = vpop.f32.mrf.mxu0  ;;  %v8522_v9 = vld [vmem:[#allocation4 + $0x258] sm:$0xff] }
 0x1d4   :  { %6224 = vmatprep.subr.mxu0 %v8269_v33  ;;  %v1268_v46 = vadd.f32 %v5788_v32, %v1267_v38  ;;  %7042 = vmatprep.subr.mxu1 %v8493_v24  ;;  %v2526_v33 = vld [vmem:[#allocation8 + $0x648] sm:$0xff]  ;;  %v2531_v32 = vld [vmem:[#allocation8 + $0x670] sm:$0xff]  ;;  %v2533_v38 = vld [vmem:[#allocation8 + $0x680] sm:$0xff] }
 0x1d5   :  { %7027 = vmatprep.mubr.f32.mxu1 %v2525_v20  ;;  %6225 = vmatpush3.msra.mxu0 %v8438_v27  ;;  %v5790_v56 = vpop.f32.mrf.mxu0 }
 0x1d6   :  { %7043 = vmatpush3.msra.mxu1 %v8493_v24  ;;  %v1278_v37 = vmax.f32 %v1258_v7, %v1268_v46  ;;  %6226 = vmatprep.subr.mxu0 %v8275_v4  ;;  %v5791_v12 = vadd.f32 %v5790_v56, %v5789_v43  ;;  %v8515_v4 = vld [vmem:[#allocation4 + $0x2e8] sm:$0xff]  ;;  %v8546_v43 = vld [vmem:[#allocation4 + $0x240] sm:$0xff] }
 0x1d7   :  { %7028 = vmatmul.mubr.f32.gmra.mxu1 %v2528_v35  ;;  %7044 = vmatprep.subr.mxu1 %v8499_v49  ;;  %v8541_v35 = vld [vmem:[#allocation4 + $0x248] sm:$0xff] }
 0x1d8   :  { %2620 = vmatprep.mubr.f32.mxu0 %v2527_v54  ;;  %v8510_v30 = vmax.f32 %v1276_v59, %v1278_v37  ;;  %6227 = vmatpush3.msra.mxu0 %v8444_v50  ;;  %v1273_v34 = vadd.f32 %v6815_v13, %v5791_v12  ;;  %v5848_v42 = vpop.f32.mrf.mxu0  ;;  %v2529_v59 = vld [vmem:[#allocation8 + $0x660] sm:$0xff]  ;;  %v2536_v54 = vld [vmem:[#allocation8 + $0x698] sm:$0xff] }
 0x1d9   :  { %7045 = vmatpush3.msra.mxu1 %v8499_v49  ;;  %2621 = vmatmul.mubr.f32.gmra.mxu0 %v2526_v33  ;;  %v8555_v12 = vld [vmem:[#allocation4 + $0x238] sm:$0xff] }
 0x1da   :  { %9805 = vst [vmem:[#allocation27_spill] sm:$0xff] %v8510_v30  ;;  %6228 = vmatprep.subr.mxu0 %v8285_v1  ;;  %7046 = vmatprep.subr.mxu1 %v8505_v5  ;;  %v1279_v11 = vmax.f32 %v8483_v21, %v1273_v34  ;;  %v5849_v52 = vpop.f32.mrf.mxu0  ;;  %v8525_v1 = vld [vmem:[#allocation4 + $0x2e0] sm:$0xff]  ;;  %v8535_v21 = vld [vmem:[#allocation4 + $0x250] sm:$0xff]  ;;  %v8900_v30 = vld [vmem:[#allocation4 + $0x238] sm:$0xff] }
 0x1db   :  { %6229 = vmatpush3.msra.mxu0 %v8455_v61  ;;  %7047 = vmatpush3.msra.mxu1 %v8505_v5  ;;  %v6850_v29 = vpop.f32.mrf.mxu1  ;;  %v5850_v56 = vadd.f32 %v5849_v52, %v5848_v42  ;;  %v2540_v42 = vld [vmem:[#allocation8 + $0x6b8] sm:$0xff]  ;;  %v8561_v52 = vld [vmem:[#allocation4 + $0x230] sm:$0xff] }
 0x1dc   :  { %6230 = vmatprep.subr.mxu0 %v8295_v3  ;;  %7048 = vmatprep.subr.mxu1 %v8515_v4  ;;  %v8530_v13 = vmax.f32 %v1277_v55, %v1279_v11  ;;  %v2534_v3 = vld [vmem:[#allocation8 + $0x688] sm:$0xff]  ;;  %v2532_v55 = vld [vmem:[#allocation8 + $0x678] sm:$0xff]  ;;  %v2537_v11 = vld [vmem:[#allocation8 + $0x6a0] sm:$0xff] }
 0x1dd   :  { %2625 = vmatprep.mubr.f32.mxu0 %v2530_v26  ;;  %6231 = vmatpush3.msra.mxu0 %v8459_v60  ;;  %v1532_v37 = vpop.f32.mrf.mxu1 }
 0x1de   :  { %9806 = vst [vmem:[#allocation28_spill] sm:$0xff] %v8530_v13  ;;  %7049 = vmatpush3.msra.mxu1 %v8515_v4  ;;  %2626 = vmatmul.mubr.f32.gmra.mxu0 %v2529_v59  ;;  %v5851_v20 = vpop.f32.mrf.mxu0  ;;  %v8563_v59 = vadd.f32 %v5850_v56, %v1532_v37 }
 0x1df   :  { %6232 = vmatprep.subr.mxu0 %v8522_v9  ;;  %7050 = vmatprep.subr.mxu1 %v8525_v1 }
 0x1e0   :  { %7030 = vmatprep.mubr.f32.mxu1 %v2531_v32  ;;  %6233 = vmatpush3.msra.mxu0 %v8292_v0  ;;  %v5852_v40 = vpop.f32.mrf.mxu0 }
 0x1e1   :  { %7051 = vmatpush3.msra.mxu1 %v8525_v1  ;;  %6234 = vmatprep.subr.mxu0 %v8535_v21  ;;  %v5853_v7 = vadd.f32 %v5852_v40, %v5851_v20  ;;  %v2539_v20 = vld [vmem:[#allocation8 + $0x6b0] sm:$0xff]  ;;  %v8573_v40 = vld [vmem:[#allocation4 + $0x228] sm:$0xff] }
 0x1e2   :  { %7031 = vmatmul.mubr.f32.gmra.mxu1 %v2534_v3  ;;  %7052 = vmatprep.subr.mxu1 %v8357_v6 }
 0x1e3   :  { %2630 = vmatprep.mubr.f32.mxu0 %v2533_v38  ;;  %6235 = vmatpush3.msra.mxu0 %v8305_v45  ;;  %v8548_v0 = vadd.f32 %v6850_v29, %v5853_v7  ;;  %v5854_v46 = vpop.f32.mrf.mxu0  ;;  %v2535_v45 = vld [vmem:[#allocation8 + $0x690] sm:$0xff]  ;;  %v2538_v29 = vld [vmem:[#allocation8 + $0x6a8] sm:$0xff] }
 0x1e4   :  { %7053 = vmatpush3.msra.mxu1 %v8357_v6  ;;  %2631 = vmatmul.mubr.f32.gmra.mxu0 %v2532_v55 }
 0x1e5   :  { %6236 = vmatprep.subr.mxu0 %v8541_v35  ;;  %7054 = vmatprep.subr.mxu1 %v8362_v28  ;;  %v5855_v33 = vpop.f32.mrf.mxu0 }
 0x1e6   :  { %6237 = vmatpush3.msra.mxu0 %v8310_v19  ;;  %7055 = vmatpush3.msra.mxu1 %v8362_v28  ;;  %v5856_v34 = vadd.f32 %v5855_v33, %v5854_v46  ;;  %v2814_v33 = vld [vmem:[#allocation8 + $0x6d0] sm:$0xff] }
 0x1e7   :  { %6238 = vmatprep.subr.mxu0 %v8546_v43  ;;  %v6853_v26 = vpop.f32.mrf.mxu1  ;;  %7056 = vmatprep.subr.mxu1 %v8369_v36 }
 0x1e8   :  { %2635 = vmatprep.mubr.f32.mxu0 %v2536_v54  ;;  %6239 = vmatpush3.msra.mxu0 %v8314_v62  ;;  %v2813_v54 = vld [vmem:[#allocation8 + $0x6c8] sm:$0xff] }
 0x1e9   :  { %7057 = vmatpush3.msra.mxu1 %v8369_v36  ;;  %v1542_v19 = vpop.f32.mrf.mxu1  ;;  %2636 = vmatmul.mubr.f32.gmra.mxu0 %v2535_v45  ;;  %v5857_v32 = vpop.f32.mrf.mxu0 }
 0x1ea   :  { %6240 = vmatprep.subr.mxu0 %v8555_v12  ;;  %v8565_v3 = vadd.f32 %v5856_v34, %v1542_v19  ;;  %7058 = vmatprep.subr.mxu1 %v8376_v14  ;;  %v8595_v34 = vld [vmem:[#allocation4 + $0x358] sm:$0xff] }
 0x1eb   :  { %7033 = vmatprep.mubr.f32.mxu1 %v2537_v11  ;;  %6241 = vmatpush3.msra.mxu0 %v8322_v17  ;;  %v5858_v38 = vpop.f32.mrf.mxu0  ;;  %v8578_v17 = vld [vmem:[#allocation4 + $0x220] sm:$0xff]  ;;  %v2815_v19 = vld [vmem:[#allocation8 + $0x6d8] sm:$0xff] }
 0x1ec   :  { %7059 = vmatpush3.msra.mxu1 %v8376_v14  ;;  %v1571_v62 = vmax.f32 %v8563_v59, %v8565_v3  ;;  %6242 = vmatprep.subr.mxu0 %v8561_v52  ;;  %v5859_v55 = vadd.f32 %v5858_v38, %v5857_v32  ;;  %v8600_v32 = vld [vmem:[#allocation4 + $0x350] sm:$0xff]  ;;  %v8607_v38 = vld [vmem:[#allocation4 + $0x348] sm:$0xff] }
 0x1ed   :  { %7034 = vmatmul.mubr.f32.gmra.mxu1 %v2540_v42  ;;  %7060 = vmatprep.subr.mxu1 %v8382_v31 }
 0x1ee   :  { %2640 = vmatprep.mubr.f32.mxu0 %v2539_v20  ;;  %6243 = vmatpush3.msra.mxu0 %v8327_v48  ;;  %v8580_v7 = vadd.f32 %v6853_v26, %v5859_v55  ;;  %v5860_v46 = vpop.f32.mrf.mxu0  ;;  %v2812_v48 = vld [vmem:[#allocation8 + $0x6c0] sm:$0xff] }
 0x1ef   :  { %7061 = vmatpush3.msra.mxu1 %v8382_v31  ;;  %2641 = vmatmul.mubr.f32.gmra.mxu0 %v2538_v29  ;;  %v2816_v26 = vld [vmem:[#allocation8 + $0x6e0] sm:$0xff] }
 0x1f0   :  { %6244 = vmatprep.subr.mxu0 %v8573_v40  ;;  %7062 = vmatprep.subr.mxu1 %v8388_v25  ;;  %v1572_v37 = vmax.f32 %v8548_v0, %v8580_v7  ;;  %v5861_v56 = vpop.f32.mrf.mxu0  ;;  %v2828_v0 = vld [vmem:[#allocation8 + $0x740] sm:$0xff] }
 0x1f1   :  { %6245 = vmatpush3.msra.mxu0 %v8338_v15  ;;  %7063 = vmatpush3.msra.mxu1 %v8388_v25  ;;  %v2817_v15 = vld [vmem:[#allocation8 + $0x6e8] sm:$0xff]  ;;  %v5862_v55 = vadd.f32 %v5861_v56, %v5860_v46  ;;  %v2823_v46 = vld [vmem:[#allocation8 + $0x718] sm:$0xff] }
 0x1f2   :  { %6246 = vmatprep.subr.mxu0 %v8578_v17  ;;  %7064 = vmatprep.subr.mxu1 %v8398_v16 }
 0x1f3   :  { %6247 = vmatpush3.msra.mxu0 %v8342_v10  ;;  %2900 = vmatprep.mubr.f32.mxu0 %v2813_v54  ;;  %v6856_v10 = vpop.f32.mrf.mxu1 }
 0x1f4   :  { %7065 = vmatpush3.msra.mxu1 %v8398_v16  ;;  %2901 = vmatmul.mubr.f32.vlgmr.msra.gmra.mxu0 %v2812_v48  ;;  %v5863_v45 = vpop.f32.mrf.mxu0  ;;  %v2818_v48 = vld [vmem:[#allocation8 + $0x6f0] sm:$0xff] }
 0x1f5   :  { %7066 = vmatprep.subr.mxu1 %v8408_v58  ;;  %6296 = vmatprep.subr.mxu0 %v8357_v6  ;;  %v1552_v29 = vpop.f32.mrf.mxu1 }
 0x1f6   :  { %7067 = vmatpush3.msra.mxu1 %v8408_v58  ;;  %7068 = vmatprep.mubr.f32.mxu1 %v2814_v33  ;;  %v5864_v11 = vpop.f32.mrf.mxu0  ;;  %v1553_v56 = vadd.f32 %v5862_v55, %v1552_v29  ;;  %v8626_v29 = vld [vmem:[#allocation4 + $0x330] sm:$0xff] }
 0x1f7   :  { %6297 = vmatpush3.msra.mxu0 %v8522_v9  ;;  %7069 = vmatmul.mubr.f32.vlgmr.msra.gmra.mxu1 %v2817_v15  ;;  %v5865_v42 = vadd.f32 %v5864_v11, %v5863_v45  ;;  %v2820_v45 = vld [vmem:[#allocation8 + $0x700] sm:$0xff]  ;;  %v8620_v11 = vld [vmem:[#allocation4 + $0x338] sm:$0xff] }
 0x1f8   :  { %6298 = vmatprep.subr.mxu0 %v8362_v28  ;;  %7080 = vmatprep.subr.mxu1 %v8595_v34  ;;  %v2819_v28 = vld [vmem:[#allocation8 + $0x6f8] sm:$0xff] }
 0x1f9   :  { %2905 = vmatprep.mubr.f32.mxu0 %v2816_v26  ;;  %6299 = vmatpush3.msra.mxu0 %v8535_v21  ;;  %v8604_v6 = vadd.f32 %v6856_v10, %v5865_v42  ;;  %v5866_v20 = vpop.f32.mrf.mxu0 }
 0x1fa   :  { %7081 = vmatpush3.msra.mxu1 %v8595_v34  ;;  %2906 = vmatmul.mubr.f32.gmra.mxu0 %v2815_v19  ;;  %v2822_v19 = vld [vmem:[#allocation8 + $0x710] sm:$0xff] }
 0x1fb   :  { %6300 = vmatprep.subr.mxu0 %v8369_v36  ;;  %7082 = vmatprep.subr.mxu1 %v8600_v32  ;;  %v5867_v54 = vpop.f32.mrf.mxu0  ;;  %v8614_v36 = vld [vmem:[#allocation4 + $0x340] sm:$0xff] }
 0x1fc   :  { %6301 = vmatpush3.msra.mxu0 %v8541_v35  ;;  %7083 = vmatpush3.msra.mxu1 %v8600_v32  ;;  %v5868_v33 = vadd.f32 %v5867_v54, %v5866_v20 }
 0x1fd   :  { %6302 = vmatprep.subr.mxu0 %v8376_v14  ;;  %v6859_v15 = vpop.f32.mrf.mxu1  ;;  %7084 = vmatprep.subr.mxu1 %v8607_v38 }
 0x1fe   :  { %2910 = vmatprep.mubr.f32.mxu0 %v2819_v28  ;;  %6303 = vmatpush3.msra.mxu0 %v8546_v43 }
 0x1ff   :  { %7085 = vmatpush3.msra.mxu1 %v8607_v38  ;;  %v1562_v26 = vpop.f32.mrf.mxu1  ;;  %2911 = vmatmul.mubr.f32.gmra.mxu0 %v2818_v48  ;;  %v5869_v14 = vpop.f32.mrf.mxu0 }
 0x200   :  { %6304 = vmatprep.subr.mxu0 %v8382_v31  ;;  %v1563_v10 = vadd.f32 %v5868_v33, %v1562_v26  ;;  %7086 = vmatprep.subr.mxu1 %v8614_v36  ;;  %v2821_v31 = vld [vmem:[#allocation8 + $0x708] sm:$0xff] }
 0x201   :  { %7071 = vmatprep.mubr.f32.mxu1 %v2820_v45  ;;  %6305 = vmatpush3.msra.mxu0 %v8555_v12  ;;  %v5870_v20 = vpop.f32.mrf.mxu0  ;;  %v2825_v33 = vld [vmem:[#allocation8 + $0x728] sm:$0xff] }
 0x202   :  { %7087 = vmatpush3.msra.mxu1 %v8614_v36  ;;  %v1573_v42 = vmax.f32 %v1553_v56, %v1563_v10  ;;  %6306 = vmatprep.subr.mxu0 %v8388_v25  ;;  %v5871_v28 = vadd.f32 %v5870_v20, %v5869_v14  ;;  %v8636_v25 = vld [vmem:[#allocation4 + $0x328] sm:$0xff]  ;;  %v8656_v14 = vld [vmem:[#allocation4 + $0x290] sm:$0xff] }
 0x203   :  { %7072 = vmatmul.mubr.f32.gmra.mxu1 %v2823_v46  ;;  %7088 = vmatprep.subr.mxu1 %v8620_v11  ;;  %v2826_v46 = vld [vmem:[#allocation8 + $0x730] sm:$0xff]  ;;  %v2829_v56 = vld [vmem:[#allocation8 + $0x748] sm:$0xff] }
 0x204   :  { %2915 = vmatprep.mubr.f32.mxu0 %v2822_v19  ;;  %v8631_v55 = vmax.f32 %v1571_v62, %v1573_v42  ;;  %6307 = vmatpush3.msra.mxu0 %v8561_v52  ;;  %v1568_v54 = vadd.f32 %v6859_v15, %v5871_v28  ;;  %v5928_v48 = vpop.f32.mrf.mxu0  ;;  %v2824_v62 = vld [vmem:[#allocation8 + $0x720] sm:$0xff]  ;;  %v8643_v15 = vld [vmem:[#allocation4 + $0x298] sm:$0xff]  ;;  %v8664_v42 = vld [vmem:[#allocation4 + $0x288] sm:$0xff] }
 0x205   :  { %7089 = vmatpush3.msra.mxu1 %v8620_v11  ;;  %2916 = vmatmul.mubr.f32.gmra.mxu0 %v2821_v31  ;;  %v8669_v31 = vld [vmem:[#allocation4 + $0x280] sm:$0xff] }
 0x206   :  { %9807 = vst [vmem:[#allocation29_spill] sm:$0xff] %v8631_v55  ;;  %6308 = vmatprep.subr.mxu0 %v8398_v16  ;;  %7090 = vmatprep.subr.mxu1 %v8626_v29  ;;  %v1574_v59 = vmax.f32 %v8604_v6, %v1568_v54  ;;  %v5929_v3 = vpop.f32.mrf.mxu0  ;;  %v8646_v16 = vld [vmem:[#allocation4 + $0x320] sm:$0xff]  ;;  %v2831_v54 = vld [vmem:[#allocation8 + $0x758] sm:$0xff]  ;;  %v3420_v55 = vld [vmem:[#allocation8 + $0x8d0] sm:$0xff] }
 0x207   :  { %6309 = vmatpush3.msra.mxu0 %v8573_v40  ;;  %7091 = vmatpush3.msra.mxu1 %v8626_v29  ;;  %v5930_v45 = vadd.f32 %v5929_v3, %v5928_v48  ;;  %v6894_v26 = vpop.f32.mrf.mxu1  ;;  %v2832_v3 = vld [vmem:[#allocation8 + $0x760] sm:$0xff] }
 0x208   :  { %6310 = vmatprep.subr.mxu0 %v8408_v58  ;;  %7092 = vmatprep.subr.mxu1 %v8636_v25  ;;  %v8651_v6 = vmax.f32 %v1572_v37, %v1574_v59  ;;  %v2827_v37 = vld [vmem:[#allocation8 + $0x738] sm:$0xff] }
 0x209   :  { %2920 = vmatprep.mubr.f32.mxu0 %v2825_v33  ;;  %6311 = vmatpush3.msra.mxu0 %v8578_v17  ;;  %v1827_v58 = vpop.f32.mrf.mxu1 }
 0x20a   :  { %9808 = vst [vmem:[#allocation30_spill] sm:$0xff] %v8651_v6  ;;  %7093 = vmatpush3.msra.mxu1 %v8636_v25  ;;  %2921 = vmatmul.mubr.f32.gmra.mxu0 %v2824_v62  ;;  %v5931_v10 = vpop.f32.mrf.mxu0  ;;  %v8658_v19 = vadd.f32 %v5930_v45, %v1827_v58  ;;  %v2833_v58 = vld [vmem:[#allocation8 + $0x768] sm:$0xff]  ;;  %v3424_v6 = vld [vmem:[#allocation8 + $0x8f0] sm:$0xff] }
 0x20b   :  { %6312 = vmatprep.subr.mxu0 %v8643_v15  ;;  %7094 = vmatprep.subr.mxu1 %v8646_v16 }
 0x20c   :  { %7074 = vmatprep.mubr.f32.mxu1 %v2826_v46  ;;  %6313 = vmatpush3.msra.mxu0 %v8405_v23  ;;  %v5932_v7 = vpop.f32.mrf.mxu0  ;;  %v2834_v46 = vld [vmem:[#allocation8 + $0x770] sm:$0xff] }
 0x20d   :  { %7095 = vmatpush3.msra.mxu1 %v8646_v16  ;;  %6314 = vmatprep.subr.mxu0 %v8656_v14  ;;  %v5933_v20 = vadd.f32 %v5932_v7, %v5931_v10  ;;  %v3108_v7 = vld [vmem:[#allocation8 + $0x788] sm:$0xff] }
 0x20e   :  { %7075 = vmatmul.mubr.f32.gmra.mxu1 %v2829_v56  ;;  %7096 = vmatprep.subr.mxu1 %v8474_v41  ;;  %v8694_v56 = vld [vmem:[#allocation4 + $0x268] sm:$0xff] }
 0x20f   :  { %2925 = vmatprep.mubr.f32.mxu0 %v2828_v0  ;;  %6315 = vmatpush3.msra.mxu0 %v8418_v47  ;;  %v8671_v23 = vadd.f32 %v6894_v26, %v5933_v20  ;;  %v5934_v28 = vpop.f32.mrf.mxu0  ;;  %v2830_v47 = vld [vmem:[#allocation8 + $0x750] sm:$0xff] }
 0x210   :  { %7097 = vmatpush3.msra.mxu1 %v8474_v41  ;;  %2926 = vmatmul.mubr.f32.gmra.mxu0 %v2827_v37  ;;  %v8678_v41 = vld [vmem:[#allocation4 + $0x278] sm:$0xff]  ;;  %v8746_v37 = vld [vmem:[#allocation4 + $0x2c8] sm:$0xff] }
 0x211   :  { %6316 = vmatprep.subr.mxu0 %v8664_v42  ;;  %7098 = vmatprep.subr.mxu1 %v8479_v53  ;;  %v5935_v48 = vpop.f32.mrf.mxu0 }
 0x212   :  { %6317 = vmatpush3.msra.mxu0 %v8424_v44  ;;  %7099 = vmatpush3.msra.mxu1 %v8479_v53  ;;  %v5936_v33 = vadd.f32 %v5935_v48, %v5934_v28  ;;  %v2835_v44 = vld [vmem:[#allocation8 + $0x778] sm:$0xff]  ;;  %v8684_v53 = vld [vmem:[#allocation4 + $0x270] sm:$0xff] }
 0x213   :  { %6318 = vmatprep.subr.mxu0 %v8669_v31  ;;  %v6897_v59 = vpop.f32.mrf.mxu1  ;;  %7100 = vmatprep.subr.mxu1 %v8486_v8  ;;  %v3109_v28 = vld [vmem:[#allocation8 + $0x790] sm:$0xff]  ;;  %v8716_v48 = vld [vmem:[#allocation4 + $0x378] sm:$0xff] }
 0x214   :  { %2930 = vmatprep.mubr.f32.mxu0 %v2831_v54  ;;  %6319 = vmatpush3.msra.mxu0 %v8429_v2 }
 0x215   :  { %7101 = vmatpush3.msra.mxu1 %v8486_v8  ;;  %v1837_v62 = vpop.f32.mrf.mxu1  ;;  %2931 = vmatmul.mubr.f32.gmra.mxu0 %v2830_v47  ;;  %v5937_v45 = vpop.f32.mrf.mxu0  ;;  %v3111_v47 = vld [vmem:[#allocation8 + $0x7a0] sm:$0xff] }
 0x216   :  { %6320 = vmatprep.subr.mxu0 %v8678_v41  ;;  %v8686_v26 = vadd.f32 %v5936_v33, %v1837_v62  ;;  %7102 = vmatprep.subr.mxu1 %v8493_v24  ;;  %v8726_v62 = vld [vmem:[#allocation4 + $0x368] sm:$0xff] }
 0x217   :  { %7077 = vmatprep.mubr.f32.mxu1 %v2832_v3  ;;  %6321 = vmatpush3.msra.mxu0 %v8438_v27  ;;  %v5938_v8 = vpop.f32.mrf.mxu0  ;;  %v8699_v27 = vld [vmem:[#allocation4 + $0x260] sm:$0xff]  ;;  %v8721_v3 = vld [vmem:[#allocation4 + $0x370] sm:$0xff] }
 0x218   :  { %7103 = vmatpush3.msra.mxu1 %v8493_v24  ;;  %v1866_v2 = vmax.f32 %v8658_v19, %v8686_v26  ;;  %6322 = vmatprep.subr.mxu0 %v8684_v53  ;;  %v5939_v10 = vadd.f32 %v5938_v8, %v5937_v45  ;;  %v3113_v8 = vld [vmem:[#allocation8 + $0x7b0] sm:$0xff] }
 0x219   :  { %7078 = vmatmul.mubr.f32.gmra.mxu1 %v2835_v44  ;;  %7104 = vmatprep.subr.mxu1 %v8499_v49  ;;  %v3114_v44 = vld [vmem:[#allocation8 + $0x7b8] sm:$0xff] }
 0x21a   :  { %2935 = vmatprep.mubr.f32.mxu0 %v2834_v46  ;;  %6323 = vmatpush3.msra.mxu0 %v8444_v50  ;;  %v8701_v24 = vadd.f32 %v6897_v59, %v5939_v10  ;;  %v5940_v0 = vpop.f32.mrf.mxu0  ;;  %v3107_v50 = vld [vmem:[#allocation8 + $0x780] sm:$0xff]  ;;  %v3110_v59 = vld [vmem:[#allocation8 + $0x798] sm:$0xff] }
 0x21b   :  { %7105 = vmatpush3.msra.mxu1 %v8499_v49  ;;  %2936 = vmatmul.mubr.f32.gmra.mxu0 %v2833_v58  ;;  %v8732_v58 = vld [vmem:[#allocation4 + $0x2d8] sm:$0xff] }
 0x21c   :  { %6324 = vmatprep.subr.mxu0 %v8694_v56  ;;  %7106 = vmatprep.subr.mxu1 %v8505_v5  ;;  %v5941_v20 = vpop.f32.mrf.mxu0 }
 0x21d   :  { %6325 = vmatpush3.msra.mxu0 %v8455_v61  ;;  %7107 = vmatpush3.msra.mxu1 %v8505_v5  ;;  %v3112_v61 = vld [vmem:[#allocation8 + $0x7a8] sm:$0xff] }
 0x21e   :  { %6326 = vmatprep.subr.mxu0 %v8699_v27  ;;  %7108 = vmatprep.subr.mxu1 %v8515_v4 }
 0x21f   :  { %6327 = vmatpush3.msra.mxu0 %v8459_v60  ;;  %3195 = vmatprep.mubr.f32.mxu0 %v3108_v7  ;;  %v6900_v60 = vpop.f32.mrf.mxu1 }
 0x220   :  { %7109 = vmatpush3.msra.mxu1 %v8515_v4  ;;  %3196 = vmatmul.mubr.f32.vlgmr.msra.gmra.mxu0 %v3107_v50  ;;  %v5943_v54 = vpop.f32.mrf.mxu0  ;;  %v3115_v50 = vld [vmem:[#allocation8 + $0x7c0] sm:$0xff] }
 0x221   :  { %7110 = vmatprep.subr.mxu1 %v8525_v1  ;;  %6376 = vmatprep.subr.mxu0 %v8499_v49  ;;  %v1847_v45 = vpop.f32.mrf.mxu1 }
 0x222   :  { %7111 = vmatpush3.msra.mxu1 %v8525_v1  ;;  %7112 = vmatprep.mubr.f32.mxu1 %v3109_v28  ;;  %v5944_v33 = vpop.f32.mrf.mxu0 }
 0x223   :  { %6377 = vmatpush3.msra.mxu0 %v8678_v41  ;;  %7113 = vmatmul.mubr.f32.vlgmr.msra.gmra.mxu1 %v3112_v61 }
 0x224   :  { %6378 = vmatprep.subr.mxu0 %v8505_v5  ;;  %7124 = vmatprep.subr.mxu1 %v8716_v48  ;;  %v5942_v5 = vadd.f32 %v5941_v20, %v5940_v0  ;;  %v8740_v20 = vld [vmem:[#allocation4 + $0x2d0] sm:$0xff] }
 0x225   :  { %3200 = vmatprep.mubr.f32.mxu0 %v3111_v47  ;;  %6379 = vmatpush3.msra.mxu0 %v8684_v53  ;;  %v5946_v49 = vpop.f32.mrf.mxu0 }
 0x226   :  { %7125 = vmatpush3.msra.mxu1 %v8716_v48  ;;  %3201 = vmatmul.mubr.f32.gmra.mxu0 %v3110_v59  ;;  %v1848_v28 = vadd.f32 %v5942_v5, %v1847_v45  ;;  %v3117_v59 = vld [vmem:[#allocation8 + $0x7d0] sm:$0xff] }
 0x227   :  { %6380 = vmatprep.subr.mxu0 %v8515_v4  ;;  %7126 = vmatprep.subr.mxu1 %v8721_v3  ;;  %v5947_v46 = vpop.f32.mrf.mxu0  ;;  %v8735_v4 = vld [vmem:[#allocation4 + $0x360] sm:$0xff] }
 0x228   :  { %6381 = vmatpush3.msra.mxu0 %v8694_v56  ;;  %7127 = vmatpush3.msra.mxu1 %v8721_v3  ;;  %v5948_v10 = vadd.f32 %v5947_v46, %v5946_v49  ;;  %v5945_v49 = vadd.f32 %v5944_v33, %v5943_v54 }
 0x229   :  { %6382 = vmatprep.subr.mxu0 %v8525_v1  ;;  %v6903_v7 = vpop.f32.mrf.mxu1  ;;  %7128 = vmatprep.subr.mxu1 %v8726_v62  ;;  %v3118_v1 = vld [vmem:[#allocation8 + $0x7d8] sm:$0xff] }
 0x22a   :  { %3205 = vmatprep.mubr.f32.mxu0 %v3114_v44  ;;  %6383 = vmatpush3.msra.mxu0 %v8699_v27  ;;  %v1853_v33 = vadd.f32 %v6900_v60, %v5945_v49  ;;  %v9810_v60 = vmax.f32 %v8671_v23, %v8701_v24  ;;  %v8786_v24 = vld [vmem:[#allocation4 + $0x2a8] sm:$0xff] }
 0x22b   :  { %7129 = vmatpush3.msra.mxu1 %v8726_v62  ;;  %v1857_v0 = vpop.f32.mrf.mxu1  ;;  %3206 = vmatmul.mubr.f32.gmra.mxu0 %v3113_v8  ;;  %v5949_v61 = vpop.f32.mrf.mxu0  ;;  %v3116_v8 = vld [vmem:[#allocation8 + $0x7c8] sm:$0xff] }
 0x22c   :  { %6384 = vmatprep.subr.mxu0 %v8732_v58  ;;  %v1858_v47 = vadd.f32 %v5948_v10, %v1857_v0  ;;  %7130 = vmatprep.subr.mxu1 %v8735_v4 }
 0x22d   :  { %7115 = vmatprep.mubr.f32.mxu1 %v3115_v50  ;;  %6385 = vmatpush3.msra.mxu0 %v8522_v9  ;;  %v5950_v46 = vpop.f32.mrf.mxu0  ;;  %v8756_v9 = vld [vmem:[#allocation4 + $0x2c0] sm:$0xff]  ;;  %v3120_v50 = vld [vmem:[#allocation8 + $0x7e8] sm:$0xff] }
 0x22e   :  { %7131 = vmatpush3.msra.mxu1 %v8735_v4  ;;  %v1868_v44 = vmax.f32 %v1848_v28, %v1858_v47  ;;  %6386 = vmatprep.subr.mxu0 %v8740_v20  ;;  %v5951_v45 = vadd.f32 %v5950_v46, %v5949_v61  ;;  %v3126_v28 = vld [vmem:[#allocation8 + $0x818] sm:$0xff] }
 0x22f   :  { %7116 = vmatmul.mubr.f32.gmra.mxu1 %v3118_v1  ;;  %7132 = vmatprep.subr.mxu1 %v8595_v34  ;;  %v3123_v1 = vld [vmem:[#allocation8 + $0x800] sm:$0xff]  ;;  %v8803_v46 = vld [vmem:[#allocation4 + $0x218] sm:$0xff] }
 0x230   :  { %3210 = vmatprep.mubr.f32.mxu0 %v3117_v59  ;;  %v8752_v54 = vmax.f32 %v1866_v2, %v1868_v44  ;;  %6387 = vmatpush3.msra.mxu0 %v8535_v21  ;;  %v1863_v5 = vadd.f32 %v6903_v7, %v5951_v45  ;;  %v6008_v10 = vpop.f32.mrf.mxu0  ;;  %v3119_v21 = vld [vmem:[#allocation8 + $0x7e0] sm:$0xff]  ;;  %v3121_v2 = vld [vmem:[#allocation8 + $0x7f0] sm:$0xff] }
 0x231   :  { %7133 = vmatpush3.msra.mxu1 %v8595_v34  ;;  %3211 = vmatmul.mubr.f32.gmra.mxu0 %v3116_v8  ;;  %v8763_v34 = vld [vmem:[#allocation4 + $0x2b8] sm:$0xff]  ;;  %v3127_v44 = vld [vmem:[#allocation8 + $0x820] sm:$0xff] }
 0x232   :  { %9809 = vst [vmem:[#allocation31_spill] sm:$0xff] %v8752_v54  ;;  %6388 = vmatprep.subr.mxu0 %v8746_v37  ;;  %7134 = vmatprep.subr.mxu1 %v8600_v32  ;;  %v1869_v19 = vmax.f32 %v1853_v33, %v1863_v5  ;;  %v6009_v26 = vpop.f32.mrf.mxu0  ;;  %v8813_v5 = vld [vmem:[#allocation4 + $0x318] sm:$0xff] }
 0x233   :  { %6389 = vmatpush3.msra.mxu0 %v8541_v35  ;;  %7135 = vmatpush3.msra.mxu1 %v8600_v32  ;;  %v3124_v35 = vld [vmem:[#allocation8 + $0x808] sm:$0xff]  ;;  %v8774_v32 = vld [vmem:[#allocation4 + $0x2b0] sm:$0xff]  ;;  %v8781_v23 = vpop.f32.mrf.mxu1  ;;  %v6010_v47 = vadd.f32 %v6009_v26, %v6008_v10 }
 0x234   :  { %6390 = vmatprep.subr.mxu0 %v8756_v9  ;;  %7136 = vmatprep.subr.mxu1 %v8607_v38  ;;  %v8769_v7 = vmax.f32 %v9810_v60, %v1869_v19  ;;  %9813 = vst [vmem:[#allocation34_spill] sm:$0xff] %v8781_v23  ;;  %v3128_v19 = vld [vmem:[#allocation8 + $0x828] sm:$0xff]  ;;  %v8825_v26 = vld [vmem:[#allocation4 + $0x310] sm:$0xff]  ;;  %v8836_v60 = vld [vmem:[#allocation4 + $0x200] sm:$0xff] }
 0x235   :  { %3215 = vmatprep.mubr.f32.mxu0 %v3120_v50  ;;  %6391 = vmatpush3.msra.mxu0 %v8546_v43  ;;  %v2122_v61 = vpop.f32.mrf.mxu1  ;;  %9818 = vst [vmem:[#allocation39_spill] sm:$0xff] %v8825_v26 }
 0x236   :  { %9811 = vst [vmem:[#allocation32_spill] sm:$0xff] %v8769_v7  ;;  %7137 = vmatpush3.msra.mxu1 %v8607_v38  ;;  %3216 = vmatmul.mubr.f32.gmra.mxu0 %v3119_v21  ;;  %v8776_v0 = vpop.f32.mrf.mxu0  ;;  %v3122_v38 = vld [vmem:[#allocation8 + $0x7f8] sm:$0xff]  ;;  %v8806_v8 = vadd.f32 %v6010_v47, %v2122_v61  ;;  %v8827_v21 = vld [vmem:[#allocation4 + $0x208] sm:$0xff]  ;;  %v3406_v47 = vld [vmem:[#allocation8 + $0x860] sm:$0xff] }
 0x237   :  { %6392 = vmatprep.subr.mxu0 %v8763_v34  ;;  %9812 = vst [vmem:[#allocation33_spill] sm:$0xff] %v8776_v0  ;;  %7138 = vmatprep.subr.mxu1 %v8614_v36  ;;  %v3407_v61 = vld [vmem:[#allocation8 + $0x868] sm:$0xff]  ;;  %v8984_v0 = vld [vmem:[#allocation4 + $0x320] sm:$0xff] }
 0x238   :  { %7118 = vmatprep.mubr.f32.mxu1 %v3121_v2  ;;  %6393 = vmatpush3.msra.mxu0 %v8555_v12  ;;  %v8783_v43 = vpop.f32.mrf.mxu0  ;;  %v8791_v12 = vld [vmem:[#allocation4 + $0x2a0] sm:$0xff]  ;;  %9816 = vst [vmem:[#allocation37_spill] sm:$0xff] %v8806_v8  ;;  %v8834_v2 = vld [vmem:[#allocation4 + $0x308] sm:$0xff] }
 0x239   :  { %7139 = vmatpush3.msra.mxu1 %v8614_v36  ;;  %9814 = vst [vmem:[#allocation35_spill] sm:$0xff] %v8783_v43  ;;  %6394 = vmatprep.subr.mxu0 %v8774_v32  ;;  %9820 = vst [vmem:[#allocation41_spill] sm:$0xff] %v8834_v2  ;;  %v3423_v7 = vld [vmem:[#allocation8 + $0x8e8] sm:$0xff] }
 0x23a   :  { %7119 = vmatmul.mubr.f32.gmra.mxu1 %v3124_v35  ;;  %7140 = vmatprep.subr.mxu1 %v8620_v11  ;;  %v3403_v35 = vld [vmem:[#allocation8 + $0x848] sm:$0xff] }
 0x23b   :  { %3220 = vmatprep.mubr.f32.mxu0 %v3123_v1  ;;  %6395 = vmatpush3.msra.mxu0 %v8561_v52  ;;  %v6014_v36 = vpop.f32.mrf.mxu0  ;;  %v3125_v52 = vld [vmem:[#allocation8 + $0x810] sm:$0xff] }
 0x23c   :  { %7141 = vmatpush3.msra.mxu1 %v8620_v11  ;;  %3221 = vmatmul.mubr.f32.gmra.mxu0 %v3122_v38  ;;  %v3402_v38 = vld [vmem:[#allocation8 + $0x840] sm:$0xff] }
 0x23d   :  { %6396 = vmatprep.subr.mxu0 %v8786_v24  ;;  %7142 = vmatprep.subr.mxu1 %v8626_v29  ;;  %v6015_v59 = vpop.f32.mrf.mxu0 }
 0x23e   :  { %6397 = vmatpush3.msra.mxu0 %v8573_v40  ;;  %7143 = vmatpush3.msra.mxu1 %v8626_v29  ;;  %v6016_v11 = vadd.f32 %v6015_v59, %v6014_v36  ;;  %v3130_v29 = vld [vmem:[#allocation8 + $0x838] sm:$0xff]  ;;  %v8844_v36 = vld [vmem:[#allocation4 + $0x300] sm:$0xff] }
 0x23f   :  { %6398 = vmatprep.subr.mxu0 %v8791_v12  ;;  %v8798_v49 = vpop.f32.mrf.mxu1  ;;  %7144 = vmatprep.subr.mxu1 %v8636_v25  ;;  %v8850_v59 = vld [vmem:[#allocation4 + $0x2f8] sm:$0xff] }
 0x240   :  { %9815 = vst [vmem:[#allocation36_spill] sm:$0xff] %v8798_v49  ;;  %3225 = vmatprep.mubr.f32.mxu0 %v3126_v28  ;;  %6399 = vmatpush3.msra.mxu0 %v8578_v17  ;;  %v3129_v17 = vld [vmem:[#allocation8 + $0x830] sm:$0xff] }
 0x241   :  { %7145 = vmatpush3.msra.mxu1 %v8636_v25  ;;  %v2132_v40 = vpop.f32.mrf.mxu1  ;;  %3226 = vmatmul.mubr.f32.gmra.mxu0 %v3125_v52  ;;  %v8808_v45 = vpop.f32.mrf.mxu0  ;;  %v8817_v25 = vld [vmem:[#allocation4 + $0x210] sm:$0xff]  ;;  %v3410_v52 = vld [vmem:[#allocation8 + $0x880] sm:$0xff] }
 0x242   :  { %6400 = vmatprep.subr.mxu0 %v8643_v15  ;;  %v8810_v33 = vadd.f32 %v6016_v11, %v2132_v40  ;;  %7146 = vmatprep.subr.mxu1 %v8646_v16  ;;  %v3404_v28 = vld [vmem:[#allocation8 + $0x850] sm:$0xff]  ;;  %v3409_v40 = vld [vmem:[#allocation8 + $0x878] sm:$0xff] }
 0x243   :  { %7121 = vmatprep.mubr.f32.mxu1 %v3127_v44  ;;  %6401 = vmatpush3.msra.mxu0 %v8803_v46  ;;  %v8821_v50 = vpop.f32.mrf.mxu0  ;;  %v3405_v44 = vld [vmem:[#allocation8 + $0x858] sm:$0xff] }
 0x244   :  { %9817 = vst [vmem:[#allocation38_spill] sm:$0xff] %v8810_v33  ;;  %7147 = vmatpush3.msra.mxu1 %v8646_v16  ;;  %6402 = vmatprep.subr.mxu0 %v8656_v14  ;;  %v8925_v33 = vld [vmem:[#allocation4 + $0x220] sm:$0xff] }
 0x245   :  { %7122 = vmatmul.mubr.f32.gmra.mxu1 %v3130_v29  ;;  %7148 = vmatprep.subr.mxu1 %v8813_v5 }
 0x246   :  { %3230 = vmatprep.mubr.f32.mxu0 %v3129_v17  ;;  %6403 = vmatpush3.msra.mxu0 %v8817_v25  ;;  %v8831_v16 = vpop.f32.mrf.mxu0  ;;  %v8858_v17 = vld [vmem:[#allocation4 + $0x2f0] sm:$0xff] }
 0x247   :  { %7149 = vmatpush3.msra.mxu1 %v8813_v5  ;;  %9819 = vst [vmem:[#allocation40_spill] sm:$0xff] %v8831_v16  ;;  %3231 = vmatmul.mubr.f32.gmra.mxu0 %v3128_v19  ;;  %v3413_v19 = vld [vmem:[#allocation8 + $0x898] sm:$0xff] }
 0x248   :  { %6404 = vmatprep.subr.mxu0 %v8664_v42  ;;  %7150 = vmatprep.subr.mxu1 %v8825_v26  ;;  %v8840_v1 = vpop.f32.mrf.mxu0 }
 0x249   :  { %6405 = vmatpush3.msra.mxu0 %v8827_v21  ;;  %9821 = vst [vmem:[#allocation42_spill] sm:$0xff] %v8840_v1  ;;  %7151 = vmatpush3.msra.mxu1 %v8825_v26  ;;  %v8944_v1 = vld [vmem:[#allocation4 + $0x340] sm:$0xff] }
 0x24a   :  { %6406 = vmatprep.subr.mxu0 %v8669_v31  ;;  %7152 = vmatprep.subr.mxu1 %v8834_v2 }
 0x24b   :  { %6407 = vmatpush3.msra.mxu0 %v8836_v60  ;;  %3490 = vmatprep.mubr.f32.mxu0 %v3403_v35  ;;  %v3416_v35 = vld [vmem:[#allocation8 + $0x8b0] sm:$0xff] }
 0x24c   :  { %7153 = vmatpush3.msra.mxu1 %v8834_v2  ;;  %3491 = vmatmul.mubr.f32.vlgmr.msra.gmra.mxu0 %v3402_v38  ;;  %v8852_v11 = vpop.f32.mrf.mxu0  ;;  %v3408_v38 = vld [vmem:[#allocation8 + $0x870] sm:$0xff] }
 0x24d   :  { %7154 = vmatprep.subr.mxu1 %v8844_v36  ;;  %7156 = vmatprep.mubr.f32.mxu1 %v3404_v28  ;;  %v8862_v28 = vld [vmem:[#allocation4 + $0x2e8] sm:$0xff] }
 0x24e   :  { %7155 = vmatpush3.msra.mxu1 %v8844_v36  ;;  %3495 = vmatprep.mubr.f32.mxu0 %v3406_v47  ;;  %v8855_v29 = vpop.f32.mrf.mxu0  ;;  %v3412_v47 = vld [vmem:[#allocation8 + $0x890] sm:$0xff] }
 0x24f   :  { %7157 = vmatmul.mubr.f32.vlgmr.msra.gmra.mxu1 %v3407_v61  ;;  %6456 = vmatprep.subr.mxu0 %v8850_v59 }
 0x250   :  { %7159 = vmatprep.mubr.f32.mxu1 %v3410_v52  ;;  %3496 = vmatmul.mubr.f32.gmra.mxu0 %v3405_v44  ;;  %v8868_v52 = vld [vmem:[#allocation4 + $0x2e0] sm:$0xff]  ;;  %v3419_v44 = vld [vmem:[#allocation8 + $0x8c8] sm:$0xff] }
 0x251   :  { %7168 = vmatprep.subr.mxu1 %v8716_v48  ;;  %3500 = vmatprep.mubr.f32.mxu0 %v3409_v40  ;;  %v8864_v61 = vpop.f32.mrf.mxu0  ;;  %v3411_v40 = vld [vmem:[#allocation8 + $0x888] sm:$0xff] }
 0x252   :  { %6457 = vmatpush3.msra.mxu0 %v8678_v41  ;;  %9822 = vst [vmem:[#allocation43_spill] sm:$0xff] %v8864_v61  ;;  %7169 = vmatpush3.msra.mxu1 %v8716_v48  ;;  %v3701_v61 = vld [vmem:[#allocation8 + $0x920] sm:$0xff] }
 0x253   :  { %6458 = vmatprep.subr.mxu0 %v8858_v17  ;;  %7160 = vmatmul.mubr.f32.gmra.mxu1 %v3413_v19  ;;  %v8870_v10 = vpop.f32.mrf.mxu0  ;;  %v8875_v19 = vld [vmem:[#allocation4 + $0x258] sm:$0xff] }
 0x254   :  { %6459 = vmatpush3.msra.mxu0 %v8684_v53  ;;  %7162 = vmatprep.mubr.f32.mxu1 %v3416_v35  ;;  %9823 = vst [vmem:[#allocation44_spill] sm:$0xff] %v8870_v10 }
 0x255   :  { %3501 = vmatmul.mubr.f32.gmra.mxu0 %v3408_v38  ;;  %6460 = vmatprep.subr.mxu0 %v8862_v28  ;;  %v8882_v38 = vld [vmem:[#allocation4 + $0x250] sm:$0xff] }
 0x256   :  { %3505 = vmatprep.mubr.f32.mxu0 %v3412_v47  ;;  %6461 = vmatpush3.msra.mxu0 %v8694_v56  ;;  %v3414_v47 = vld [vmem:[#allocation8 + $0x8a0] sm:$0xff] }
 0x257   :  { %6462 = vmatprep.subr.mxu0 %v8868_v52  ;;  %7163 = vmatmul.mubr.f32.gmra.mxu1 %v3419_v44  ;;  %v8879_v35 = vpop.f32.mrf.mxu0  ;;  %v3418_v44 = vld [vmem:[#allocation8 + $0x8c0] sm:$0xff] }
 0x258   :  { %6463 = vmatpush3.msra.mxu0 %v8699_v27  ;;  %7170 = vmatprep.subr.mxu1 %v8721_v3 }
 0x259   :  { %3506 = vmatmul.mubr.f32.gmra.mxu0 %v3411_v40  ;;  %6464 = vmatprep.subr.mxu0 %v8732_v58  ;;  %v8885_v57 = vpop.f32.mrf.mxu0  ;;  %v3422_v40 = vld [vmem:[#allocation8 + $0x8e0] sm:$0xff] }
 0x25a   :  { %3510 = vmatprep.mubr.f32.mxu0 %v3415_v51  ;;  %6465 = vmatpush3.msra.mxu0 %v8875_v19  ;;  %v8894_v51 = vld [vmem:[#allocation4 + $0x240] sm:$0xff] }
 0x25b   :  { %6466 = vmatprep.subr.mxu0 %v8740_v20  ;;  %7171 = vmatpush3.msra.mxu1 %v8721_v3 }
 0x25c   :  { %6467 = vmatpush3.msra.mxu0 %v8882_v38  ;;  %v8896_v22 = vpop.f32.mrf.mxu0  ;;  %7172 = vmatprep.subr.mxu1 %v8726_v62 }
 0x25d   :  { %3511 = vmatmul.mubr.f32.gmra.mxu0 %v3414_v47  ;;  %6468 = vmatprep.subr.mxu0 %v8746_v37  ;;  %v8907_v47 = vld [vmem:[#allocation4 + $0x230] sm:$0xff] }
 0x25e   :  { %3515 = vmatprep.mubr.f32.mxu0 %v3418_v44  ;;  %6469 = vmatpush3.msra.mxu0 %v8888_v63  ;;  %v8903_v13 = vpop.f32.mrf.mxu0  ;;  %v3425_v44 = vld [vmem:[#allocation8 + $0x8f8] sm:$0xff] }
 0x25f   :  { %6470 = vmatprep.subr.mxu0 %v8756_v9  ;;  %7165 = vmatprep.mubr.f32.mxu1 %v3422_v40  ;;  %v8918_v40 = vld [vmem:[#allocation4 + $0x358] sm:$0xff] }
 0x260   :  { %6471 = vmatpush3.msra.mxu0 %v8894_v51  ;;  %7173 = vmatpush3.msra.mxu1 %v8726_v62 }
 0x261   :  { %3516 = vmatmul.mubr.f32.gmra.mxu0 %v3417_v18  ;;  %6472 = vmatprep.subr.mxu0 %v8763_v34  ;;  %v8915_v18 = vld [vmem:[#allocation4 + $0x228] sm:$0xff] }
 0x262   :  { %3520 = vmatprep.mubr.f32.mxu0 %v3421_v39  ;;  %6473 = vmatpush3.msra.mxu0 %v8900_v30  ;;  %v8912_v54 = vpop.f32.mrf.mxu0 }
 0x263   :  { %6474 = vmatprep.subr.mxu0 %v8774_v32  ;;  %7166 = vmatmul.mubr.f32.gmra.mxu1 %v3425_v44  ;;  %v8927_v44 = vld [vmem:[#allocation4 + $0x350] sm:$0xff] }
 0x264   :  { %6475 = vmatpush3.msra.mxu0 %v8907_v47  ;;  %v8920_v39 = vpop.f32.mrf.mxu0  ;;  %7174 = vmatprep.subr.mxu1 %v8735_v4 }
 0x265   :  { %3521 = vmatmul.mubr.f32.gmra.mxu0 %v3420_v55  ;;  %6476 = vmatprep.subr.mxu0 %v8786_v24  ;;  %v8931_v55 = vpop.f32.mrf.mxu1 }
 0x266   :  { %3525 = vmatprep.mubr.f32.mxu0 %v3424_v6  ;;  %6477 = vmatpush3.msra.mxu0 %v8915_v18  ;;  %9824 = vst [vmem:[#allocation45_spill] sm:$0xff] %v8931_v55  ;;  %v8936_v6 = vld [vmem:[#allocation4 + $0x348] sm:$0xff]  ;;  %v8952_v55 = vld [vmem:[#allocation4 + $0x338] sm:$0xff] }
 0x267   :  { %7175 = vmatpush3.msra.mxu1 %v8735_v4  ;;  %6478 = vmatprep.subr.mxu0 %v8791_v12  ;;  %v8933_v8 = vpop.f32.mrf.mxu0 }
 0x268   :  { %7176 = vmatprep.subr.mxu1 %v8918_v40  ;;  %6479 = vmatpush3.msra.mxu0 %v8925_v33 }
 0x269   :  { %3526 = vmatmul.mubr.f32.gmra.mxu0 %v3423_v7  ;;  %7177 = vmatpush3.msra.mxu1 %v8918_v40  ;;  %v8940_v23 = vpop.f32.mrf.mxu0  ;;  %v8948_v7 = vpop.f32.mrf.mxu1 }
 0x26a   :  { %7178 = vmatprep.subr.mxu1 %v8927_v44  ;;  %6480 = vmatprep.subr.mxu0 %v8643_v15  ;;  %9825 = vst [vmem:[#allocation46_spill] sm:$0xff] %v8948_v7  ;;  %v3698_v15 = vld [vmem:[#allocation8 + $0x908] sm:$0xff]  ;;  %v8964_v7 = vld [vmem:[#allocation4 + $0x330] sm:$0xff] }
 0x26b   :  { %7179 = vmatpush3.msra.mxu1 %v8927_v44  ;;  %6481 = vmatpush3.msra.mxu0 %v8803_v46  ;;  %v8956_v16 = vpop.f32.mrf.mxu1 }
 0x26c   :  { %7180 = vmatprep.subr.mxu1 %v8936_v6  ;;  %6482 = vmatprep.subr.mxu0 %v8656_v14  ;;  %9826 = vst [vmem:[#allocation47_spill] sm:$0xff] %v8956_v16  ;;  %v3697_v14 = vld [vmem:[#allocation8 + $0x900] sm:$0xff]  ;;  %v8971_v16 = vld [vmem:[#allocation4 + $0x328] sm:$0xff] }
 0x26d   :  { %7181 = vmatpush3.msra.mxu1 %v8936_v6  ;;  %6483 = vmatpush3.msra.mxu0 %v8817_v25  ;;  %v8958_v49 = vpop.f32.mrf.mxu0 }
 0x26e   :  { %7182 = vmatprep.subr.mxu1 %v8944_v1  ;;  %6484 = vmatprep.subr.mxu0 %v8664_v42  ;;  %v8973_v42 = vpop.f32.mrf.mxu1 }
 0x26f   :  { %7183 = vmatpush3.msra.mxu1 %v8944_v1  ;;  %6485 = vmatpush3.msra.mxu0 %v8827_v21  ;;  %v8966_v10 = vpop.f32.mrf.mxu0  ;;  %9827 = vst [vmem:[#allocation48_spill] sm:$0xff] %v8973_v42 }
 0x270   :  { %7184 = vmatprep.subr.mxu1 %v8952_v55  ;;  %6486 = vmatprep.subr.mxu0 %v8669_v31  ;;  %v8980_v31 = vpop.f32.mrf.mxu1 }
 0x271   :  { %3785 = vmatprep.mubr.f32.mxu0 %v3698_v15  ;;  %6487 = vmatpush3.msra.mxu0 %v8836_v60  ;;  %v3700_v15 = vld [vmem:[#allocation8 + $0x918] sm:$0xff] }
 0x272   :  { %7185 = vmatpush3.msra.mxu1 %v8952_v55  ;;  %3786 = vmatmul.mubr.f32.vlgmr.msra.gmra.mxu0 %v3697_v14  ;;  %v8976_v43 = vpop.f32.mrf.mxu0  ;;  %v8992_v14 = vpop.f32.mrf.mxu1 }
 0x273   :  { %7186 = vmatprep.subr.mxu1 %v8964_v7  ;;  %6536 = vmatprep.subr.mxu0 %v8850_v59  ;;  %v3704_v59 = vld [vmem:[#allocation8 + $0x938] sm:$0xff] }
 0x274   :  { %7187 = vmatpush3.msra.mxu1 %v8964_v7  ;;  %6537 = vmatpush3.msra.mxu0 %v8678_v41  ;;  %v8986_v42 = vpop.f32.mrf.mxu0 }
 0x275   :  { %7188 = vmatprep.subr.mxu1 %v8971_v16  ;;  %6538 = vmatprep.subr.mxu0 %v8858_v17  ;;  %v3703_v17 = vld [vmem:[#allocation8 + $0x930] sm:$0xff] }
 0x276   :  { %3790 = vmatprep.mubr.f32.mxu0 %v3701_v61  ;;  %7189 = vmatpush3.msra.mxu1 %v8971_v16  ;;  %v9000_v61 = vpop.f32.mrf.mxu1 }
 0x277   :  { %6539 = vmatpush3.msra.mxu0 %v8684_v53  ;;  %7190 = vmatprep.subr.mxu1 %v8984_v0 }
 0x278   :  { %3791 = vmatmul.mubr.f32.gmra.mxu0 %v3700_v15  ;;  %6540 = vmatprep.subr.mxu0 %v8862_v28  ;;  %v8996_v41 = vpop.f32.mrf.mxu0  ;;  %v3707_v28 = vld [vmem:[#allocation8 + $0x950] sm:$0xff] }
 0x279   :  { %7191 = vmatpush3.msra.mxu1 %v8984_v0  ;;  %6541 = vmatpush3.msra.mxu0 %v8694_v56  ;;  %v9010_v56 = vpop.f32.mrf.mxu1 }
 0x27a   :  { %7192 = vmatprep.subr.mxu1 %v8813_v5  ;;  %6542 = vmatprep.subr.mxu0 %v8868_v52  ;;  %v9003_v53 = vpop.f32.mrf.mxu0  ;;  %v3706_v52 = vld [vmem:[#allocation8 + $0x948] sm:$0xff] }
 0x27b   :  { %3795 = vmatprep.mubr.f32.mxu0 %v3704_v59  ;;  %7193 = vmatpush3.msra.mxu1 %v8813_v5 }
 0x27c   :  { %6543 = vmatpush3.msra.mxu0 %v8699_v27  ;;  %7194 = vmatprep.subr.mxu1 %v8825_v26  ;;  %v9017_v27 = vpop.f32.mrf.mxu1 }
 0x27d   :  { %3796 = vmatmul.mubr.f32.gmra.mxu0 %v3703_v17  ;;  %6544 = vmatprep.subr.mxu0 %v8732_v58  ;;  %v9012_v15 = vpop.f32.mrf.mxu0  ;;  %v3699_v58 = vld [vmem:[#allocation8 + $0x910] sm:$0xff]  ;;  %v3702_v17 = vld [vmem:[#allocation8 + $0x928] sm:$0xff] }
 0x27e   :  { %7195 = vmatpush3.msra.mxu1 %v8825_v26  ;;  %6545 = vmatpush3.msra.mxu0 %v8875_v19  ;;  %v3710_v19 = vld [vmem:[#allocation8 + $0x968] sm:$0xff] }
 0x27f   :  { %7196 = vmatprep.subr.mxu1 %v8834_v2  ;;  %6546 = vmatprep.subr.mxu0 %v8740_v20  ;;  %v9019_v59 = vpop.f32.mrf.mxu0  ;;  %v9027_v20 = vpop.f32.mrf.mxu1 }
 0x280   :  { %3800 = vmatprep.mubr.f32.mxu0 %v3707_v28  ;;  %7197 = vmatpush3.msra.mxu1 %v8834_v2 }
 0x281   :  { %6547 = vmatpush3.msra.mxu0 %v8882_v38  ;;  %7198 = vmatprep.subr.mxu1 %v8844_v36  ;;  %v3709_v38 = vld [vmem:[#allocation8 + $0x960] sm:$0xff]  ;;  %v6991_v2 = vpop.f32.mrf.mxu1 }
 0x282   :  { %3801 = vmatmul.mubr.f32.gmra.mxu0 %v3706_v52  ;;  %6548 = vmatprep.subr.mxu0 %v8746_v37  ;;  %v3705_v52 = vld [vmem:[#allocation8 + $0x940] sm:$0xff] }
 0x283   :  { %7199 = vmatpush3.msra.mxu1 %v8844_v36  ;;  %7200 = vmatprep.mubr.f32.mxu1 %v3699_v58  ;;  %v6109_v28 = vpop.f32.mrf.mxu0  ;;  %v3713_v37 = vld [vmem:[#allocation8 + $0x980] sm:$0xff]  ;;  %v9037_v58 = vpop.f32.mrf.mxu1 }
 0x284   :  { %6549 = vmatpush3.msra.mxu0 %v8888_v63  ;;  %7201 = vmatmul.mubr.f32.vlgmr.msra.gmra.mxu1 %v3702_v17  ;;  %v3708_v63 = vld [vmem:[#allocation8 + $0x958] sm:$0xff] }
 0x285   :  { %6550 = vmatprep.subr.mxu0 %v8756_v9  ;;  %7212 = vmatprep.subr.mxu1 %v8716_v48  ;;  %v6110_v26 = vpop.f32.mrf.mxu0 }
 0x286   :  { %3805 = vmatprep.mubr.f32.mxu0 %v3710_v19  ;;  %6551 = vmatpush3.msra.mxu0 %v8894_v51  ;;  %v3712_v51 = vld [vmem:[#allocation8 + $0x978] sm:$0xff] }
 0x287   :  { %7213 = vmatpush3.msra.mxu1 %v8716_v48  ;;  %3806 = vmatmul.mubr.f32.gmra.mxu0 %v3709_v38 }
 0x288   :  { %6552 = vmatprep.subr.mxu0 %v8763_v34  ;;  %7214 = vmatprep.subr.mxu1 %v8721_v3  ;;  %v6168_v9 = vpop.f32.mrf.mxu0  ;;  %v3711_v34 = vld [vmem:[#allocation8 + $0x970] sm:$0xff] }
 0x289   :  { %7203 = vmatprep.mubr.f32.mxu1 %v3705_v52  ;;  %6553 = vmatpush3.msra.mxu0 %v8900_v30  ;;  %v6111_v30 = vadd.f32 %v6110_v26, %v6109_v28  ;;  %v6099_v52 = vadd.f32 %v8966_v10, %v8958_v49  ;;  %v3962_v26 = vld [vmem:[#allocation4 + $0x298] sm:$0xff]  ;;  %v3717_v10 = vld [vmem:[#allocation8 + $0x9a0] sm:$0xff] }
 0x28a   :  { %7215 = vmatpush3.msra.mxu1 %v8721_v3  ;;  %6554 = vmatprep.subr.mxu0 %v8774_v32  ;;  %v6169_v48 = vpop.f32.mrf.mxu0  ;;  %v3714_v3 = vld [vmem:[#allocation8 + $0x988] sm:$0xff]  ;;  %v3716_v32 = vld [vmem:[#allocation8 + $0x998] sm:$0xff] }
 0x28b   :  { %7204 = vmatmul.mubr.f32.gmra.mxu1 %v3708_v63  ;;  %7216 = vmatprep.subr.mxu1 %v8726_v62  ;;  %v6170_v17 = vadd.f32 %v6169_v48, %v6168_v9  ;;  %v7026_v19 = vpop.f32.mrf.mxu1  ;;  %v6105_v63 = vadd.f32 %v9003_v53, %v8996_v41  ;;  %v2453_v28 = vadd.f32 %v6991_v2, %v6111_v30  ;;  %v3720_v2 = vld [vmem:[#allocation8 + $0x9b8] sm:$0xff]  ;;  %v3718_v9 = vld [vmem:[#allocation8 + $0x9a8] sm:$0xff]  ;;  %v3992_v30 = vld [vmem:[#allocation8 + $0x9c0] sm:$0xff] }
 0x28c   :  { %3810 = vmatprep.mubr.f32.mxu0 %v3713_v37  ;;  %6555 = vmatpush3.msra.mxu0 %v8907_v47 }
 0x28d   :  { %7217 = vmatpush3.msra.mxu1 %v8726_v62  ;;  %3811 = vmatmul.mubr.f32.gmra.mxu0 %v3712_v51  ;;  %v2712_v38 = vpop.f32.mrf.mxu1  ;;  %v6093_v62 = vadd.f32 %v8920_v39, %v8912_v54  ;;  %v2443_v54 = vadd.f32 %v9017_v27, %v6105_v63  ;;  %v3960_v51 = vld [vmem:[#allocation4 + $0x288] sm:$0xff] }
 0x28e   :  { %6556 = vmatprep.subr.mxu0 %v8786_v24  ;;  %7218 = vmatprep.subr.mxu1 %v8735_v4  ;;  %v6171_v37 = vpop.f32.mrf.mxu0  ;;  %v9049_v47 = vadd.f32 %v6170_v17, %v2712_v38  ;;  %v3715_v24 = vld [vmem:[#allocation8 + $0x990] sm:$0xff]  ;;  %v3993_v17 = vld [vmem:[#allocation8 + $0x9c8] sm:$0xff] }
 0x28f   :  { %7206 = vmatprep.mubr.f32.mxu1 %v3711_v34  ;;  %6557 = vmatpush3.msra.mxu0 %v8915_v18  ;;  %v3961_v18 = vld [vmem:[#allocation4 + $0x290] sm:$0xff]  ;;  %v2423_v39 = vadd.f32 %v8980_v31, %v6093_v62  ;;  %v2459_v27 = vmax.f32 %v2443_v54, %v2453_v28  ;;  %v6090_v31 = vadd.f32 %v8903_v13, %v8896_v22  ;;  %v9829_v63 = vld [vmem:[#allocation35_spill] sm:$0xff] }
 0x290   :  { %7219 = vmatpush3.msra.mxu1 %v8735_v4  ;;  %6558 = vmatprep.subr.mxu0 %v8791_v12  ;;  %v6172_v49 = vpop.f32.mrf.mxu0  ;;  %v2433_v4 = vadd.f32 %v9000_v61, %v6099_v52  ;;  %v6108_v12 = vadd.f32 %v9019_v59, %v9012_v15  ;;  %v6096_v61 = vadd.f32 %v8940_v23, %v8933_v8  ;;  %v9830_v62 = vld [vmem:[#allocation43_spill] sm:$0xff] }
 0x291   :  { %7207 = vmatmul.mubr.f32.gmra.mxu1 %v3714_v3  ;;  %7220 = vmatprep.subr.mxu1 %v8918_v40  ;;  %v6173_v41 = vadd.f32 %v6172_v49, %v6171_v37  ;;  %v6102_v15 = vadd.f32 %v8986_v42, %v8976_v43  ;;  %v3959_v43 = vld [vmem:[#allocation4 + $0x280] sm:$0xff]  ;;  %v9832_v28 = vld [vmem:[#allocation47_spill] sm:$0xff] }
 0x292   :  { %3815 = vmatprep.mubr.f32.mxu0 %v3716_v32  ;;  %6559 = vmatpush3.msra.mxu0 %v8925_v33  ;;  %v2457_v48 = vmax.f32 %v2423_v39, %v2433_v4  ;;  %v2448_v34 = vadd.f32 %v6108_v12, %v9037_v58  ;;  %v2428_v22 = vadd.f32 %v6096_v61, %v9010_v56  ;;  %v9835_v12 = vld [vmem:[#allocation40_spill] sm:$0xff]  ;;  %v9837_v39 = vld [vmem:[#allocation45_spill] sm:$0xff] }
 0x293   :  { %7221 = vmatpush3.msra.mxu1 %v8918_v40  ;;  %3816 = vmatmul.mubr.f32.gmra.mxu0 %v3715_v24  ;;  %v9066_v53 = vadd.f32 %v7026_v19, %v6173_v41  ;;  %v6174_v33 = vpop.f32.mrf.mxu0  ;;  %v3719_v40 = vld [vmem:[#allocation8 + $0x9b0] sm:$0xff]  ;;  %v2438_v13 = vadd.f32 %v6102_v15, %v9027_v20  ;;  %v9089_v19 = vstv %s9063_s4  ;;  %v6019_v56 = vadd.f32 %v8821_v50, %v8808_v45 }
 0x294   :  { %6560 = vmatprep.subr.mxu0 %v3962_v26  ;;  %7222 = vmatprep.subr.mxu1 %v8927_v44  ;;  %v6031_v20 = vadd.f32 %v8885_v57, %v8879_v35  ;;  %v6025_v57 = vadd.f32 %v8855_v29, %v8852_v11  ;;  %v3994_v50 = vld [vmem:[#allocation8 + $0x9d0] sm:$0xff]  ;;  %v3995_v11 = vld [vmem:[#allocation8 + $0x9d8] sm:$0xff] }
 0x295   :  { %7209 = vmatprep.mubr.f32.mxu1 %v3717_v10  ;;  %6561 = vmatpush3.msra.mxu0 %v8803_v46  ;;  %v6175_v59 = vpop.f32.mrf.mxu0  ;;  %v2461_v46 = vmax.f32 %v2457_v48, %v2459_v27  ;;  %v9831_v24 = vld [vmem:[#allocation44_spill] sm:$0xff]  ;;  %v3999_v10 = vld [vmem:[#allocation8 + $0x9f8] sm:$0xff]  ;;  %v9838_v27 = vld [vmem:[#allocation34_spill] sm:$0xff] }
 0x296   :  { %7223 = vmatpush3.msra.mxu1 %v8927_v44  ;;  %6562 = vmatprep.subr.mxu0 %v3961_v18  ;;  %v6176_v23 = vadd.f32 %v6175_v59, %v6174_v33  ;;  %v6028_v26 = vadd.f32 %v9831_v24, %v9830_v62  ;;  %v2158_v49 = vadd.f32 %v9832_v28, %v6031_v20  ;;  %v9833_v29 = vld [vmem:[#allocation36_spill] sm:$0xff]  ;;  %v4005_v20 = vld [vmem:[#allocation8 + $0xa28] sm:$0xff]  ;;  %v4003_v62 = vld [vmem:[#allocation8 + $0xa18] sm:$0xff] }
 0x297   :  { %7210 = vmatmul.mubr.f32.gmra.mxu1 %v3720_v2  ;;  %v7029_v8 = vpop.f32.mrf.mxu1  ;;  %7224 = vmatprep.subr.mxu1 %v8936_v6  ;;  %v2463_v32 = vadd.f32 %v2461_v46, %v9089_v19  ;;  %v9836_v2 = vld [vmem:[#allocation42_spill] sm:$0xff]  ;;  %v2148_v33 = vadd.f32 %v9837_v39, %v6025_v57  ;;  %v9839_v59 = vld [vmem:[#allocation48_spill] sm:$0xff] }
 0x298   :  { %3820 = vmatprep.mubr.f32.mxu0 %v3719_v40  ;;  %6563 = vmatpush3.msra.mxu0 %v8817_v25  ;;  %v2418_v25 = vadd.f32 %v6090_v31, %v8992_v14  ;;  %v3996_v14 = vld [vmem:[#allocation8 + $0x9e0] sm:$0xff]  ;;  %v6022_v18 = vadd.f32 %v9836_v2, %v9835_v12  ;;  %v3998_v48 = vld [vmem:[#allocation8 + $0x9f0] sm:$0xff] }
 0x299   :  { %7225 = vmatpush3.msra.mxu1 %v8936_v6  ;;  %v2722_v44 = vpop.f32.mrf.mxu1  ;;  %3821 = vmatmul.mubr.f32.gmra.mxu0 %v3718_v9  ;;  %v6177_v42 = vpop.f32.mrf.mxu0  ;;  %v2458_v6 = vmax.f32 %v2438_v13, %v2448_v34  ;;  %v9115_v41 = vmax.f32 %v2463_v32, 0.0  ;;  %v2153_v9 = vadd.f32 %v6028_v26, %v9839_v59  ;;  %v4002_v34 = vld [vmem:[#allocation8 + $0xa10] sm:$0xff]  ;;  %v9845_v32 = vld [vmem:[#allocation38_spill] sm:$0xff] }
 0x29a   :  { %6564 = vmatprep.subr.mxu0 %v3960_v51  ;;  %v9083_v58 = vadd.f32 %v6176_v23, %v2722_v44  ;;  %7226 = vmatprep.subr.mxu1 %v8944_v1  ;;  %v2456_v38 = vmax.f32 %v2418_v25, %v2428_v22  ;;  %v2164_v51 = vmax.f32 %v2148_v33, %v2158_v49  ;;  %v9840_v22 = vld [vmem:[#allocation46_spill] sm:$0xff]  ;;  %v4006_v24 = vld [vmem:[#allocation8 + $0xa30] sm:$0xff]  ;;  %v4007_v49 = vld [vmem:[#allocation8 + $0xa38] sm:$0xff] }
 0x29b   :  { %6565 = vmatpush3.msra.mxu0 %v8827_v21  ;;  %7227 = vmatpush3.msra.mxu1 %v8944_v1  ;;  %v6178_v21 = vpop.f32.mrf.mxu0  ;;  %v2143_v13 = vadd.f32 %v6022_v18, %v9840_v22  ;;  %v4012_v2 = vld [vmem:[#allocation8 + $0xa60] sm:$0xff]  ;;  %v9848_v39 = vld [vmem:[#allocation32_spill] sm:$0xff]  ;;  %v9855_v22 = vld [vmem:[#allocation29_spill] sm:$0xff] }
 0x29c   :  { %6566 = vmatprep.subr.mxu0 %v3959_v43  ;;  %v2751_v3 = vmax.f32 %v9049_v47, %v9083_v58  ;;  %7228 = vmatprep.subr.mxu1 %v8952_v55  ;;  %v6179_v45 = vadd.f32 %v6178_v21, %v6177_v42  ;;  %v2460_v1 = vmax.f32 %v2456_v38, %v2458_v6  ;;  %v9844_v38 = vld [vmem:[#allocation37_spill] sm:$0xff] }
 0x29d   :  { %6567 = vmatpush3.msra.mxu0 %v8836_v60  ;;  %4080 = vmatprep.mubr.f32.mxu0 %v3993_v17  ;;  %v9828_v60 = vld [vmem:[#allocation33_spill] sm:$0xff]  ;;  %v2163_v42 = vmax.f32 %v2143_v13, %v2153_v9  ;;  %v4001_v17 = vld [vmem:[#allocation8 + $0xa08] sm:$0xff]  ;;  %v1873_v33 = vadd.f32 %v9848_v39, %v9089_v19  ;;  %v1577_v13 = vadd.f32 %v9855_v22, %v9089_v19 }
 0x29e   :  { %7229 = vmatpush3.msra.mxu1 %v8952_v55  ;;  %4081 = vmatmul.mubr.f32.vlgmr.msra.gmra.mxu0 %v3992_v30  ;;  %v9105_v35 = vadd.f32 %v7029_v8, %v6179_v45  ;;  %v6180_v52 = vpop.f32.mrf.mxu0  ;;  %v6013_v37 = vadd.f32 %v9829_v63, %v9828_v60  ;;  %v2138_v55 = vadd.f32 %v9833_v29, %v6019_v56  ;;  %v9843_v56 = vld [vmem:[#allocation41_spill] sm:$0xff]  ;;  %v4008_v60 = vld [vmem:[#allocation8 + $0xa40] sm:$0xff]  ;;  %v9851_v9 = vld [vmem:[#allocation31_spill] sm:$0xff] }
 0x29f   :  { %7230 = vmatprep.subr.mxu1 %v8964_v7  ;;  %4085 = vmatprep.mubr.f32.mxu0 %v3996_v14  ;;  %9834 = vst [vmem:[#allocation33_spill] sm:$0xff] %v9115_v41  ;;  %v2462_v15 = vadd.f32 %v2460_v1, %v9089_v19  ;;  %v4000_v14 = vld [vmem:[#allocation8 + $0xa00] sm:$0xff]  ;;  %v9846_v45 = vmax.f32 %v9844_v38, %v9845_v32  ;;  %v9863_v32 = vld [vmem:[#allocation25_spill] sm:$0xff] }
 0x2a0   :  { %7231 = vmatpush3.msra.mxu1 %v8964_v7  ;;  %7244 = vmatprep.mubr.f32.mxu1 %v3994_v50  ;;  %v2752_v4 = vmax.f32 %v9066_v53, %v9105_v35  ;;  %v6181_v54 = vpop.f32.mrf.mxu0  ;;  %v9767_v7 = vmov 0.0   ;;  %v2128_v31 = vadd.f32 %v9838_v27, %v6013_v37  ;;  %v4004_v1 = vld [vmem:[#allocation8 + $0xa20] sm:$0xff]  ;;  %v4014_v27 = vld [vmem:[#allocation8 + $0xa70] sm:$0xff]  ;;  %v9871_v39 = vld [vmem:[#allocation21_spill] sm:$0xff] }
 0x2a1   :  { %7232 = vmatprep.subr.mxu1 %v8971_v16  ;;  %4283 = vmatprep.subr.mxu0 %v9767_v7  ;;  %v6182_v40 = vadd.f32 %v6181_v54, %v6180_v52  ;;  %v9137_v46 = vmax.f32 %v2462_v15, 0.0  ;;  %v2165_v57 = vmax.f32 %v9846_v45, %v2163_v42  ;;  %v9857_v42 = vld [vmem:[#allocation28_spill] sm:$0xff]  ;;  %v987_v45 = vadd.f32 %v9863_v32, %v9089_v19 }
 0x2a2   :  { %7233 = vmatpush3.msra.mxu1 %v8971_v16  ;;  %v7032_v61 = vpop.f32.mrf.mxu1  ;;  %4086 = vmatmul.mubr.f32.gmra.mxu0 %v3995_v11  ;;  %v2162_v43 = vmax.f32 %v2128_v31, %v2138_v55  ;;  %v4011_v55 = vld [vmem:[#allocation8 + $0xa58] sm:$0xff] }
 0x2a3   :  { %7234 = vmatprep.subr.mxu1 %v8984_v0  ;;  %4090 = vmatprep.mubr.f32.mxu0 %v3999_v10  ;;  %9842 = vst [vmem:[#allocation35_spill] sm:$0xff] %v9137_v46  ;;  %v4009_v10 = vld [vmem:[#allocation8 + $0xa48] sm:$0xff] }
 0x2a4   :  { %7235 = vmatpush3.msra.mxu1 %v8984_v0  ;;  %v2732_v16 = vpop.f32.mrf.mxu1  ;;  %4284 = vmatpush1.msra.mxu0 %v9115_v41  ;;  %v6183_v23 = vpop.f32.mrf.mxu0  ;;  %v9841_v0 = vld [vmem:[#allocation39_spill] sm:$0xff]  ;;  %v2166_v25 = vmax.f32 %v2162_v43, %v2164_v51  ;;  %v1872_v51 = vadd.f32 %v9851_v9, %v9089_v19 }
 0x2a5   :  { %7236 = vmatprep.subr.mxu1 %v8813_v5  ;;  %v9131_v8 = vadd.f32 %v6182_v40, %v2732_v16  ;;  %4285 = vmatprep.subr.mxu0 %v9767_v7 }
 0x2a6   :  { %7237 = vmatpush3.msra.mxu1 %v8813_v5  ;;  %4091 = vmatmul.mubr.f32.gmra.mxu0 %v3998_v48  ;;  %v6184_v44 = vpop.f32.mrf.mxu0  ;;  %v3997_v5 = vld [vmem:[#allocation8 + $0x9e8] sm:$0xff]  ;;  %v2168_v50 = vadd.f32 %v2166_v25, %v9089_v19  ;;  %v4015_v48 = vld [vmem:[#allocation8 + $0xa78] sm:$0xff]  ;;  %v1283_v25 = vadd.f32 %v9857_v42, %v9089_v19 }
 0x2a7   :  { %7238 = vmatprep.subr.mxu1 %v9841_v0  ;;  %4095 = vmatprep.mubr.f32.mxu0 %v4002_v34  ;;  %v6185_v6 = vadd.f32 %v6184_v44, %v6183_v23  ;;  %v9181_v34 = vmax.f32 %v1873_v33, 0.0  ;;  %v4013_v23 = vld [vmem:[#allocation8 + $0xa68] sm:$0xff]  ;;  %v397_v33 = vadd.f32 %v9089_v19, %v9871_v39 }
 0x2a8   :  { %7239 = vmatpush3.msra.mxu1 %v9841_v0  ;;  %4286 = vmatpush1.msra.mxu0 %v9137_v46  ;;  %v9156_v28 = vmax.f32 %v2168_v50, 0.0  ;;  %v9192_v0 = vmax.f32 %v1872_v51, 0.0 }
 0x2a9   :  { %7240 = vmatprep.subr.mxu1 %v9843_v56  ;;  %4287 = vmatprep.subr.mxu0 %v9767_v7  ;;  %v9144_v30 = vadd.f32 %v7032_v61, %v6185_v6  ;;  %v6186_v21 = vpop.f32.mrf.mxu0  ;;  %v4010_v61 = vld [vmem:[#allocation8 + $0xa50] sm:$0xff]  ;;  %9853 = vst [vmem:[#allocation36_spill] sm:$0xff] %v9181_v34 }
 0x2aa   :  { %7241 = vmatpush3.msra.mxu1 %v9843_v56  ;;  %4096 = vmatmul.mubr.f32.gmra.mxu0 %v4001_v17  ;;  %9847 = vst [vmem:[#allocation43_spill] sm:$0xff] %v9156_v28  ;;  %9856 = vst [vmem:[#allocation42_spill] sm:$0xff] %v9192_v0  ;;  %v9207_v56 = vmax.f32 %v1577_v13, 0.0 }
 0x2ab   :  { %7242 = vmatprep.subr.mxu1 %v8844_v36  ;;  %4100 = vmatprep.mubr.f32.mxu0 %v4005_v20  ;;  %v6187_v52 = vpop.f32.mrf.mxu0 }
 0x2ac   :  { %7243 = vmatpush3.msra.mxu1 %v8844_v36  ;;  %v6188_v63 = vadd.f32 %v6187_v52, %v6186_v21  ;;  %v2167_v36 = vadd.f32 %v2165_v57, %v9089_v19  ;;  %4288 = vmatpush1.msra.mxu0 %v9156_v28  ;;  %9860 = vst [vmem:[#allocation34_spill] sm:$0xff] %v9207_v56  ;;  %v9215_v21 = vmax.f32 %v1283_v25, 0.0 }
 0x2ad   :  { %7245 = vmatmul.mubr.f32.vlgmr.msra.gmra.mxu1 %v3997_v5  ;;  %4420 = vmatprep.subr.mxu1 %v9767_v7  ;;  %v7035_v37 = vpop.f32.mrf.mxu1  ;;  %v9861_v5 = vld [vmem:[#allocation26_spill] sm:$0xff] }
 0x2ae   :  { %7247 = vmatprep.mubr.f32.mxu1 %v4000_v14  ;;  %4421 = vmatpush1.msra.mxu1 %v9115_v41  ;;  %v9165_v40 = vmax.f32 %v2167_v36, 0.0  ;;  %9862 = vst [vmem:[#allocation48_spill] sm:$0xff] %v9215_v21  ;;  %v9239_v36 = vmax.f32 %v987_v45, 0.0 }
 0x2af   :  { %4101 = vmatmul.mubr.f32.gmra.mxu0 %v4004_v1  ;;  %4422 = vmatprep.subr.mxu1 %v9767_v7  ;;  %v2742_v26 = vpop.f32.mrf.mxu1  ;;  %v6189_v11 = vpop.f32.mrf.mxu0 }
 0x2b0   :  { %4105 = vmatprep.mubr.f32.mxu0 %v4008_v60  ;;  %4423 = vmatpush1.msra.mxu1 %v9137_v46  ;;  %v2743_v29 = vadd.f32 %v6188_v63, %v2742_v26  ;;  %9849 = vst [vmem:[#allocation44_spill] sm:$0xff] %v9165_v40  ;;  %v9866_v63 = vld [vmem:[#allocation24_spill] sm:$0xff]  ;;  %9868 = vst [vmem:[#allocation41_spill] sm:$0xff] %v9239_v36 }
 0x2b1   :  { %7248 = vmatmul.mubr.f32.gmra.mxu1 %v4003_v62  ;;  %4424 = vmatprep.subr.mxu1 %v9767_v7  ;;  %v6190_v12 = vpop.f32.mrf.mxu0 }
 0x2b2   :  { %7250 = vmatprep.mubr.f32.mxu1 %v4006_v24  ;;  %v2753_v54 = vmax.f32 %v9131_v8, %v2743_v29  ;;  %4425 = vmatpush1.msra.mxu1 %v9156_v28  ;;  %v6191_v18 = vadd.f32 %v6190_v12, %v6189_v11  ;;  %v9867_v24 = vld [vmem:[#allocation23_spill] sm:$0xff] }
 0x2b3   :  { %4106 = vmatmul.mubr.f32.gmra.mxu0 %v4007_v49  ;;  %4289 = vmatprep.subr.mxu0 %v9767_v7  ;;  %v692_v26 = vadd.f32 %v9867_v24, %v9089_v19 }
 0x2b4   :  { %4110 = vmatprep.mubr.f32.mxu0 %v4011_v55  ;;  %v9171_v15 = vmax.f32 %v2751_v3, %v2753_v54  ;;  %4426 = vmatprep.subr.mxu1 %v9767_v7  ;;  %v2748_v31 = vadd.f32 %v7035_v37, %v6191_v18  ;;  %v6248_v59 = vpop.f32.mrf.mxu0  ;;  %v9852_v3 = vld [vmem:[#allocation30_spill] sm:$0xff]  ;;  %v693_v37 = vadd.f32 %v9866_v63, %v9089_v19 }
 0x2b5   :  { %7251 = vmatmul.mubr.f32.gmra.mxu1 %v4009_v10  ;;  %4290 = vmatpush1.msra.mxu0 %v9165_v40  ;;  %v1578_v16 = vadd.f32 %v9852_v3, %v9089_v19  ;;  %v9870_v10 = vld [vmem:[#allocation22_spill] sm:$0xff]  ;;  %v4263_v3 = vld [vmem:[#allocation10 + $0x8] sm:$0xff] }
 0x2b6   :  { %9850 = vst [vmem:[#allocation47_spill] sm:$0xff] %v9171_v15  ;;  %7253 = vmatprep.mubr.f32.mxu1 %v4012_v2  ;;  %4427 = vmatpush1.msra.mxu1 %v9165_v40  ;;  %v2754_v47 = vmax.f32 %v9144_v30, %v2748_v31  ;;  %v6249_v58 = vpop.f32.mrf.mxu0  ;;  %v988_v30 = vadd.f32 %v9861_v5, %v9089_v19  ;;  %v9249_v55 = vmax.f32 %v693_v37, 0.0 }
 0x2b7   :  { %4111 = vmatmul.mubr.f32.gmra.mxu0 %v4010_v61  ;;  %4291 = vmatprep.subr.mxu0 %v9767_v7  ;;  %v6250_v8 = vadd.f32 %v6249_v58, %v6248_v59  ;;  %v9199_v17 = vmax.f32 %v1578_v16, 0.0  ;;  %v7070_v53 = vpop.f32.mrf.mxu1  ;;  %v398_v54 = vadd.f32 %v9089_v19, %v9870_v10  ;;  %v9260_v61 = vmax.f32 %v692_v26, 0.0  ;;  %v4401_v16 = vld [vmem:[#allocation10 + $0x48] sm:$0xff] }
 0x2b8   :  { %4115 = vmatprep.mubr.f32.mxu0 %v4014_v27  ;;  %4428 = vmatprep.subr.mxu1 %v9767_v7  ;;  %v9188_v43 = vmax.f32 %v2752_v4, %v2754_v47  ;;  %v9859_v4 = vld [vmem:[#allocation27_spill] sm:$0xff]  ;;  %v9229_v60 = vmax.f32 %v988_v30, 0.0  ;;  %9869 = vst [vmem:[#allocation37_spill] sm:$0xff] %v9249_v55  ;;  %v9272_v47 = vmax.f32 %v397_v33, 0.0 }
 0x2b9   :  { %7254 = vmatmul.mubr.f32.gmra.mxu1 %v4015_v48  ;;  %4292 = vmatpush1.msra.mxu0 %v9181_v34  ;;  %9858 = vst [vmem:[#allocation45_spill] sm:$0xff] %v9199_v17  ;;  %v1282_v6 = vadd.f32 %v9859_v4, %v9089_v19  ;;  %v3007_v38 = vpop.f32.mrf.mxu1  ;;  %9872 = vst [vmem:[#allocation38_spill] sm:$0xff] %v9260_v61  ;;  %v9266_v9 = vmax.f32 %v398_v54, 0.0 }
 0x2ba   :  { %9854 = vst [vmem:[#allocation40_spill] sm:$0xff] %v9188_v43  ;;  %4429 = vmatpush1.msra.mxu1 %v9181_v34  ;;  %4293 = vmatprep.subr.mxu0 %v9767_v7  ;;  %v6251_v44 = vpop.f32.mrf.mxu0  ;;  %9865 = vst [vmem:[#allocation39_spill] sm:$0xff] %v9229_v60  ;;  %v9243_v49 = vadd.f32 %v6250_v8, %v3007_v38 }
 0x2bb   :  { %4116 = vmatmul.mubr.f32.gmra.mxu0 %v4013_v23  ;;  %4430 = vmatprep.subr.mxu1 %v9767_v7  ;;  %v9223_v57 = vmax.f32 %v1282_v6, 0.0  ;;  %9873 = vst [vmem:[#allocation32_spill] sm:$0xff] %v9266_v9  ;;  %9874 = vst [vmem:[#allocation31_spill] sm:$0xff] %v9272_v47 }
 0x2bc   :  { %4294 = vmatpush1.msra.mxu0 %v9192_v0  ;;  %4431 = vmatpush1.msra.mxu1 %v9192_v0  ;;  %v6252_v35 = vpop.f32.mrf.mxu0 }
 0x2bd   :  { %4295 = vmatprep.subr.mxu0 %v9767_v7  ;;  %4432 = vmatprep.subr.mxu1 %v9767_v7  ;;  %v6253_v20 = vadd.f32 %v6252_v35, %v6251_v44  ;;  %9864 = vst [vmem:[#allocation46_spill] sm:$0xff] %v9223_v57 }
 0x2be   :  { %4296 = vmatpush1.msra.mxu0 %v9199_v17  ;;  %4433 = vmatpush1.msra.mxu1 %v9199_v17 }
 0x2bf   :  { %4297 = vmatprep.subr.mxu0 %v9767_v7  ;;  %4434 = vmatprep.subr.mxu1 %v9767_v7  ;;  %v6254_v14 = vpop.f32.mrf.mxu0  ;;  %v3013_v27 = vadd.f32 %v7070_v53, %v6253_v20 }
 0x2c0   :  { %4298 = vmatpush1.msra.mxu0 %v9207_v56  ;;  %4435 = vmatpush1.msra.mxu1 %v9207_v56 }
 0x2c1   :  { %4299 = vmatprep.subr.mxu0 %v9767_v7  ;;  %4436 = vmatprep.subr.mxu1 %v9767_v7  ;;  %v6255_v50 = vpop.f32.mrf.mxu0 }
 0x2c2   :  { %4300 = vmatpush1.msra.mxu0 %v9215_v21  ;;  %4437 = vmatpush1.msra.mxu1 %v9215_v21  ;;  %v6256_v1 = vadd.f32 %v6255_v50, %v6254_v14 }
 0x2c3   :  { %4301 = vmatprep.subr.mxu0 %v9767_v7  ;;  %v7073_v52 = vpop.f32.mrf.mxu1  ;;  %4438 = vmatprep.subr.mxu1 %v9767_v7 }
 0x2c4   :  { %4302 = vmatpush1.msra.mxu0 %v9223_v57  ;;  %4439 = vmatpush1.msra.mxu1 %v9223_v57 }
 0x2c5   :  { %4303 = vmatprep.subr.mxu0 %v9767_v7  ;;  %v3017_v62 = vpop.f32.mrf.mxu1  ;;  %4440 = vmatprep.subr.mxu1 %v9767_v7  ;;  %v6257_v11 = vpop.f32.mrf.mxu0 }
 0x2c6   :  { %4304 = vmatpush1.msra.mxu0 %v9229_v60  ;;  %v3018_v29 = vadd.f32 %v6256_v1, %v3017_v62  ;;  %4441 = vmatpush1.msra.mxu1 %v9229_v60 }
 0x2c7   :  { %4305 = vmatprep.subr.mxu0 %v9767_v7  ;;  %4442 = vmatprep.subr.mxu1 %v9767_v7  ;;  %v6258_v2 = vpop.f32.mrf.mxu0 }
 0x2c8   :  { %4306 = vmatpush1.msra.mxu0 %v9239_v36  ;;  %v3046_v12 = vmax.f32 %v9243_v49, %v3018_v29  ;;  %4443 = vmatpush1.msra.mxu1 %v9239_v36  ;;  %v6259_v18 = vadd.f32 %v6258_v2, %v6257_v11 }
 0x2c9   :  { %4307 = vmatprep.subr.mxu0 %v9767_v7  ;;  %4444 = vmatprep.subr.mxu1 %v9767_v7 }
 0x2ca   :  { %4308 = vmatpush1.msra.mxu0 %v9249_v55  ;;  %4445 = vmatpush1.msra.mxu1 %v9249_v55  ;;  %v3023_v31 = vadd.f32 %v7073_v52, %v6259_v18  ;;  %v6260_v59 = vpop.f32.mrf.mxu0 }
 0x2cb   :  { %4309 = vmatprep.subr.mxu0 %v9767_v7  ;;  %4446 = vmatprep.subr.mxu1 %v9767_v7 }
 0x2cc   :  { %4310 = vmatpush1.msra.mxu0 %v9260_v61  ;;  %4447 = vmatpush1.msra.mxu1 %v9260_v61  ;;  %v3047_v51 = vmax.f32 %v3013_v27, %v3023_v31  ;;  %v6261_v48 = vpop.f32.mrf.mxu0 }
 0x2cd   :  { %4311 = vmatprep.subr.mxu0 %v9767_v7  ;;  %4448 = vmatprep.subr.mxu1 %v9767_v7  ;;  %v6262_v58 = vadd.f32 %v6261_v48, %v6260_v59 }
 0x2ce   :  { %4312 = vmatpush1.msra.mxu0 %v9266_v9  ;;  %4449 = vmatpush1.msra.mxu1 %v9266_v9  ;;  %v7076_v8 = vpop.f32.mrf.mxu1 }
 0x2cf   :  { %4313 = vmatprep.subr.mxu0 %v9767_v7  ;;  %4450 = vmatprep.subr.mxu1 %v9767_v7 }
 0x2d0   :  { %4314 = vmatpush1.msra.mxu0 %v9272_v47  ;;  %4451 = vmatpush1.msra.mxu1 %v9272_v47  ;;  %v6263_v23 = vpop.f32.mrf.mxu0  ;;  %v3027_v42 = vpop.f32.mrf.mxu1 }
 0x2d1   :  { %4331 = vmatprep.subr.mxu0 %v9767_v7  ;;  %4468 = vmatprep.subr.mxu1 %v9767_v7  ;;  %v3028_v6 = vadd.f32 %v6262_v58, %v3027_v42 }
 0x2d2   :  { %5458 = vmatprep.mubr.msk.f32.mxu0 %vm4270_vm0, %v4263_v3  ;;  %v6264_v22 = vpop.f32.mrf.mxu0  ;;  %5462 = vmatprep.mubr.msk.f32.mxu1 %vm4270_vm0, %v4401_v16 }
 0x2d3   :  { %v6265_v13 = vadd.f32 %v6264_v22, %v6263_v23 }
 0x2d5   :  { %v6266_v44 = vpop.f32.mrf.mxu0  ;;  %v3033_v45 = vadd.f32 %v7076_v8, %v6265_v13 }
 0x2d7   :  { %v6267_v25 = vpop.f32.mrf.mxu0 }
 0x2d8   :  { %v6268_v53 = vadd.f32 %v6267_v25, %v6266_v44 }
 0x2d9   :  { %v7079_v35 = vpop.f32.mrf.mxu1 }
 0x2db   :  { %v3037_v4 = vpop.f32.mrf.mxu1  ;;  %v6269_v20 = vpop.f32.mrf.mxu0 }
 0x2dc   :  { %v3038_v5 = vadd.f32 %v6268_v53, %v3037_v4 }
 0x2dd   :  { %v6270_v14 = vpop.f32.mrf.mxu0 }
 0x2de   :  { %v3048_v30 = vmax.f32 %v3028_v6, %v3038_v5  ;;  %v6271_v38 = vadd.f32 %v6270_v14, %v6269_v20 }
 0x2e0   :  { %v9283_v32 = vmax.f32 %v3046_v12, %v3048_v30  ;;  %v3043_v50 = vadd.f32 %v7079_v35, %v6271_v38  ;;  %v6328_v1 = vpop.f32.mrf.mxu0 }
 0x2e2   :  { %9875 = vst [vmem:[#allocation30_spill] sm:$0xff] %v9283_v32  ;;  %v3049_v52 = vmax.f32 %v3033_v45, %v3043_v50  ;;  %v6329_v63 = vpop.f32.mrf.mxu0 }
 0x2e3   :  { %v9285_v37 = vadd.f32 %v6329_v63, %v6328_v1  ;;  %v9289_v18 = vpop.f32.mrf.mxu1 }
 0x2e4   :  { %v9287_v62 = vmax.f32 %v3047_v51, %v3049_v52 }
 0x2e5   :  { %v9291_v39 = vpop.f32.mrf.mxu1 }
 0x2e6   :  { %v6331_v24 = vpop.f32.mrf.mxu0 }
 0x2e8   :  { %v6332_v26 = vpop.f32.mrf.mxu0 }
 0x2e9   :  { %v6333_v56 = vadd.f32 %v6332_v26, %v6331_v24 }
 0x2eb   :  { %v6334_v49 = vpop.f32.mrf.mxu0  ;;  %v3308_v26 = vadd.f32 %v9289_v18, %v6333_v56 }
 0x2ed   :  { %v6335_v11 = vpop.f32.mrf.mxu0 }
 0x2ee   :  { %v6336_v40 = vadd.f32 %v6335_v11, %v6334_v49 }
 0x2ef   :  { %v7117_v27 = vpop.f32.mrf.mxu1 }
 0x2f1   :  { %v6337_v29 = vpop.f32.mrf.mxu0  ;;  %v3312_v59 = vpop.f32.mrf.mxu1 }
 0x2f3   :  { %v6338_v10 = vpop.f32.mrf.mxu0 }
 0x2f4   :  { %v6339_v55 = vadd.f32 %v6338_v10, %v6337_v29 }
 0x2f6   :  { %v6340_v54 = vpop.f32.mrf.mxu0 }
 0x2f8   :  { %v6341_v2 = vpop.f32.mrf.mxu0 }
 0x2f9   :  { %v6342_v28 = vadd.f32 %v6341_v2, %v6340_v54 }
 0x2fa   :  { %v7120_v51 = vpop.f32.mrf.mxu1 }
 0x2fc   :  { %v6343_v12 = vpop.f32.mrf.mxu0  ;;  %v3322_v3 = vpop.f32.mrf.mxu1 }
 0x2fe   :  { %v6344_v33 = vpop.f32.mrf.mxu0 }
 0x2ff   :  { %v6345_v36 = vadd.f32 %v6344_v33, %v6343_v12 }
 0x301   :  { %v6346_v31 = vpop.f32.mrf.mxu0 }
 0x303   :  { %v6347_v48 = vpop.f32.mrf.mxu0 }
 0x304   :  { %v6348_v60 = vadd.f32 %v6347_v48, %v6346_v31 }
 0x305   :  { %v7123_v23 = vpop.f32.mrf.mxu1 }
 0x307   :  { %v6349_v58 = vpop.f32.mrf.mxu0  ;;  %v3332_v13 = vpop.f32.mrf.mxu1 }
 0x308   :  { %v3333_v29 = vadd.f32 %v6348_v60, %v3332_v13 }
 0x309   :  { %v6350_v16 = vpop.f32.mrf.mxu0 }
 0x30a   :  { %v6351_v7 = vadd.f32 %v6350_v16, %v6349_v58 }
 0x30c   :  { %v6408_v8 = vpop.f32.mrf.mxu0  ;;  %v3338_v46 = vadd.f32 %v7123_v23, %v6351_v7 }
 0x30e   :  { %v6409_v22 = vpop.f32.mrf.mxu0 }
 0x30f   :  { %v7158_v42 = vpop.f32.mrf.mxu1  ;;  %v6410_v17 = vadd.f32 %v6409_v22, %v6408_v8  ;;  %v9878_v8 = vld [vmem:[#allocation40_spill] sm:$0xff] }
 0x310   :  { %v6411_v44 = vpop.f32.mrf.mxu0  ;;  %v2758_v22 = vadd.f32 %v9878_v8, %v9089_v19 }
 0x311   :  { %v3597_v35 = vpop.f32.mrf.mxu1 }
 0x312   :  { %v6412_v25 = vpop.f32.mrf.mxu0  ;;  %v3598_v12 = vadd.f32 %v6410_v17, %v3597_v35 }
 0x313   :  { %v7161_v6 = vpop.f32.mrf.mxu1  ;;  %v6413_v41 = vadd.f32 %v6412_v25, %v6411_v44 }
 0x315   :  { %v6414_v53 = vpop.f32.mrf.mxu0  ;;  %v3607_v30 = vpop.f32.mrf.mxu1  ;;  %v3603_v7 = vadd.f32 %v7158_v42, %v6413_v41  ;;  %v9879_v42 = vld [vmem:[#allocation47_spill] sm:$0xff] }
 0x316   :  { %v2757_v25 = vadd.f32 %v9879_v42, %v9089_v19 }
 0x317   :  { %v6415_v4 = vpop.f32.mrf.mxu0  ;;  %v7164_v38 = vpop.f32.mrf.mxu1 }
 0x318   :  { %v6416_v9 = vadd.f32 %v6415_v4, %v6414_v53  ;;  %v3318_v53 = vadd.f32 %v7117_v27, %v6339_v55  ;;  %v3328_v4 = vadd.f32 %v7120_v51, %v6345_v36  ;;  %v3053_v27 = vadd.f32 %v9287_v62, %v9089_v19  ;;  %v9877_v51 = vld [vmem:[#allocation30_spill] sm:$0xff] }
 0x319   :  { %v6417_v20 = vpop.f32.mrf.mxu0  ;;  %v3617_v1 = vpop.f32.mrf.mxu1 }
 0x31a   :  { %v3608_v43 = vadd.f32 %v6416_v9, %v3607_v30  ;;  %v3344_v49 = vmax.f32 %v3328_v4, %v3338_v46  ;;  %v9336_v13 = vmax.f32 %v3053_v27, 0.0  ;;  %v9881_v4 = vld [vmem:[#allocation35_spill] sm:$0xff] }
 0x31b   :  { %v6418_v5 = vpop.f32.mrf.mxu0 }
 0x31c   :  { %v6419_v0 = vadd.f32 %v6418_v5, %v6417_v20  ;;  %v3636_v11 = vmax.f32 %v3598_v12, %v3608_v43  ;;  %v9360_v5 = vmax.f32 %v2757_v25, 0.0 }
 0x31d   :  { %v6420_v14 = vpop.f32.mrf.mxu0 }
 0x31e   :  { %v3613_v33 = vadd.f32 %v7161_v6, %v6419_v0  ;;  %v9352_v6 = vmax.f32 %v2758_v22, 0.0  ;;  %v9889_v22 = vld [vmem:[#allocation46_spill] sm:$0xff] }
 0x31f   :  { %v6421_v45 = vpop.f32.mrf.mxu0 }
 0x320   :  { %v6422_v61 = vadd.f32 %v6421_v45, %v6420_v14  ;;  %v3637_v60 = vmax.f32 %v3603_v7, %v3613_v33  ;;  %v4262_v14 = vld [vmem:[#allocation10] sm:$0xff]  ;;  %v9882_v33 = vld [vmem:[#allocation43_spill] sm:$0xff]  ;;  %v9884_v7 = vld [vmem:[#allocation36_spill] sm:$0xff] }
 0x321   :  { %v6423_v50 = vpop.f32.mrf.mxu0  ;;  %v4400_v45 = vld [vmem:[#allocation10 + $0x40] sm:$0xff] }
 0x322   :  { %v3618_v32 = vadd.f32 %v6422_v61, %v3617_v1 }
 0x323   :  { %v6424_v52 = vpop.f32.mrf.mxu0  ;;  %v7167_v63 = vpop.f32.mrf.mxu1 }
 0x324   :  { %v6425_v58 = vadd.f32 %v6424_v52, %v6423_v50  ;;  %v4265_v52 = vld [vmem:[#allocation10 + $0x18] sm:$0xff] }
 0x325   :  { %v6426_v47 = vpop.f32.mrf.mxu0  ;;  %v3627_v21 = vpop.f32.mrf.mxu1 }
 0x326   :  { %v3623_v54 = vadd.f32 %v7164_v38, %v6425_v58  ;;  %v4264_v58 = vld [vmem:[#allocation10 + $0x10] sm:$0xff] }
 0x327   :  { %v6427_v57 = vpop.f32.mrf.mxu0 }
 0x328   :  { %v6428_v34 = vadd.f32 %v6427_v57, %v6426_v47  ;;  %v3313_v57 = vadd.f32 %v6336_v40, %v3312_v59  ;;  %v3323_v47 = vadd.f32 %v6342_v28, %v3322_v3  ;;  %v3052_v3 = vadd.f32 %v9877_v51, %v9089_v19 }
 0x329   :  { %v6429_v15 = vpop.f32.mrf.mxu0 }
 0x32a   :  { %v3628_v16 = vadd.f32 %v6428_v34, %v3627_v21  ;;  %v3303_v34 = vadd.f32 %v9285_v37, %v9291_v39  ;;  %v3342_v21 = vmax.f32 %v3308_v26, %v3318_v53  ;;  %v3343_v36 = vmax.f32 %v3323_v47, %v3333_v29  ;;  %v9883_v26 = vld [vmem:[#allocation44_spill] sm:$0xff]  ;;  %v4269_v47 = vld [vmem:[#allocation10 + $0x38] sm:$0xff] }
 0x32b   :  { %v6430_v10 = vpop.f32.mrf.mxu0  ;;  %v9876_v39 = vmov 0.0   ;;  %v9346_v35 = vmax.f32 %v3052_v3, 0.0  ;;  %v9888_v3 = vld [vmem:[#allocation48_spill] sm:$0xff] }
 0x32c   :  { %v3638_v31 = vmax.f32 %v3618_v32, %v3628_v16  ;;  %v6431_v24 = vadd.f32 %v6430_v10, %v6429_v15  ;;  %v3341_v0 = vmax.f32 %v3303_v34, %v3313_v57  ;;  %v3346_v61 = vmax.f32 %v3342_v21, %v3344_v49  ;;  %v4267_v10 = vld [vmem:[#allocation10 + $0x28] sm:$0xff] }
 0x32e   :  { %v3633_v9 = vadd.f32 %v7167_v63, %v6431_v24  ;;  %v3640_v55 = vmax.f32 %v3636_v11, %v3638_v31  ;;  %v3345_v40 = vmax.f32 %v3341_v0, %v3343_v36  ;;  %v3348_v43 = vadd.f32 %v3346_v61, %v9089_v19  ;;  %v9880_v63 = vld [vmem:[#allocation33_spill] sm:$0xff]  ;;  %v4266_v31 = vld [vmem:[#allocation10 + $0x20] sm:$0xff]  ;;  %v4268_v11 = vld [vmem:[#allocation10 + $0x30] sm:$0xff] }
 0x330   :  { %v3639_v17 = vmax.f32 %v3623_v54, %v3633_v9  ;;  %v3642_v46 = vadd.f32 %v3640_v55, %v9089_v19  ;;  %v3347_v37 = vadd.f32 %v3345_v40, %v9089_v19  ;;  %v9316_v59 = vmax.f32 %v3348_v43, 0.0  ;;  %v9885_v9 = vld [vmem:[#allocation42_spill] sm:$0xff] }
 0x332   :  { %v3641_v15 = vmax.f32 %v3637_v60, %v3639_v17  ;;  %v9296_v32 = vpop.f32.mrf.mxu0  ;;  %v9306_v2 = vmax.f32 %v3642_v46, 0.0  ;;  %v9326_v23 = vmax.f32 %v3347_v37, 0.0 }
 0x334   :  { %v3643_v41 = vadd.f32 %v3641_v15, %v9089_v19  ;;  %v9300_v28 = vpop.f32.mrf.mxu0  ;;  %v9886_v15 = vld [vmem:[#allocation45_spill] sm:$0xff] }
 0x335   :  { %v6490_v21 = vadd.f32 %v9300_v28, %v9296_v32 }
 0x336   :  { %v9303_v56 = vmax.f32 %v3643_v41, 0.0  ;;  %v9887_v41 = vld [vmem:[#allocation34_spill] sm:$0xff] }
 0x338   :  { %v9308_v18 = vpop.f32.mrf.mxu0  ;;  %4332 = vmatpush2.msra.mxu0 %v9303_v56  ;;  %4469 = vmatpush2.msra.mxu1 %v9303_v56 }
 0x339   :  { %4333 = vmatprep.subr.mxu0 %v9876_v39  ;;  %4470 = vmatprep.subr.mxu1 %v9876_v39 }
 0x33a   :  { %v9318_v48 = vpop.f32.mrf.mxu0  ;;  %4334 = vmatpush2.msra.mxu0 %v9306_v2  ;;  %4471 = vmatpush2.msra.mxu1 %v9306_v2 }
 0x33b   :  { %4335 = vmatprep.subr.mxu0 %v9876_v39  ;;  %4472 = vmatprep.subr.mxu1 %v9876_v39  ;;  %v6493_v36 = vadd.f32 %v9318_v48, %v9308_v18 }
 0x33c   :  { %4336 = vmatpush2.msra.mxu0 %v9316_v59  ;;  %4473 = vmatpush2.msra.mxu1 %v9316_v59 }
 0x33d   :  { %v9330_v62 = vpop.f32.mrf.mxu0  ;;  %4337 = vmatprep.subr.mxu0 %v9876_v39  ;;  %4474 = vmatprep.subr.mxu1 %v9876_v39 }
 0x33e   :  { %4338 = vmatpush2.msra.mxu0 %v9326_v23  ;;  %4475 = vmatpush2.msra.mxu1 %v9326_v23 }
 0x33f   :  { %v9340_v44 = vpop.f32.mrf.mxu0  ;;  %4339 = vmatprep.subr.mxu0 %v9876_v39  ;;  %4476 = vmatprep.subr.mxu1 %v9876_v39 }
 0x340   :  { %4340 = vmatpush2.msra.mxu0 %v9336_v13  ;;  %4477 = vmatpush2.msra.mxu1 %v9336_v13  ;;  %v6496_v17 = vadd.f32 %v9340_v44, %v9330_v62 }
 0x341   :  { %4341 = vmatprep.subr.mxu0 %v9876_v39  ;;  %4478 = vmatprep.subr.mxu1 %v9876_v39 }
 0x342   :  { %v9354_v20 = vpop.f32.mrf.mxu0  ;;  %4342 = vmatpush2.msra.mxu0 %v9346_v35  ;;  %4479 = vmatpush2.msra.mxu1 %v9346_v35 }
 0x343   :  { %4343 = vmatprep.subr.mxu0 %v9876_v39  ;;  %4480 = vmatprep.subr.mxu1 %v9876_v39 }
 0x344   :  { %v6498_v30 = vpop.f32.mrf.mxu0  ;;  %4344 = vmatpush2.msra.mxu0 %v9352_v6  ;;  %4481 = vmatpush2.msra.mxu1 %v9352_v6  ;;  %v9364_v38 = vpop.f32.mrf.mxu1 }
 0x345   :  { %4345 = vmatprep.subr.mxu0 %v9876_v39  ;;  %4482 = vmatprep.subr.mxu1 %v9876_v39  ;;  %v6499_v60 = vadd.f32 %v6498_v30, %v9354_v20  ;;  %v3898_v28 = vadd.f32 %v9364_v38, %v6493_v36  ;;  %v4402_v36 = vld [vmem:[#allocation10 + $0x50] sm:$0xff] }
 0x346   :  { %4346 = vmatpush2.msra.mxu0 %v9360_v5  ;;  %4483 = vmatpush2.msra.mxu1 %v9360_v5  ;;  %v9370_v50 = vpop.f32.mrf.mxu1 }
 0x347   :  { %4348 = vmatmul.mubr.f32.vlgmr.msra.gmra.mxu0 %v4262_v14  ;;  %4556 = vmatprep.subr.mxu0 %v9876_v39  ;;  %v6500_v1 = vpop.f32.mrf.mxu0  ;;  %v3893_v43 = vadd.f32 %v6490_v21, %v9370_v50  ;;  %v9890_v14 = vld [vmem:[#allocation39_spill] sm:$0xff]  ;;  %v9891_v50 = vld [vmem:[#allocation41_spill] sm:$0xff] }
 0x348   :  { %4692 = vmatprep.subr.mxu1 %v9876_v39  ;;  %4485 = vmatmul.mubr.f32.vlgmr.msra.gmra.mxu1 %v4400_v45 }
 0x349   :  { %4557 = vmatpush1.msra.mxu0 %v9880_v63  ;;  %4693 = vmatpush1.msra.mxu1 %v9352_v6  ;;  %v6501_v16 = vpop.f32.mrf.mxu0 }
 0x34a   :  { %4558 = vmatprep.subr.mxu0 %v9876_v39  ;;  %4694 = vmatprep.subr.mxu1 %v9876_v39  ;;  %v6502_v0 = vadd.f32 %v6501_v16, %v6500_v1  ;;  %v9892_v16 = vld [vmem:[#allocation37_spill] sm:$0xff] }
 0x34b   :  { %v7205_v53 = vpop.f32.mrf.mxu1  ;;  %5459 = vmatprep.mubr.msk.f32.mxu0 %vm4270_vm0, %v4265_v52  ;;  %4559 = vmatpush1.msra.mxu0 %v9881_v4 }
 0x34c   :  { %4695 = vmatpush1.msra.mxu1 %v9360_v5  ;;  %4353 = vmatmul.mubr.f32.gmra.mxu0 %v4264_v58  ;;  %v3908_v37 = vadd.f32 %v7205_v53, %v6499_v60 }
 0x34d   :  { %v3902_v29 = vpop.f32.mrf.mxu1  ;;  %4560 = vmatprep.subr.mxu0 %v9876_v39  ;;  %4696 = vmatprep.subr.mxu1 %v9876_v39  ;;  %v6503_v12 = vpop.f32.mrf.mxu0 }
 0x34e   :  { %4561 = vmatpush1.msra.mxu0 %v9882_v33  ;;  %4697 = vmatpush1.msra.mxu1 %v9880_v63  ;;  %v3903_v18 = vadd.f32 %v6496_v17, %v3902_v29  ;;  %v3932_v44 = vmax.f32 %v3898_v28, %v3908_v37  ;;  %v9893_v29 = vld [vmem:[#allocation38_spill] sm:$0xff] }
 0x34f   :  { %4562 = vmatprep.subr.mxu0 %v9876_v39  ;;  %4698 = vmatprep.subr.mxu1 %v9876_v39  ;;  %v6504_v24 = vpop.f32.mrf.mxu0  ;;  %v4404_v17 = vld [vmem:[#allocation10 + $0x60] sm:$0xff] }
 0x350   :  { %5460 = vmatprep.mubr.msk.f32.mxu0 %vm4270_vm0, %v4267_v10  ;;  %4563 = vmatpush1.msra.mxu0 %v9883_v26  ;;  %v6505_v32 = vadd.f32 %v6504_v24, %v6503_v12  ;;  %v3931_v20 = vmax.f32 %v3893_v43, %v3903_v18  ;;  %v9894_v24 = vld [vmem:[#allocation32_spill] sm:$0xff]  ;;  %v4537_v43 = vld [vmem:[#allocation10 + $0x88] sm:$0xff]  ;;  %v4536_v18 = vld [vmem:[#allocation10 + $0x80] sm:$0xff] }
 0x351   :  { %v7208_v57 = vpop.f32.mrf.mxu1  ;;  %4699 = vmatpush1.msra.mxu1 %v9881_v4  ;;  %4358 = vmatmul.mubr.f32.gmra.mxu0 %v4266_v31 }
 0x352   :  { %4564 = vmatprep.subr.mxu0 %v9876_v39  ;;  %4700 = vmatprep.subr.mxu1 %v9876_v39  ;;  %v3918_v62 = vadd.f32 %v7208_v57, %v6505_v32  ;;  %v4407_v32 = vld [vmem:[#allocation10 + $0x78] sm:$0xff] }
 0x353   :  { %v3912_v49 = vpop.f32.mrf.mxu1  ;;  %4565 = vmatpush1.msra.mxu0 %v9884_v7  ;;  %4701 = vmatpush1.msra.mxu1 %v9882_v33  ;;  %v6506_v54 = vpop.f32.mrf.mxu0 }
 0x354   :  { %4566 = vmatprep.subr.mxu0 %v9876_v39  ;;  %4702 = vmatprep.subr.mxu1 %v9876_v39  ;;  %v3913_v27 = vadd.f32 %v6502_v0, %v3912_v49 }
 0x355   :  { %5461 = vmatprep.mubr.msk.f32.mxu0 %vm4270_vm0, %v4269_v47  ;;  %4567 = vmatpush1.msra.mxu0 %v9885_v9  ;;  %v6507_v34 = vpop.f32.mrf.mxu0  ;;  %v9895_v47 = vld [vmem:[#allocation31_spill] sm:$0xff] }
 0x356   :  { %4703 = vmatpush1.msra.mxu1 %v9883_v26  ;;  %4363 = vmatmul.mubr.f32.gmra.mxu0 %v4268_v11  ;;  %v6508_v61 = vadd.f32 %v6507_v34, %v6506_v54  ;;  %v4403_v34 = vld [vmem:[#allocation10 + $0x58] sm:$0xff] }
 0x357   :  { %v7211_v55 = vpop.f32.mrf.mxu1  ;;  %4568 = vmatprep.subr.mxu0 %v9876_v39  ;;  %4704 = vmatprep.subr.mxu1 %v9876_v39 }
 0x358   :  { %4569 = vmatpush1.msra.mxu0 %v9886_v15  ;;  %4705 = vmatpush1.msra.mxu1 %v9884_v7 }
 0x359   :  { %v3922_v40 = vpop.f32.mrf.mxu1  ;;  %4570 = vmatprep.subr.mxu0 %v9876_v39  ;;  %4706 = vmatprep.subr.mxu1 %v9876_v39  ;;  %v6509_v46 = vpop.f32.mrf.mxu0 }
 0x35a   :  { %4571 = vmatpush1.msra.mxu0 %v9887_v41  ;;  %4707 = vmatpush1.msra.mxu1 %v9885_v9  ;;  %v3923_v48 = vadd.f32 %v6508_v61, %v3922_v40 }
 0x35b   :  { %4572 = vmatprep.subr.mxu0 %v9876_v39  ;;  %4708 = vmatprep.subr.mxu1 %v9876_v39  ;;  %v6510_v51 = vpop.f32.mrf.mxu0 }
 0x35c   :  { %4573 = vmatpush1.msra.mxu0 %v9888_v3  ;;  %4709 = vmatpush1.msra.mxu1 %v9886_v15  ;;  %v6511_v8 = vadd.f32 %v6510_v51, %v6509_v46  ;;  %v3933_v30 = vmax.f32 %v3913_v27, %v3923_v48  ;;  %v4406_v46 = vld [vmem:[#allocation10 + $0x70] sm:$0xff]  ;;  %v4673_v27 = vld [vmem:[#allocation10 + $0xc8] sm:$0xff]  ;;  %v4672_v51 = vld [vmem:[#allocation10 + $0xc0] sm:$0xff] }
 0x35d   :  { %4574 = vmatprep.subr.mxu0 %v9876_v39  ;;  %4710 = vmatprep.subr.mxu1 %v9876_v39 }
 0x35e   :  { %4575 = vmatpush1.msra.mxu0 %v9889_v22  ;;  %4711 = vmatpush1.msra.mxu1 %v9887_v41  ;;  %v3928_v42 = vadd.f32 %v7211_v55, %v6511_v8  ;;  %v9424_v25 = vpop.f32.mrf.mxu0  ;;  %v3935_v58 = vmax.f32 %v3931_v20, %v3933_v30  ;;  %v4405_v55 = vld [vmem:[#allocation10 + $0x68] sm:$0xff]  ;;  %v4539_v8 = vld [vmem:[#allocation10 + $0x98] sm:$0xff] }
 0x35f   :  { %4576 = vmatprep.subr.mxu0 %v9876_v39  ;;  %4712 = vmatprep.subr.mxu1 %v9876_v39 }
 0x360   :  { %4577 = vmatpush1.msra.mxu0 %v9890_v14  ;;  %4713 = vmatpush1.msra.mxu1 %v9888_v3  ;;  %v3934_v38 = vmax.f32 %v3918_v62, %v3928_v42  ;;  %v9430_v45 = vpop.f32.mrf.mxu0  ;;  %v3937_v31 = vadd.f32 %v3935_v58, %v9089_v19  ;;  %v4538_v42 = vld [vmem:[#allocation10 + $0x90] sm:$0xff] }
 0x361   :  { %4578 = vmatprep.subr.mxu0 %v9876_v39  ;;  %4714 = vmatprep.subr.mxu1 %v9876_v39 }
 0x362   :  { %4579 = vmatpush1.msra.mxu0 %v9891_v50  ;;  %4715 = vmatpush1.msra.mxu1 %v9889_v22  ;;  %v3936_v1 = vmax.f32 %v3932_v44, %v3934_v38  ;;  %v9436_v52 = vpop.f32.mrf.mxu0  ;;  %v9468_v54 = vmax.f32 %v3937_v31, 0.0  ;;  %v4541_v38 = vld [vmem:[#allocation10 + $0xa8] sm:$0xff]  ;;  %v4542_v31 = vld [vmem:[#allocation10 + $0xb0] sm:$0xff] }
 0x363   :  { %4580 = vmatprep.subr.mxu0 %v9876_v39  ;;  %4716 = vmatprep.subr.mxu1 %v9876_v39 }
 0x364   :  { %4581 = vmatpush1.msra.mxu0 %v9892_v16  ;;  %4717 = vmatpush1.msra.mxu1 %v9890_v14  ;;  %v9442_v53 = vpop.f32.mrf.mxu0  ;;  %v3938_v10 = vadd.f32 %v3936_v1, %v9089_v19  ;;  %v4540_v1 = vld [vmem:[#allocation10 + $0xa0] sm:$0xff] }
 0x365   :  { %4582 = vmatprep.subr.mxu0 %v9876_v39  ;;  %4718 = vmatprep.subr.mxu1 %v9876_v39 }
 0x366   :  { %4583 = vmatpush1.msra.mxu0 %v9893_v29  ;;  %4719 = vmatpush1.msra.mxu1 %v9891_v50  ;;  %v9449_v12 = vpop.f32.mrf.mxu0  ;;  %v9462_v49 = vmax.f32 %v3938_v10, 0.0 }
 0x367   :  { %4584 = vmatprep.subr.mxu0 %v9876_v39  ;;  %4720 = vmatprep.subr.mxu1 %v9876_v39 }
 0x368   :  { %4585 = vmatpush1.msra.mxu0 %v9894_v24  ;;  %4721 = vmatpush1.msra.mxu1 %v9892_v16  ;;  %v9456_v57 = vpop.f32.mrf.mxu0  ;;  %v6573_v24 = vadd.f32 %v9442_v53, %v9436_v52 }
 0x369   :  { %4586 = vmatprep.subr.mxu0 %v9876_v39  ;;  %4722 = vmatprep.subr.mxu1 %v9876_v39  ;;  %v6576_v52 = vadd.f32 %v9456_v57, %v9449_v12 }
 0x36a   :  { %4587 = vmatpush1.msra.mxu0 %v9895_v47  ;;  %4723 = vmatpush1.msra.mxu1 %v9893_v29  ;;  %v9464_v11 = vpop.f32.mrf.mxu0  ;;  %v4543_v29 = vld [vmem:[#allocation10 + $0xb8] sm:$0xff] }
 0x36b   :  { %4604 = vmatprep.subr.mxu0 %v9876_v39  ;;  %4740 = vmatprep.subr.mxu1 %v9876_v39 }
 0x36c   :  { %4605 = vmatpush2.msra.mxu0 %v9303_v56  ;;  %4741 = vmatpush2.msra.mxu1 %v9462_v49  ;;  %v9472_v21 = vpop.f32.mrf.mxu0 }
 0x36d   :  { %4606 = vmatprep.subr.mxu0 %v9876_v39  ;;  %4742 = vmatprep.subr.mxu1 %v9876_v39  ;;  %v9493_v61 = vpop.f32.mrf.mxu1 }
 0x36e   :  { %4607 = vmatpush2.msra.mxu0 %v9306_v2  ;;  %4743 = vmatpush2.msra.mxu1 %v9468_v54 }
 0x36f   :  { %v9478_v60 = vpop.f32.mrf.mxu0  ;;  %5463 = vmatprep.mubr.msk.f32.mxu1 %vm4270_vm0, %v4403_v34  ;;  %4608 = vmatprep.subr.mxu0 %v9876_v39  ;;  %v9504_v28 = vpop.f32.mrf.mxu1  ;;  %v6579_v34 = vadd.f32 %v9472_v21, %v9464_v11  ;;  %v4193_v21 = vadd.f32 %v9493_v61, %v6573_v24  ;;  %v4947_v24 = vld [vmem:[#allocation10 + $0x158] sm:$0xff] }
 0x370   :  { %4744 = vmatprep.subr.mxu1 %v9876_v39  ;;  %4490 = vmatmul.mubr.f32.gmra.mxu1 %v4402_v36 }
 0x371   :  { %4609 = vmatpush2.msra.mxu0 %v9316_v59  ;;  %4745 = vmatpush2.msra.mxu1 %v9303_v56  ;;  %v9487_v0 = vpop.f32.mrf.mxu0  ;;  %v9513_v48 = vpop.f32.mrf.mxu1 }
 0x372   :  { %4610 = vmatprep.subr.mxu0 %v9876_v39  ;;  %4746 = vmatprep.subr.mxu1 %v9876_v39  ;;  %v6582_v53 = vadd.f32 %v9487_v0, %v9478_v60 }
 0x373   :  { %4611 = vmatpush2.msra.mxu0 %v9326_v23  ;;  %4747 = vmatpush2.msra.mxu1 %v9306_v2  ;;  %v9498_v40 = vpop.f32.mrf.mxu0  ;;  %v9521_v44 = vpop.f32.mrf.mxu1 }
 0x374   :  { %5464 = vmatprep.mubr.msk.f32.mxu1 %vm4270_vm0, %v4405_v55  ;;  %4612 = vmatprep.subr.mxu0 %v9876_v39  ;;  %v4198_v57 = vadd.f32 %v6576_v52, %v9521_v44  ;;  %v4677_v44 = vld [vmem:[#allocation10 + $0xe8] sm:$0xff] }
 0x375   :  { %4748 = vmatprep.subr.mxu1 %v9876_v39  ;;  %4495 = vmatmul.mubr.f32.gmra.mxu1 %v4404_v17  ;;  %v6584_v37 = vpop.f32.mrf.mxu0  ;;  %v7252_v30 = vpop.f32.mrf.mxu1  ;;  %v6570_v17 = vadd.f32 %v9430_v45, %v9424_v25  ;;  %v4203_v25 = vadd.f32 %v9513_v48, %v6579_v34  ;;  %v4949_v34 = vld [vmem:[#allocation10 + $0x168] sm:$0xff] }
 0x376   :  { %4613 = vmatpush2.msra.mxu0 %v9336_v13  ;;  %4749 = vmatpush2.msra.mxu1 %v9316_v59  ;;  %v6585_v36 = vadd.f32 %v6584_v37, %v9498_v40 }
 0x377   :  { %4614 = vmatprep.subr.mxu0 %v9876_v39  ;;  %4750 = vmatprep.subr.mxu1 %v9876_v39  ;;  %v6586_v62 = vpop.f32.mrf.mxu0  ;;  %v4207_v16 = vpop.f32.mrf.mxu1  ;;  %v4188_v12 = vadd.f32 %v6570_v17, %v9504_v28  ;;  %v4227_v61 = vmax.f32 %v4193_v21, %v4203_v25 }
 0x378   :  { %4615 = vmatpush2.msra.mxu0 %v9346_v35  ;;  %4751 = vmatpush2.msra.mxu1 %v9326_v23  ;;  %v4213_v45 = vadd.f32 %v7252_v30, %v6585_v36  ;;  %v4208_v60 = vadd.f32 %v6582_v53, %v4207_v16  ;;  %v4808_v30 = vld [vmem:[#allocation10 + $0x100] sm:$0xff]  ;;  %v4945_v16 = vld [vmem:[#allocation10 + $0x148] sm:$0xff] }
 0x379   :  { %5465 = vmatprep.mubr.msk.f32.mxu1 %vm4270_vm0, %v4407_v32  ;;  %4616 = vmatprep.subr.mxu0 %v9876_v39  ;;  %v6587_v20 = vpop.f32.mrf.mxu0  ;;  %v7255_v47 = vpop.f32.mrf.mxu1  ;;  %v4226_v28 = vmax.f32 %v4188_v12, %v4198_v57  ;;  %v5081_v36 = vld [vmem:[#allocation10 + $0x188] sm:$0xff] }
 0x37a   :  { %4752 = vmatprep.subr.mxu1 %v9876_v39  ;;  %4500 = vmatmul.mubr.f32.gmra.mxu1 %v4406_v46  ;;  %v6588_v11 = vadd.f32 %v6587_v20, %v6586_v62  ;;  %v4809_v20 = vld [vmem:[#allocation10 + $0x108] sm:$0xff] }
 0x37b   :  { %4617 = vmatpush2.msra.mxu0 %v9352_v6  ;;  %4753 = vmatpush2.msra.mxu1 %v9336_v13  ;;  %v6589_v58 = vpop.f32.mrf.mxu0  ;;  %v4217_v32 = vpop.f32.mrf.mxu1 }
 0x37c   :  { %4618 = vmatprep.subr.mxu0 %v9876_v39  ;;  %4754 = vmatprep.subr.mxu1 %v9876_v39  ;;  %v4218_v0 = vadd.f32 %v6588_v11, %v4217_v32 }
 0x37d   :  { %4619 = vmatpush2.msra.mxu0 %v9360_v5  ;;  %5466 = vmatprep.mubr.msk.f32.mxu0 %vm4270_vm0, %v4537_v43  ;;  %v6590_v10 = vpop.f32.mrf.mxu0 }
 0x37e   :  { %4755 = vmatpush2.msra.mxu1 %v9346_v35  ;;  %4621 = vmatmul.mubr.f32.vlgmr.msra.gmra.mxu0 %v4536_v18  ;;  %v6591_v55 = vadd.f32 %v6590_v10, %v6589_v58  ;;  %v4228_v43 = vmax.f32 %v4208_v60, %v4218_v0  ;;  %v4811_v58 = vld [vmem:[#allocation10 + $0x118] sm:$0xff]  ;;  %v4813_v10 = vld [vmem:[#allocation10 + $0x128] sm:$0xff] }
 0x37f   :  { %5470 = vmatprep.mubr.msk.f32.mxu1 %vm4270_vm0, %v4673_v27  ;;  %4828 = vmatprep.subr.mxu0 %v9876_v39 }
 0x380   :  { %4964 = vmatprep.subr.mxu1 %v9876_v39  ;;  %4757 = vmatmul.mubr.f32.vlgmr.msra.gmra.mxu1 %v4672_v51  ;;  %v4223_v40 = vadd.f32 %v7255_v47, %v6591_v55  ;;  %v4230_v18 = vmax.f32 %v4226_v28, %v4228_v43  ;;  %v4815_v47 = vld [vmem:[#allocation10 + $0x138] sm:$0xff] }
 0x381   :  { %4829 = vmatpush1.msra.mxu0 %v9336_v13  ;;  %4965 = vmatpush1.msra.mxu1 %v9336_v13  ;;  %v4951_v55 = vld [vmem:[#allocation10 + $0x178] sm:$0xff] }
 0x382   :  { %4830 = vmatprep.subr.mxu0 %v9876_v39  ;;  %4966 = vmatprep.subr.mxu1 %v9876_v39  ;;  %v4229_v46 = vmax.f32 %v4213_v45, %v4223_v40  ;;  %v4232_v48 = vadd.f32 %v4230_v18, %v9089_v19  ;;  %v7479_v40 = vmov 1.0  }
 0x383   :  { %5467 = vmatprep.mubr.msk.f32.mxu0 %vm4270_vm0, %v4539_v8  ;;  %4831 = vmatpush1.msra.mxu0 %v9346_v35  ;;  %v4674_v8 = vld [vmem:[#allocation10 + $0xd0] sm:$0xff] }
 0x384   :  { %4967 = vmatpush1.msra.mxu1 %v9346_v35  ;;  %4626 = vmatmul.mubr.f32.gmra.mxu0 %v4538_v42  ;;  %v4231_v37 = vmax.f32 %v4227_v61, %v4229_v46  ;;  %v9609_v62 = vmax.f32 %v4232_v48, 0.0  ;;  %v4676_v42 = vld [vmem:[#allocation10 + $0xe0] sm:$0xff] }
 0x385   :  { %4832 = vmatprep.subr.mxu0 %v9876_v39  ;;  %4968 = vmatprep.subr.mxu1 %v9876_v39 }
 0x386   :  { %4833 = vmatpush1.msra.mxu0 %v9352_v6  ;;  %4969 = vmatpush1.msra.mxu1 %v9352_v6  ;;  %v4233_v27 = vadd.f32 %v4231_v37, %v9089_v19  ;;  %v4675_v19 = vld [vmem:[#allocation10 + $0xd8] sm:$0xff] }
 0x387   :  { %4834 = vmatprep.subr.mxu0 %v9876_v39  ;;  %4970 = vmatprep.subr.mxu1 %v9876_v39 }
 0x388   :  { %5468 = vmatprep.mubr.msk.f32.mxu0 %vm4270_vm0, %v4541_v38  ;;  %4835 = vmatpush1.msra.mxu0 %v9360_v5  ;;  %v9605_v51 = vmax.f32 %v4233_v27, 0.0  ;;  %v4679_v38 = vld [vmem:[#allocation10 + $0xf8] sm:$0xff] }
 0x389   :  { %4971 = vmatpush1.msra.mxu1 %v9360_v5  ;;  %4631 = vmatmul.mubr.f32.gmra.mxu0 %v4540_v1  ;;  %v4678_v1 = vld [vmem:[#allocation10 + $0xf0] sm:$0xff] }
 0x38a   :  { %4836 = vmatprep.subr.mxu0 %v9876_v39  ;;  %4972 = vmatprep.subr.mxu1 %v9876_v39 }
 0x38b   :  { %4837 = vmatpush1.msra.mxu0 %v9880_v63  ;;  %4973 = vmatpush1.msra.mxu1 %v9880_v63 }
 0x38c   :  { %4838 = vmatprep.subr.mxu0 %v9876_v39  ;;  %4974 = vmatprep.subr.mxu1 %v9876_v39 }
 0x38d   :  { %5469 = vmatprep.mubr.msk.f32.mxu0 %vm4270_vm0, %v4543_v29  ;;  %4839 = vmatpush1.msra.mxu0 %v9881_v4  ;;  %v4810_v29 = vld [vmem:[#allocation10 + $0x110] sm:$0xff] }
 0x38e   :  { %4975 = vmatpush1.msra.mxu1 %v9881_v4  ;;  %4636 = vmatmul.mubr.f32.gmra.mxu0 %v4542_v31  ;;  %v4944_v31 = vld [vmem:[#allocation10 + $0x140] sm:$0xff] }
 0x38f   :  { %4840 = vmatprep.subr.mxu0 %v9876_v39  ;;  %4976 = vmatprep.subr.mxu1 %v9876_v39 }
 0x390   :  { %4841 = vmatpush1.msra.mxu0 %v9882_v33  ;;  %4977 = vmatpush1.msra.mxu1 %v9882_v33 }
 0x391   :  { %4842 = vmatprep.subr.mxu0 %v9876_v39  ;;  %4978 = vmatprep.subr.mxu1 %v9876_v39 }
 0x392   :  { %4843 = vmatpush1.msra.mxu0 %v9883_v26  ;;  %4979 = vmatpush1.msra.mxu1 %v9883_v26 }
 0x393   :  { %4844 = vmatprep.subr.mxu0 %v9876_v39  ;;  %4980 = vmatprep.subr.mxu1 %v9876_v39 }
 0x394   :  { %4845 = vmatpush1.msra.mxu0 %v9884_v7  ;;  %4981 = vmatpush1.msra.mxu1 %v9884_v7 }
 0x395   :  { %4846 = vmatprep.subr.mxu0 %v9876_v39  ;;  %4982 = vmatprep.subr.mxu1 %v9876_v39 }
 0x396   :  { %4847 = vmatpush1.msra.mxu0 %v9885_v9  ;;  %4983 = vmatpush1.msra.mxu1 %v9885_v9 }
 0x397   :  { %4848 = vmatprep.subr.mxu0 %v9876_v39  ;;  %4984 = vmatprep.subr.mxu1 %v9876_v39 }
 0x398   :  { %4849 = vmatpush1.msra.mxu0 %v9886_v15  ;;  %4985 = vmatpush1.msra.mxu1 %v9886_v15 }
 0x399   :  { %4850 = vmatprep.subr.mxu0 %v9876_v39  ;;  %4986 = vmatprep.subr.mxu1 %v9876_v39 }
 0x39a   :  { %4851 = vmatpush1.msra.mxu0 %v9887_v41  ;;  %4987 = vmatpush1.msra.mxu1 %v9887_v41 }
 0x39b   :  { %4852 = vmatprep.subr.mxu0 %v9876_v39  ;;  %4988 = vmatprep.subr.mxu1 %v9876_v39 }
 0x39c   :  { %4853 = vmatpush1.msra.mxu0 %v9888_v3  ;;  %4989 = vmatpush1.msra.mxu1 %v9888_v3 }
 0x39d   :  { %4854 = vmatprep.subr.mxu0 %v9876_v39  ;;  %4990 = vmatprep.subr.mxu1 %v9876_v39 }
 0x39e   :  { %4855 = vmatpush1.msra.mxu0 %v9889_v22  ;;  %4991 = vmatpush1.msra.mxu1 %v9889_v22 }
 0x39f   :  { %4856 = vmatprep.subr.mxu0 %v9876_v39  ;;  %4992 = vmatprep.subr.mxu1 %v9876_v39 }
 0x3a0   :  { %4857 = vmatpush1.msra.mxu0 %v9890_v14  ;;  %4993 = vmatpush1.msra.mxu1 %v9890_v14 }
 0x3a1   :  { %4858 = vmatprep.subr.mxu0 %v9876_v39  ;;  %4994 = vmatprep.subr.mxu1 %v9876_v39 }
 0x3a2   :  { %4859 = vmatpush1.msra.mxu0 %v9891_v50  ;;  %4995 = vmatpush1.msra.mxu1 %v9891_v50 }
 0x3a3   :  { %4876 = vmatprep.subr.mxu0 %v9876_v39  ;;  %5012 = vmatprep.subr.mxu1 %v9876_v39 }
 0x3a4   :  { %4877 = vmatpush2.msra.mxu0 %v9605_v51  ;;  %5013 = vmatpush2.msra.mxu1 %v9605_v51 }
 0x3a5   :  { %4878 = vmatprep.subr.mxu0 %v9876_v39  ;;  %5014 = vmatprep.subr.mxu1 %v9876_v39 }
 0x3a6   :  { %4879 = vmatpush2.msra.mxu0 %v9609_v62  ;;  %5015 = vmatpush2.msra.mxu1 %v9609_v62 }
 0x3a7   :  { %4880 = vmatprep.subr.mxu0 %v9876_v39  ;;  %5016 = vmatprep.subr.mxu1 %v9876_v39 }
 0x3a8   :  { %4881 = vmatpush2.msra.mxu0 %v9462_v49  ;;  %5017 = vmatpush2.msra.mxu1 %v9462_v49 }
 0x3a9   :  { %4882 = vmatprep.subr.mxu0 %v9876_v39  ;;  %5018 = vmatprep.subr.mxu1 %v9876_v39 }
 0x3aa   :  { %4883 = vmatpush2.msra.mxu0 %v9468_v54  ;;  %5019 = vmatpush2.msra.mxu1 %v9468_v54 }
 0x3ab   :  { %4884 = vmatprep.subr.mxu0 %v9876_v39  ;;  %5020 = vmatprep.subr.mxu1 %v9876_v39 }
 0x3ac   :  { %4885 = vmatpush2.msra.mxu0 %v9303_v56  ;;  %5021 = vmatpush2.msra.mxu1 %v9303_v56 }
 0x3ad   :  { %5471 = vmatprep.mubr.msk.f32.mxu1 %vm4270_vm0, %v4675_v19  ;;  %4886 = vmatprep.subr.mxu0 %v9876_v39 }
 0x3ae   :  { %5022 = vmatprep.subr.mxu1 %v9876_v39  ;;  %4762 = vmatmul.mubr.f32.gmra.mxu1 %v4674_v8 }
 0x3af   :  { %4887 = vmatpush2.msra.mxu0 %v9306_v2  ;;  %5023 = vmatpush2.msra.mxu1 %v9306_v2 }
 0x3b0   :  { %4888 = vmatprep.subr.mxu0 %v9876_v39  ;;  %5024 = vmatprep.subr.mxu1 %v9876_v39 }
 0x3b1   :  { %4889 = vmatpush2.msra.mxu0 %v9316_v59  ;;  %5025 = vmatpush2.msra.mxu1 %v9316_v59 }
 0x3b2   :  { %5472 = vmatprep.mubr.msk.f32.mxu1 %vm4270_vm0, %v4677_v44  ;;  %4890 = vmatprep.subr.mxu0 %v9876_v39 }
 0x3b3   :  { %5026 = vmatprep.subr.mxu1 %v9876_v39  ;;  %4767 = vmatmul.mubr.f32.gmra.mxu1 %v4676_v42 }
 0x3b4   :  { %4891 = vmatpush2.msra.mxu0 %v9326_v23  ;;  %5474 = vmatprep.mubr.msk.f32.mxu0 %vm4270_vm0, %v4809_v20 }
 0x3b5   :  { %5027 = vmatpush2.msra.mxu1 %v9326_v23  ;;  %4893 = vmatmul.mubr.f32.vlgmr.msra.gmra.mxu0 %v4808_v30 }
 0x3b6   :  { %5100 = vmatprep.subr.mxu0 %v9876_v39  ;;  %5473 = vmatprep.mubr.msk.f32.mxu1 %vm4270_vm0, %v4679_v38 }
 0x3b7   :  { %5101 = vmatpush1.msra.mxu0 %v9336_v13  ;;  %4772 = vmatmul.mubr.f32.gmra.mxu1 %v4678_v1  ;;  %v4812_v13 = vld [vmem:[#allocation10 + $0x120] sm:$0xff] }
 0x3b8   :  { %5102 = vmatprep.subr.mxu0 %v9876_v39  ;;  %5475 = vmatprep.mubr.msk.f32.mxu0 %vm4270_vm0, %v4811_v58 }
 0x3b9   :  { %5103 = vmatpush1.msra.mxu0 %v9346_v35  ;;  %5478 = vmatprep.mubr.msk.f32.mxu1 %vm4270_vm0, %v4945_v16  ;;  %v4946_v35 = vld [vmem:[#allocation10 + $0x150] sm:$0xff] }
 0x3ba   :  { %4898 = vmatmul.mubr.f32.gmra.mxu0 %v4810_v29  ;;  %5104 = vmatprep.subr.mxu0 %v9876_v39 }
 0x3bb   :  { %5105 = vmatpush1.msra.mxu0 %v9352_v6  ;;  %5476 = vmatprep.mubr.msk.f32.mxu0 %vm4270_vm0, %v4813_v10  ;;  %v4814_v6 = vld [vmem:[#allocation10 + $0x130] sm:$0xff] }
 0x3bc   :  { %5106 = vmatprep.subr.mxu0 %v9876_v39  ;;  %5029 = vmatmul.mubr.f32.vlgmr.msra.gmra.mxu1 %v4944_v31 }
 0x3bd   :  { %5107 = vmatpush1.msra.mxu0 %v9360_v5  ;;  %5479 = vmatprep.mubr.msk.f32.mxu1 %vm4270_vm0, %v4947_v24  ;;  %v4948_v5 = vld [vmem:[#allocation10 + $0x160] sm:$0xff] }
 0x3be   :  { %4903 = vmatmul.mubr.f32.gmra.mxu0 %v4812_v13  ;;  %5108 = vmatprep.subr.mxu0 %v9876_v39 }
 0x3bf   :  { %5109 = vmatpush1.msra.mxu0 %v9880_v63  ;;  %5477 = vmatprep.mubr.msk.f32.mxu0 %vm4270_vm0, %v4815_v47  ;;  %v4950_v63 = vld [vmem:[#allocation10 + $0x170] sm:$0xff] }
 0x3c0   :  { %5110 = vmatprep.subr.mxu0 %v9876_v39  ;;  %5034 = vmatmul.mubr.f32.gmra.mxu1 %v4946_v35 }
 0x3c1   :  { %5111 = vmatpush1.msra.mxu0 %v9881_v4  ;;  %5480 = vmatprep.mubr.msk.f32.mxu1 %vm4270_vm0, %v4949_v34  ;;  %v5080_v4 = vld [vmem:[#allocation10 + $0x180] sm:$0xff] }
 0x3c2   :  { %4908 = vmatmul.mubr.f32.gmra.mxu0 %v4814_v6  ;;  %5112 = vmatprep.subr.mxu0 %v9876_v39 }
 0x3c3   :  { %5113 = vmatpush1.msra.mxu0 %v9882_v33  ;;  %5482 = vmatprep.mubr.msk.f32.mxu0 %vm4270_vm0, %v5081_v36  ;;  %v5083_v33 = vld [vmem:[#allocation10 + $0x198] sm:$0xff] }
 0x3c4   :  { %5114 = vmatprep.subr.mxu0 %v9876_v39  ;;  %5039 = vmatmul.mubr.f32.gmra.mxu1 %v4948_v5 }
 0x3c5   :  { %5115 = vmatpush1.msra.mxu0 %v9883_v26  ;;  %5481 = vmatprep.mubr.msk.f32.mxu1 %vm4270_vm0, %v4951_v55  ;;  %v5082_v26 = vld [vmem:[#allocation10 + $0x190] sm:$0xff] }
 0x3c6   :  { %5116 = vmatprep.subr.mxu0 %v9876_v39  ;;  %7256 = vmatprep.subr.mxu1 %v9876_v39 }
 0x3c7   :  { %5117 = vmatpush1.msra.mxu0 %v9884_v7  ;;  %v5085_v7 = vld [vmem:[#allocation10 + $0x1a8] sm:$0xff]  ;;  %7257 = vmatpush3.msra.mxu1 %v7479_v40 }
 0x3c8   :  { %5118 = vmatprep.subr.mxu0 %v9876_v39  ;;  %5044 = vmatmul.mubr.f32.gmra.mxu1 %v4950_v63 }
 0x3c9   :  { %5119 = vmatpush1.msra.mxu0 %v9885_v9  ;;  %7258 = vmatprep.subr.mxu1 %v9876_v39 }
 0x3ca   :  { %5120 = vmatprep.subr.mxu0 %v9876_v39  ;;  %7272 = vmatprep.mubr.msk.f32.mxu1 %vm7480_vm1, %v9876_v39 }
 0x3cb   :  { %5121 = vmatpush1.msra.mxu0 %v9886_v15 }
 0x3cc   :  { %5122 = vmatprep.subr.mxu0 %v9876_v39 }
 0x3cd   :  { %5123 = vmatpush1.msra.mxu0 %v9887_v41 }
 0x3ce   :  { %5124 = vmatprep.subr.mxu0 %v9876_v39 }
 0x3cf   :  { %5125 = vmatpush1.msra.mxu0 %v9888_v3 }
 0x3d0   :  { %5126 = vmatprep.subr.mxu0 %v9876_v39 }
 0x3d1   :  { %5127 = vmatpush1.msra.mxu0 %v9889_v22 }
 0x3d2   :  { %5128 = vmatprep.subr.mxu0 %v9876_v39 }
 0x3d3   :  { %5129 = vmatpush1.msra.mxu0 %v9890_v14 }
 0x3d4   :  { %5130 = vmatprep.subr.mxu0 %v9876_v39 }
 0x3d5   :  { %5131 = vmatpush1.msra.mxu0 %v9891_v50 }
 0x3d6   :  { %5148 = vmatprep.subr.mxu0 %v9876_v39 }
 0x3d7   :  { %5149 = vmatpush2.msra.mxu0 %v9605_v51 }
 0x3d8   :  { %5150 = vmatprep.subr.mxu0 %v9876_v39 }
 0x3d9   :  { %5151 = vmatpush2.msra.mxu0 %v9609_v62 }
 0x3da   :  { %5152 = vmatprep.subr.mxu0 %v9876_v39 }
 0x3db   :  { %5153 = vmatpush2.msra.mxu0 %v9462_v49 }
 0x3dc   :  { %5154 = vmatprep.subr.mxu0 %v9876_v39 }
 0x3dd   :  { %5155 = vmatpush2.msra.mxu0 %v9468_v54 }
 0x3de   :  { %5156 = vmatprep.subr.mxu0 %v9876_v39 }
 0x3df   :  { %5157 = vmatpush2.msra.mxu0 %v9303_v56  ;;  %v5084_v56 = vld [vmem:[#allocation10 + $0x1a0] sm:$0xff] }
 0x3e0   :  { %5158 = vmatprep.subr.mxu0 %v9876_v39 }
 0x3e1   :  { %5159 = vmatpush2.msra.mxu0 %v9306_v2  ;;  %v5087_v2 = vld [vmem:[#allocation10 + $0x1b8] sm:$0xff] }
 0x3e2   :  { %5160 = vmatprep.subr.mxu0 %v9876_v39 }
 0x3e3   :  { %5161 = vmatpush2.msra.mxu0 %v9316_v59  ;;  %v5086_v59 = vld [vmem:[#allocation10 + $0x1b0] sm:$0xff] }
 0x3e4   :  { %5162 = vmatprep.subr.mxu0 %v9876_v39 }
 0x3e5   :  { %5163 = vmatpush2.msra.mxu0 %v9326_v23 }
 0x3e6   :  { %5165 = vmatmul.mubr.f32.vlgmr.msra.gmra.mxu0 %v5080_v4 }
 0x3e7   :  { %5483 = vmatprep.mubr.msk.f32.mxu0 %vm4270_vm0, %v5083_v33 }
 0x3ea   :  { %5170 = vmatmul.mubr.f32.gmra.mxu0 %v5082_v26 }
 0x3eb   :  { %5484 = vmatprep.mubr.msk.f32.mxu0 %vm4270_vm0, %v5085_v7 }
 0x3ee   :  { %5175 = vmatmul.mubr.f32.gmra.mxu0 %v5084_v56 }
 0x3ef   :  { %5485 = vmatprep.mubr.msk.f32.mxu0 %vm4270_vm0, %v5087_v2 }
 0x3f2   :  { %5180 = vmatmul.mubr.f32.gmra.mxu0 %v5086_v59 }
 0x407   :  { %v4349_v9 = vpop.f32.mrf.mxu0 }
 0x408   :  { %v4486_v15 = vpop.f32.mrf.mxu1 }
 0x409   :  { %v4351_v41 = vpop.f32.mrf.mxu0 }
 0x40a   :  { %v4488_v3 = vpop.f32.mrf.mxu1 }
 0x40c   :  { %v4354_v23 = vpop.f32.mrf.mxu0 }
 0x40d   :  { %v4368_v22 = vmax.f32 %v4349_v9, %v4354_v23 }
 0x40e   :  { %v4356_v14 = vpop.f32.mrf.mxu0 }
 0x411   :  { %v4359_v50 = vpop.f32.mrf.mxu0 }
 0x413   :  { %v4361_v49 = vpop.f32.mrf.mxu0 }
 0x416   :  { %v4364_v54 = vpop.f32.mrf.mxu0 }
 0x417   :  { %v4369_v17 = vmax.f32 %v4359_v50, %v4364_v54 }
 0x418   :  { %v4366_v52 = vpop.f32.mrf.mxu0 }
 0x419   :  { %v9705_v53 = vmax.f32 %v4368_v22, %v4369_v17 }
 0x430   :  { %v4491_v11 = vpop.f32.mrf.mxu1 }
 0x431   :  { %v4505_v21 = vmax.f32 %v4486_v15, %v4491_v11 }
 0x432   :  { %v4493_v32 = vpop.f32.mrf.mxu1 }
 0x435   :  { %v4496_v25 = vpop.f32.mrf.mxu1 }
 0x437   :  { %v4498_v45 = vpop.f32.mrf.mxu1 }
 0x43a   :  { %v4501_v12 = vpop.f32.mrf.mxu1 }
 0x43b   :  { %v4506_v57 = vmax.f32 %v4496_v25, %v4501_v12  ;;  %v4371_v25 = vstv %s5457_s6 }
 0x43c   :  { %v4503_v60 = vpop.f32.mrf.mxu1 }
 0x43d   :  { %v9708_v0 = vmax.f32 %v4505_v21, %v4506_v57 }
 0x43e   :  { %v4622_v61 = vpop.f32.mrf.mxu0 }
 0x440   :  { %v4624_v46 = vpop.f32.mrf.mxu0  ;;  %v4758_v28 = vpop.f32.mrf.mxu1 }
 0x442   :  { %v4760_v43 = vpop.f32.mrf.mxu1 }
 0x443   :  { %v4508_v43 = vadd.f32 %v9708_v0, %v4371_v25  ;;  %v5194_v0 = vld [vmem:[#allocation11 + $0x10] sm:$0xff] }
 0x444   :  { %v4627_v37 = vpop.f32.mrf.mxu0 }
 0x445   :  { %v4641_v18 = vmax.f32 %v4622_v61, %v4627_v37 }
 0x446   :  { %v4629_v27 = vpop.f32.mrf.mxu0 }
 0x449   :  { %v4632_v48 = vpop.f32.mrf.mxu0 }
 0x44b   :  { %v4634_v51 = vpop.f32.mrf.mxu0 }
 0x44e   :  { %v4637_v62 = vpop.f32.mrf.mxu0 }
 0x44f   :  { %v4642_v19 = vmax.f32 %v4632_v48, %v4637_v62  ;;  %v4509_v48 = vmax.f32 %v4508_v43, 0.0  ;;  %v5192_v62 = vld [vmem:[#allocation11] sm:$0xff] }
 0x450   :  { %v4639_v8 = vpop.f32.mrf.mxu0 }
 0x451   :  { %v4643_v44 = vmax.f32 %v4641_v18, %v4642_v19  ;;  %v4372_v18 = vadd.f32 %v4371_v25, %v9705_v53  ;;  %v5193_v53 = vld [vmem:[#allocation11 + $0x8] sm:$0xff]  ;;  %v5195_v19 = vld [vmem:[#allocation11 + $0x18] sm:$0xff]  ;;  %v5196_v8 = vld [vmem:[#allocation11 + $0x20] sm:$0xff] }
 0x453   :  { %v4644_v46 = vadd.f32 %v4643_v44, %v4371_v25  ;;  %v4373_v51 = vmax.f32 %v4372_v18, 0.0  ;;  %v5197_v44 = vld [vmem:[#allocation11 + $0x28] sm:$0xff] }
 0x455   :  { %v4645_v27 = vmax.f32 %v4644_v46, 0.0 }
 0x46e   :  { %v4763_v42 = vpop.f32.mrf.mxu1 }
 0x46f   :  { %v4777_v20 = vmax.f32 %v4758_v28, %v4763_v42  ;;  %v5198_v42 = vld [vmem:[#allocation11 + $0x30] sm:$0x3] }
 0x470   :  { %v4765_v30 = vpop.f32.mrf.mxu1 }
 0x471   :  { %v5337_v30 = vld [vmem:[%s9758_s5] sm:$0xff] }
 0x473   :  { %v4768_v38 = vpop.f32.mrf.mxu1 }
 0x475   :  { %v4894_v1 = vpop.f32.mrf.mxu0  ;;  %v4770_v58 = vpop.f32.mrf.mxu1 }
 0x477   :  { %v4896_v16 = vpop.f32.mrf.mxu0  ;;  %v4773_v29 = vpop.f32.mrf.mxu1 }
 0x478   :  { %v4778_v10 = vmax.f32 %v4768_v38, %v4773_v29  ;;  %v7481_v38 = vmov 0  }
 0x479   :  { %v4775_v31 = vpop.f32.mrf.mxu1  ;;  %7327 = vset.pattern.permute.xlu0 %v7481_v38 }
 0x47a   :  { %v4779_v24 = vmax.f32 %v4777_v20, %v4778_v10  ;;  %v4899_v13 = vpop.f32.mrf.mxu0  ;;  %v5335_v20 = vld [vmem:[#allocation13] sm:$0xff]  ;;  %5341 = vperm.xlu0 %7327, %v5337_v30  }
 0x47b   :  { %v4913_v49 = vmax.f32 %v4894_v1, %v4899_v13  ;;  %v5338_v1 = vld [vmem:[%s9758_s5 + $0x8] sm:$0x3]  ;;  %s7482_s5 = smov [#allocation15]  }
 0x47c   :  { %v4901_v47 = vpop.f32.mrf.mxu0  ;;  %v5030_v35 = vpop.f32.mrf.mxu1  ;;  %v4780_v60 = vadd.f32 %v4779_v24, %v4371_v25  ;;  %s5442_s12 = sshll.u32 %s7482_s5, 4  ;;  %s5443_s12 = int_to_ptr.vmem [resolvable:$true] %s5442_s12 }
 0x47d   :  { %s7436_s15 = scalar_lea.vmem %s5443_s12, 256  ;;  %p7441_p12 = scmp.lt.s32.totalorder %s5443_s12, %s5443_s12 }
 0x47e   :  { %v4904_v34 = vpop.f32.mrf.mxu0  ;;  %v5032_v6 = vpop.f32.mrf.mxu1  ;;  %v4781_v37 = vmax.f32 %v4780_v60, 0.0  ;;  %5346 = vperm.xlu0 %7327, %v5338_v1   ;;  %p7437_p11 = scmp.ne.s32.totalorder %s5443_s12, %s7436_s15  ;;  %p7442_p13 = scmp.lt.s32.totalorder %s7436_s15, %s7436_s15 }
 0x480   :  { %v4906_v36 = vpop.f32.mrf.mxu0  ;;  %v5035_v5 = vpop.f32.mrf.mxu1  ;;  %p7443_p0 = por %p7442_p13, %p7441_p12 }
 0x481   :  { %v5049_v3 = vmax.f32 %v5030_v35, %v5035_v5 }
 0x482   :  { %v4909_v55 = vpop.f32.mrf.mxu0  ;;  %v5037_v63 = vpop.f32.mrf.mxu1  ;;  %p7444_p1 = pnand %p7443_p0, %p7437_p11 }
 0x483   :  { %v4914_v14 = vmax.f32 %v4904_v34, %v4909_v55 }
 0x484   :  { %v4911_v4 = vpop.f32.mrf.mxu0  ;;  %v5040_v33 = vpop.f32.mrf.mxu1 }
 0x485   :  { %v4915_v21 = vmax.f32 %v4913_v49, %v4914_v14 }
 0x486   :  { %v5042_v26 = vpop.f32.mrf.mxu1 }
 0x487   :  { %v4916_v12 = vadd.f32 %v4915_v21, %v4371_v25 }
 0x488   :  { %v5045_v7 = vpop.f32.mrf.mxu1 }
 0x489   :  { %v5050_v23 = vmax.f32 %v5040_v33, %v5045_v7  ;;  %v4917_v28 = vmax.f32 %v4916_v12, 0.0 }
 0x48a   :  { %v5047_v56 = vpop.f32.mrf.mxu1 }
 0x48b   :  { %v5051_v54 = vmax.f32 %v5049_v3, %v5050_v23 }
 0x48d   :  { %v5052_v45 = vadd.f32 %v5051_v54, %v4371_v25 }
 0x48f   :  { %v5053_v61 = vmax.f32 %v5052_v45, 0.0 }
 0x4a6   :  { %v5166_v2 = vpop.f32.mrf.mxu0 }
 0x4a8   :  { %v5168_v59 = vpop.f32.mrf.mxu0 }
 0x4aa   :  { %v5171_v9 = vpop.f32.mrf.mxu0 }
 0x4ab   :  { %v5185_v17 = vmax.f32 %v5166_v2, %v5171_v9  ;;  %v5336_v2 = vld [vmem:[#allocation13 + $0x8] sm:$0x3] }
 0x4ac   :  { %v5173_v15 = vpop.f32.mrf.mxu0 }
 0x4ae   :  { %v5176_v41 = vpop.f32.mrf.mxu0 }
 0x4b0   :  { %v5178_v22 = vpop.f32.mrf.mxu0 }
 0x4b2   :  { %v5181_v50 = vpop.f32.mrf.mxu0 }
 0x4b3   :  { %v5186_v52 = vmax.f32 %v5176_v41, %v5181_v50 }
 0x4b4   :  { %v5183_v11 = vpop.f32.mrf.mxu0 }
 0x4b5   :  { %v5187_v32 = vmax.f32 %v5185_v17, %v5186_v52 }
 0x4b7   :  { %v5188_v40 = vadd.f32 %v5187_v32, %v4371_v25 }
 0x4b9   :  { %v5189_v57 = vmax.f32 %v5188_v40, 0.0 }
 0x4bb   :  { %7259 = vmatpush3.msra.mxu1 %v5189_v57 }
 0x4bc   :  { %7260 = vmatprep.subr.mxu1 %v9876_v39 }
 0x4bd   :  { %7261 = vmatpush3.msra.mxu1 %v5053_v61 }
 0x4be   :  { %7262 = vmatprep.subr.mxu1 %v9876_v39 }
 0x4bf   :  { %7263 = vmatpush3.msra.mxu1 %v4917_v28 }
 0x4c0   :  { %7264 = vmatprep.subr.mxu1 %v9876_v39 }
 0x4c1   :  { %7265 = vmatpush3.msra.mxu1 %v4781_v37 }
 0x4c2   :  { %7266 = vmatprep.subr.mxu1 %v9876_v39 }
 0x4c3   :  { %7267 = vmatpush3.msra.mxu1 %v4645_v27 }
 0x4c4   :  { %7268 = vmatprep.subr.mxu1 %v9876_v39 }
 0x4c5   :  { %7269 = vmatpush3.msra.mxu1 %v4509_v48 }
 0x4c6   :  { %7270 = vmatprep.subr.mxu1 %v9876_v39 }
 0x4c7   :  { %7271 = vmatpush3.msra.mxu1 %v4373_v51 }
 0x4c8   :  { %7273 = vmatmul.mubr.msk.f32.vlgmr.msra.gmra.mxu1 %vm4270_vm0, %v5192_v62 }
 0x4c9   :  { %7275 = vmatprep.mubr.msk.f32.mxu1 %vm7480_vm1, %v9876_v39 }
 0x4cc   :  { %7276 = vmatmul.mubr.msk.f32.gmra.mxu1 %vm4270_vm0, %v5193_v53 }
 0x4cd   :  { %7278 = vmatprep.mubr.msk.f32.mxu1 %vm7480_vm1, %v9876_v39 }
 0x4d0   :  { %7279 = vmatmul.mubr.msk.f32.gmra.mxu1 %vm4270_vm0, %v5194_v0 }
 0x4d1   :  { %7281 = vmatprep.mubr.msk.f32.mxu1 %vm7480_vm1, %v9876_v39 }
 0x4d4   :  { %7282 = vmatmul.mubr.msk.f32.gmra.mxu1 %vm4270_vm0, %v5195_v19 }
 0x4d5   :  { %7284 = vmatprep.mubr.msk.f32.mxu1 %vm7480_vm1, %v9876_v39 }
 0x4d8   :  { %7285 = vmatmul.mubr.msk.f32.gmra.mxu1 %vm4270_vm0, %v5196_v8 }
 0x4d9   :  { %7287 = vmatprep.mubr.msk.f32.mxu1 %vm7480_vm1, %v9876_v39 }
 0x4dc   :  { %7288 = vmatmul.mubr.msk.f32.gmra.mxu1 %vm4270_vm0, %v5197_v44 }
 0x4dd   :  { %7290 = vmatprep.mubr.msk.f32.mxu1 %vm7480_vm1, %v9876_v39 }
 0x4e0   :  { %7291 = vmatmul.mubr.msk.f32.gmra.mxu1 %vm4270_vm0, %v5198_v42 }
 0x4e1   :  { %7307 = vmatprep.mubr.msk.f32.mxu1 %vm5349_vm2, %v5335_v20 }
 0x4f5   :  { %v5342_v59 = vpop.permute.xlu0 %5341 }
 0x4f9   :  { %v5347_v15 = vpop.permute.xlu0 %5346 }
 0x588   :  { %v5294_v39 = vpop.f32.mrf.mxu1 }
 0x589   :  { %v5328_v56 = vmax.f32 %v5294_v39, 0.0 }
 0x58a   :  { %v7274_v58 = vpop.f32.mrf.mxu1 }
 0x58c   :  { %v5299_v16 = vpop.f32.mrf.mxu1 }
 0x58d   :  { %v5329_v7 = vmax.f32 %v5299_v16, 0.0 }
 0x58e   :  { %v7277_v29 = vpop.f32.mrf.mxu1 }
 0x590   :  { %v5304_v10 = vpop.f32.mrf.mxu1 }
 0x591   :  { %v5330_v26 = vmax.f32 %v5304_v10, 0.0 }
 0x592   :  { %v7280_v31 = vpop.f32.mrf.mxu1 }
 0x594   :  { %v5309_v24 = vpop.f32.mrf.mxu1 }
 0x595   :  { %v5331_v33 = vmax.f32 %v5309_v24, 0.0 }
 0x596   :  { %v7283_v13 = vpop.f32.mrf.mxu1 }
 0x598   :  { %v5314_v47 = vpop.f32.mrf.mxu1 }
 0x599   :  { %v5332_v4 = vmax.f32 %v5314_v47, 0.0 }
 0x59a   :  { %v7286_v35 = vpop.f32.mrf.mxu1 }
 0x59c   :  { %v5319_v34 = vpop.f32.mrf.mxu1 }
 0x59d   :  { %v5333_v63 = vmax.f32 %v5319_v34, 0.0 }
 0x59e   :  { %v7289_v6 = vpop.f32.mrf.mxu1 }
 0x5a0   :  { %v5324_v36 = vpop.f32.mrf.mxu1 }
 0x5a1   :  { %v5334_v5 = vmax.f32 %v5324_v36, 0.0 }
 0x5a2   :  { %v7292_v55 = vpop.f32.mrf.mxu1 }
 0x5a3   :  { %7293 = vmatprep.subr.msk.mxu1 %vm5356_vm3, %v5334_v5 }
 0x5a4   :  { %7294 = vmatpush3.msk.msra.mxu1 %vm5356_vm3, %v5334_v5 }
 0x5a5   :  { %7295 = vmatprep.subr.mxu1 %v5333_v63 }
 0x5a6   :  { %7296 = vmatpush3.msra.mxu1 %v5333_v63 }
 0x5a7   :  { %7297 = vmatprep.subr.mxu1 %v5332_v4 }
 0x5a8   :  { %7298 = vmatpush3.msra.mxu1 %v5332_v4 }
 0x5a9   :  { %7299 = vmatprep.subr.mxu1 %v5331_v33 }
 0x5aa   :  { %7300 = vmatpush3.msra.mxu1 %v5331_v33 }
 0x5ab   :  { %7301 = vmatprep.subr.mxu1 %v5330_v26 }
 0x5ac   :  { %7302 = vmatpush3.msra.mxu1 %v5330_v26 }
 0x5ad   :  { %7303 = vmatprep.subr.mxu1 %v5329_v7 }
 0x5ae   :  { %7304 = vmatpush3.msra.mxu1 %v5329_v7 }
 0x5af   :  { %7305 = vmatprep.subr.mxu1 %v5328_v56 }
 0x5b0   :  { %7306 = vmatpush3.msra.mxu1 %v5328_v56 }
 0x5b1   :  { %7308 = vmatmul.mubr.msk.f32.vlgmr.msra.gmra.mxu1 %vm5349_vm2, %v5336_v2 }
 0x671   :  { %v7309_v9 = vpop.f32.mrf.mxu1 }
 0x672   :  { %v5432_v41 = vadd.f32 %v7309_v9, %v5347_v15 }
 0x673   :  { %v5426_v3 = vpop.f32.mrf.mxu1 }
 0x674   :  { %5436 = vst [vmem:[#allocation15 + $0x8] sm:$0x3] %v5432_v41  ;;  %v5427_v23 = vadd.f32 %v5426_v3, %v5342_v59 }
 0x676   :  { %5435 = vst [vmem:[#allocation15] sm:$0xff] %v5427_v23 }
 0x677   :  { %7447 = shalt.err (!%p7444_p1)
}
 0x678   :  { %5448 = dma.vmem_to_hbm [thread:$0]  %s5443_s12, 256, %s9760_s7, [#allocation6], %s7471_s13, %s7471_s13, %s7472_s14  }
 0x679   :  { %7464 = dma.done.wait [#allocation6], 256  }
 0x67a   :  { %7465 = vsyncadd [#allocation6], 4294967040 }
 0x67b   :  { %5452 = vsyncpa [#allocation5], 1 }
 0x67c   :  { %5453 = vsyncpa [#allocation9], 1 }
 0x67d   :  { %5454 = vsyncpa [#allocation12], 1 }
 0x67e   :  { %5455 = vsyncpa [#allocation6], 1 }
 0x67f   :  { %5456 = vsyncpa [#allocation7], 1 }

</bundles_post_ra>
